<compile_context>
chip_gen: v5e
topology: v5e:2x2
jax: 0.10.0
libtpu: 0.0.40
codegen_flags: <defaults>
</compile_context>

<pallas_src>
import numpy as np
import jax
import jax.numpy as jnp
from jax.experimental import pallas as pl
from jax.experimental.pallas import tpu as pltpu

_VMEM_LIMIT = 64 * 1024 * 1024


# ----------------------------------------------------------------------------
# tiling helpers
# ----------------------------------------------------------------------------
def _row_tile(n):
    """Output row-slab height; keep >= 2 tiles when possible (v7x megacore)."""
    if n % 256 == 0 and n >= 512:
        return 256
    if n % 128 == 0:
        return 128
    return n


def _fused_fits_vmem(n, tm, budget=48 * 1024 * 1024):
    """Rough double-buffered VMEM footprint of the fused single-pass kernel."""
    const = 2 * (4 * n * n * 2)          # ur/ui/dct_r/dct_i (bf16), 2 buffers
    slabs = 2 * 20 * tm * n              # dc (bf16) + pc / out (f32) row slabs
    temps = 40 * tm * n                  # in-kernel f32/bf16 temporaries
    return const + slabs + temps <= budget


def _pick_tiles(n):
    """Tiles for the K-tiled fallback path (only used when n % 128 == 0)."""
    tm = 256 if n % 256 == 0 else 128
    tn = 256 if n % 256 == 0 else 128
    tk = 512 if n % 512 == 0 else (256 if n % 256 == 0 else 128)
    return tm, tn, tk


# ----------------------------------------------------------------------------
# U = field * Hc   (elementwise, computed once, bf16 output for the MXU)
# ----------------------------------------------------------------------------
def _u_kernel(fr_ref, fi_ref, hr_ref, hi_ref, ur_ref, ui_ref):
    fr = fr_ref[...]
    fi = fi_ref[...]
    hr = hr_ref[...]
    hi = hi_ref[...]
    ur_ref[...] = (fr * hr - fi * hi).astype(ur_ref.dtype)
    ui_ref[...] = (fr * hi + fi * hr).astype(ui_ref.dtype)


def _compute_u(fr, fi, hr, hi):
    n = fr.shape[0]
    tu = 128 if n % 128 == 0 else n
    spec = pl.BlockSpec((tu, n), lambda i: (i, 0))
    return pl.pallas_call(
        _u_kernel,
        out_shape=(jax.ShapeDtypeStruct((n, n), jnp.bfloat16),
                   jax.ShapeDtypeStruct((n, n), jnp.bfloat16)),
        grid=(n // tu,),
        in_specs=[spec, spec, spec, spec],
        out_specs=(spec, spec),
        compiler_params=pltpu.CompilerParams(
            dimension_semantics=("parallel",),
            vmem_limit_bytes=_VMEM_LIMIT),
    )(fr, fi, hr, hi)


# ----------------------------------------------------------------------------
# Fused single-pass kernel:  O_i = Pc_i * ( (Dc_i @ U) @ Dc^T )
# Grid only over output row slabs i; U and Dc^T are full-resident in VMEM and
# (index_map constant in i) fetched once per core.  T never leaves VMEM.
# ----------------------------------------------------------------------------
def _fused_kernel(dc_r_ref, dc_i_ref, ur_ref, ui_ref, dtr_ref, dti_ref,
                  pr_ref, pi_ref, or_ref, oi_ref):
    ar = dc_r_ref[...]          # (tm, N) bf16 row slab of Dc
    ai = dc_i_ref[...]
    ur = ur_ref[...]            # (N, N)  bf16 U = field * Hc
    ui = ui_ref[...]

    # stage 1: T = Dc_i @ U   (bf16 operands, f32 accumulation)
    tr = (jnp.dot(ar, ur, preferred_element_type=jnp.float32)
          - jnp.dot(ai, ui, preferred_element_type=jnp.float32))
    ti = (jnp.dot(ar, ui, preferred_element_type=jnp.float32)
          + jnp.dot(ai, ur, preferred_element_type=jnp.float32))

    # stage 2: V = T @ Dc^T   (bf16 operands, f32 accumulation)
    trb = tr.astype(jnp.bfloat16)
    tib = ti.astype(jnp.bfloat16)
    br = dtr_ref[...]           # (N, N) bf16 Dc^T
    bi = dti_ref[...]
    vr = (jnp.dot(trb, br, preferred_element_type=jnp.float32)
          - jnp.dot(tib, bi, preferred_element_type=jnp.float32))
    vi = (jnp.dot(trb, bi, preferred_element_type=jnp.float32)
          + jnp.dot(tib, br, preferred_element_type=jnp.float32))

    # epilogue: multiply by the prefactor (f32)
    pr = pr_ref[...]
    pi = pi_ref[...]
    or_ref[...] = pr * vr - pi * vi
    oi_ref[...] = pr * vi + pi * vr


def _fused(dc_r, dc_i, ur, ui, dtr, dti, pc_r, pc_i):
    n = dc_r.shape[0]
    tm = _row_tile(n)
    row = pl.BlockSpec((tm, n), lambda i: (i, 0))
    full = pl.BlockSpec((n, n), lambda i: (0, 0))
    return pl.pallas_call(
        _fused_kernel,
        out_shape=(jax.ShapeDtypeStruct((n, n), jnp.float32),
                   jax.ShapeDtypeStruct((n, n), jnp.float32)),
        grid=(n // tm,),
        in_specs=[row, row, full, full, full, full, row, row],
        out_specs=(row, row),
        compiler_params=pltpu.CompilerParams(
            dimension_semantics=("parallel",),
            vmem_limit_bytes=_VMEM_LIMIT),
    )(dc_r, dc_i, ur, ui, dtr, dti, pc_r, pc_i)


# ----------------------------------------------------------------------------
# Fallback for large N (full planes no longer fit VMEM): two K-tiled complex
# matmuls, bf16 operands, bf16 intermediate T, f32 accumulator scratch.
# ----------------------------------------------------------------------------
def _stage1_kernel(ar_ref, ai_ref, br_ref, bi_ref, tr_ref, ti_ref, acc_r, acc_i):
    @pl.when(pl.program_id(2) == 0)
    def _():
        acc_r[...] = jnp.zeros_like(acc_r)
        acc_i[...] = jnp.zeros_like(acc_i)

    ar = ar_ref[...]
    ai = ai_ref[...]
    br = br_ref[...]
    bi = bi_ref[...]
    acc_r[...] += (jnp.dot(ar, br, preferred_element_type=jnp.float32)
                   - jnp.dot(ai, bi, preferred_element_type=jnp.float32))
    acc_i[...] += (jnp.dot(ar, bi, preferred_element_type=jnp.float32)
                   + jnp.dot(ai, br, preferred_element_type=jnp.float32))

    @pl.when(pl.program_id(2) == pl.num_programs(2) - 1)
    def _():
        tr_ref[...] = acc_r[...].astype(tr_ref.dtype)
        ti_ref[...] = acc_i[...].astype(ti_ref.dtype)


def _stage1(dc_r, dc_i, ur, ui):
    n = dc_r.shape[0]
    tm, tn, tk = _pick_tiles(n)
    grid = (n // tm, n // tn, n // tk)
    lhs = pl.BlockSpec((tm, tk), lambda i, j, k: (i, k))
    rhs = pl.BlockSpec((tk, tn), lambda i, j, k: (k, j))
    out = pl.BlockSpec((tm, tn), lambda i, j, k: (i, j))
    return pl.pallas_call(
        _stage1_kernel,
        out_shape=(jax.ShapeDtypeStruct((n, n), jnp.bfloat16),
                   jax.ShapeDtypeStruct((n, n), jnp.bfloat16)),
        grid=grid,
        in_specs=[lhs, lhs, rhs, rhs],
        out_specs=(out, out),
        scratch_shapes=[pltpu.VMEM((tm, tn), jnp.float32),
                        pltpu.VMEM((tm, tn), jnp.float32)],
        compiler_params=pltpu.CompilerParams(
            dimension_semantics=("parallel", "parallel", "arbitrary"),
            vmem_limit_bytes=_VMEM_LIMIT),
    )(dc_r, dc_i, ur, ui)


def _stage2_kernel(ar_ref, ai_ref, br_ref, bi_ref, pr_ref, pi_ref,
                   or_ref, oi_ref, acc_r, acc_i):
    @pl.when(pl.program_id(2) == 0)
    def _():
        acc_r[...] = jnp.zeros_like(acc_r)
        acc_i[...] = jnp.zeros_like(acc_i)

    ar = ar_ref[...]
    ai = ai_ref[...]
    br = br_ref[...]
    bi = bi_ref[...]
    acc_r[...] += (jnp.dot(ar, br, preferred_element_type=jnp.float32)
                   - jnp.dot(ai, bi, preferred_element_type=jnp.float32))
    acc_i[...] += (jnp.dot(ar, bi, preferred_element_type=jnp.float32)
                   + jnp.dot(ai, br, preferred_element_type=jnp.float32))

    @pl.when(pl.program_id(2) == pl.num_programs(2) - 1)
    def _():
        pr = pr_ref[...]
        pi = pi_ref[...]
        vr = acc_r[...]
        vi = acc_i[...]
        or_ref[...] = pr * vr - pi * vi
        oi_ref[...] = pr * vi + pi * vr


def _stage2(tr, ti, dtr, dti, pc_r, pc_i):
    n = tr.shape[0]
    tm, tn, tk = _pick_tiles(n)
    grid = (n // tm, n // tn, n // tk)
    lhs = pl.BlockSpec((tm, tk), lambda i, j, k: (i, k))
    rhs = pl.BlockSpec((tk, tn), lambda i, j, k: (k, j))
    out = pl.BlockSpec((tm, tn), lambda i, j, k: (i, j))
    return pl.pallas_call(
        _stage2_kernel,
        out_shape=(jax.ShapeDtypeStruct((n, n), jnp.float32),
                   jax.ShapeDtypeStruct((n, n), jnp.float32)),
        grid=grid,
        in_specs=[lhs, lhs, rhs, rhs, out, out],
        out_specs=(out, out),
        scratch_shapes=[pltpu.VMEM((tm, tn), jnp.float32),
                        pltpu.VMEM((tm, tn), jnp.float32)],
        compiler_params=pltpu.CompilerParams(
            dimension_semantics=("parallel", "parallel", "arbitrary"),
            vmem_limit_bytes=_VMEM_LIMIT),
    )(tr, ti, dtr, dti, pc_r, pc_i)


# ----------------------------------------------------------------------------
# forward
# ----------------------------------------------------------------------------
@jax.jit
def _fresnel_forward(field, dc_r, dc_i, dct_r, dct_i, hc_r, hc_i, pc_r, pc_i):
    n = field.shape[-1]
    fr = jnp.real(field).astype(jnp.float32)
    fi = jnp.imag(field).astype(jnp.float32)
    ur, ui = _compute_u(fr, fi, hc_r, hc_i)          # U = field * Hc (bf16)

    tm = _row_tile(n)
    if _fused_fits_vmem(n, tm):
        our, oui = _fused(dc_r, dc_i, ur, ui, dct_r, dct_i, pc_r, pc_i)
    elif n % 128 == 0:
        tr, ti = _stage1(dc_r, dc_i, ur, ui)
        our, oui = _stage2(tr, ti, dct_r, dct_i, pc_r, pc_i)
    else:
        # TODO(synk): pad N up to a multiple of 128/256 for very large,
        # non-aligned simulation sizes instead of raising.
        raise NotImplementedError(
            f"N={n}: too large for full-plane VMEM residency and not a "
            f"multiple of 128")
    return jax.lax.complex(our, oui)


# ----------------------------------------------------------------------------
# Module wrapper (mirrors One_Step_Prop_NC.__init__ / forward)
# ----------------------------------------------------------------------------
class OneStepPropNC:
    def __init__(self, wavelength, dx, distance, N, padding=1 / 2):
        self.wavelength = float(wavelength)
        self.dx = float(dx)
        self.distance = float(distance)
        self.N = int(N)
        self.padding = float(padding)
        self.dx_new = wavelength * distance / (2 * N * dx)

        k = 2.0 * np.pi / self.wavelength
        M = int((1 + 2 * self.padding) * N)           # padded simulation size
        half = int((1 + 2 * self.padding) * N / 2)
        pad = int(self.padding * N)                   # crop / block offset
        self.M, self.pad = M, pad

        # Tables built in float64 on host (phases span 1e2-1e3 rad), then cast.
        coords = np.linspace(-half, half, M, dtype=np.float64) * self.dx
        coords2 = np.linspace(-half, half, M, dtype=np.float64) * self.dx_new
        X, Y = np.meshgrid(coords, coords, indexing="ij")
        X2, Y2 = np.meshgrid(coords2, coords2, indexing="ij")
        H = np.exp(1j * (k / (2.0 * self.distance)) * (X ** 2 + Y ** 2))
        prefactor = (np.exp(1j * (k / (2.0 * self.distance)) * (X2 ** 2 + Y2 ** 2))
                     * (self.dx ** 2 / (1j * self.distance * self.wavelength)))

        # Full tables kept (complex64) for parity with the torch attributes /
        # the pure-FFT reference used in the self-test.
        self.H = jnp.asarray(H, dtype=jnp.complex64)
        self.prefactor = jnp.asarray(prefactor, dtype=jnp.complex64)

        # Shifted M x M DFT matrix:  D @ x == fftshift(fft(ifftshift(x))).
        eye = np.eye(M, dtype=np.complex128)
        D = np.fft.fftshift(
            np.fft.fft(np.fft.ifftshift(eye, axes=0), axis=0), axes=0)

        # Zero padding + center crop collapse the padded pipeline to the
        # central N x N blocks of D / H / prefactor (see header comment).
        Dc = D[pad:pad + N, pad:pad + N]
        Hc = H[pad:pad + N, pad:pad + N]
        Pc = prefactor[pad:pad + N, pad:pad + N]

        bf16, f32 = jnp.bfloat16, jnp.float32
        # D tables in bf16: MXU operands (f32 accumulation in-kernel).
        self._dc_r = jnp.asarray(np.ascontiguousarray(Dc.real), bf16)
        self._dc_i = jnp.asarray(np.ascontiguousarray(Dc.imag), bf16)
        self._dct_r = jnp.asarray(np.ascontiguousarray(Dc.T.real), bf16)
        self._dct_i = jnp.asarray(np.ascontiguousarray(Dc.T.imag), bf16)
        # H / prefactor stay f32 (elementwise only, no quantization needed).
        self._hc_r = jnp.asarray(np.ascontiguousarray(Hc.real), f32)
        self._hc_i = jnp.asarray(np.ascontiguousarray(Hc.imag), f32)
        self._pc_r = jnp.asarray(np.ascontiguousarray(Pc.real), f32)
        self._pc_i = jnp.asarray(np.ascontiguousarray(Pc.imag), f32)

    def __call__(self, field):
        # TODO(synk): only square 2-D (N, N) fields; batched leading dims of the
        # torch forward are not supported here.
        assert field.shape[-2] == self.N and field.shape[-1] == self.N
        return _fresnel_forward(field.astype(jnp.complex64),
                                self._dc_r, self._dc_i,
                                self._dct_r, self._dct_i,
                                self._hc_r, self._hc_i,
                                self._pc_r, self._pc_i)


# ----------------------------------------------------------------------------
# Pure-JAX reference (follows the torch forward exactly: pad -> *H -> ft2 ->
# *prefactor -> center crop)
# ----------------------------------------------------------------------------
def reference_forward(prop, field):
    N = field.shape[-2]
    pad = int(prop.padding * N)
    Ein = jnp.pad(field.astype(jnp.complex64), ((pad, pad), (pad, pad)),
                  mode="constant", constant_values=0)
    U = Ein * prop.H
    ft2 = jnp.fft.fftshift(
        jnp.fft.fft2(jnp.fft.ifftshift(U, axes=(-2, -1)), norm="backward"),
        axes=(-2, -1))
    Ein_fft = prop.prefactor * ft2
    return Ein_fft[pad:pad + N, pad:pad + N]


if __name__ == "__main__":
    # Deterministic configuration: N=256 -> padded simulation size M=512,
    # kernel matmuls run on the cropped N x N blocks only (fused path,
    # grid (2,) "parallel" -> both v7x TensorCores busy).
    N = 256
    wavelength = 0.5e-6
    dx = 10e-6
    distance = 0.1

    prop = OneStepPropNC(wavelength, dx, distance, N)

    key = jax.random.PRNGKey(0)
    kr, ki = jax.random.split(key)
    field = (jax.random.normal(kr, (N, N), dtype=jnp.float32)
             + 1j * jax.random.normal(ki, (N, N), dtype=jnp.float32)
             ).astype(jnp.complex64)

    out = jax.block_until_ready(prop(field))
    ref = jax.block_until_ready(reference_forward(prop, field))

    rel_err = jnp.linalg.norm(out - ref) / (jnp.linalg.norm(ref) + 1e-30)
    assert out.shape == (N, N)
    # bf16 MXU operands with f32 accumulation: expected rel err ~3e-3.
    assert bool(rel_err < 1e-2), f"relative error too large: {rel_err}"

    print("KERNEL_OK")
</pallas_src>

<mosaic_0001>
module attributes {stable_mosaic.version = 11 : i64} {
  func.func @_u_kernel(%arg0: i32, %arg1: memref<128x256xf32, #tpu.memory_space<vmem>>, %arg2: memref<128x256xf32, #tpu.memory_space<vmem>>, %arg3: memref<128x256xf32, #tpu.memory_space<vmem>>, %arg4: memref<128x256xf32, #tpu.memory_space<vmem>>, %arg5: memref<128x256xbf16, #tpu.memory_space<vmem>>, %arg6: memref<128x256xbf16, #tpu.memory_space<vmem>>) attributes {dimension_semantics = [#tpu.dimension_semantics<parallel>], iteration_bounds = array<i64: 2>, scalar_prefetch = 0 : i64, scratch_operands = 0 : i64, tpu.core_type = #tpu.core_type<tc>, window_params = [{transform_indices = @transform_0, window_bounds = array<i64: 128, 256>}, {transform_indices = @transform_1, window_bounds = array<i64: 128, 256>}, {transform_indices = @transform_2, window_bounds = array<i64: 128, 256>}, {transform_indices = @transform_3, window_bounds = array<i64: 128, 256>}, {transform_indices = @transform_4, window_bounds = array<i64: 128, 256>}, {transform_indices = @transform_5, window_bounds = array<i64: 128, 256>}]} {
    %c0 = arith.constant 0 : index
    %c0_0 = arith.constant 0 : index
    %0 = vector.load %arg1[%c0, %c0_0] : memref<128x256xf32, #tpu.memory_space<vmem>>, vector<128x256xf32>
    %c0_1 = arith.constant 0 : index
    %c0_2 = arith.constant 0 : index
    %1 = vector.load %arg2[%c0_1, %c0_2] : memref<128x256xf32, #tpu.memory_space<vmem>>, vector<128x256xf32>
    %c0_3 = arith.constant 0 : index
    %c0_4 = arith.constant 0 : index
    %2 = vector.load %arg3[%c0_3, %c0_4] : memref<128x256xf32, #tpu.memory_space<vmem>>, vector<128x256xf32>
    %c0_5 = arith.constant 0 : index
    %c0_6 = arith.constant 0 : index
    %3 = vector.load %arg4[%c0_5, %c0_6] : memref<128x256xf32, #tpu.memory_space<vmem>>, vector<128x256xf32>
    %4 = arith.mulf %0, %2 : vector<128x256xf32>
    %5 = arith.mulf %1, %3 : vector<128x256xf32>
    %6 = arith.subf %4, %5 : vector<128x256xf32>
    %7 = arith.truncf %6 : vector<128x256xf32> to vector<128x256xbf16>
    %c0_7 = arith.constant 0 : index
    %c0_8 = arith.constant 0 : index
    %8 = vector.load %arg5[%c0_7, %c0_8] : memref<128x256xbf16, #tpu.memory_space<vmem>>, vector<128x256xbf16>
    tpu.vector_store %arg5[%c0_7, %c0_8], %7 {strides = array<i32>} : memref<128x256xbf16, #tpu.memory_space<vmem>>, vector<128x256xbf16>,
    %9 = arith.mulf %0, %3 : vector<128x256xf32>
    %10 = arith.mulf %1, %2 : vector<128x256xf32>
    %11 = arith.addf %9, %10 : vector<128x256xf32>
    %12 = arith.truncf %11 : vector<128x256xf32> to vector<128x256xbf16>
    %c0_9 = arith.constant 0 : index
    %c0_10 = arith.constant 0 : index
    %13 = vector.load %arg6[%c0_9, %c0_10] : memref<128x256xbf16, #tpu.memory_space<vmem>>, vector<128x256xbf16>
    tpu.vector_store %arg6[%c0_9, %c0_10], %12 {strides = array<i32>} : memref<128x256xbf16, #tpu.memory_space<vmem>>, vector<128x256xbf16>,
    return
  }
  func.func @transform_0(%arg0: i32) -> (i32, i32) {
    %c0_i32 = arith.constant 0 : i32
    %c0_i32_0 = arith.constant 0 : i32
    return %arg0, %c0_i32 : i32, i32
  }
  func.func @transform_1(%arg0: i32) -> (i32, i32) {
    %c0_i32 = arith.constant 0 : i32
    %c0_i32_0 = arith.constant 0 : i32
    return %arg0, %c0_i32 : i32, i32
  }
  func.func @transform_2(%arg0: i32) -> (i32, i32) {
    %c0_i32 = arith.constant 0 : i32
    %c0_i32_0 = arith.constant 0 : i32
    return %arg0, %c0_i32 : i32, i32
  }
  func.func @transform_3(%arg0: i32) -> (i32, i32) {
    %c0_i32 = arith.constant 0 : i32
    %c0_i32_0 = arith.constant 0 : i32
    return %arg0, %c0_i32 : i32, i32
  }
  func.func @transform_4(%arg0: i32) -> (i32, i32) {
    %c0_i32 = arith.constant 0 : i32
    %c0_i32_0 = arith.constant 0 : i32
    return %arg0, %c0_i32 : i32, i32
  }
  func.func @transform_5(%arg0: i32) -> (i32, i32) {
    %c0_i32 = arith.constant 0 : i32
    %c0_i32_0 = arith.constant 0 : i32
    return %arg0, %c0_i32 : i32, i32
  }
}

module attributes {stable_mosaic.version = 11 : i64} {
  func.func @_fused_kernel(%arg0: i32, %arg1: memref<128x256xbf16, #tpu.memory_space<vmem>>, %arg2: memref<128x256xbf16, #tpu.memory_space<vmem>>, %arg3: memref<256x256xbf16, #tpu.memory_space<vmem>>, %arg4: memref<256x256xbf16, #tpu.memory_space<vmem>>, %arg5: memref<256x256xbf16, #tpu.memory_space<vmem>>, %arg6: memref<256x256xbf16, #tpu.memory_space<vmem>>, %arg7: memref<128x256xf32, #tpu.memory_space<vmem>>, %arg8: memref<128x256xf32, #tpu.memory_space<vmem>>, %arg9: memref<128x256xf32, #tpu.memory_space<vmem>>, %arg10: memref<128x256xf32, #tpu.memory_space<vmem>>) attributes {dimension_semantics = [#tpu.dimension_semantics<parallel>], iteration_bounds = array<i64: 2>, scalar_prefetch = 0 : i64, scratch_operands = 0 : i64, tpu.core_type = #tpu.core_type<tc>, window_params = [{transform_indices = @transform_0, window_bounds = array<i64: 128, 256>}, {transform_indices = @transform_1, window_bounds = array<i64: 128, 256>}, {pipeline_mode = #tpu.pipeline_mode<synchronous>, transform_indices = @transform_2, window_bounds = array<i64: 256, 256>}, {pipeline_mode = #tpu.pipeline_mode<synchronous>, transform_indices = @transform_3, window_bounds = array<i64: 256, 256>}, {pipeline_mode = #tpu.pipeline_mode<synchronous>, transform_indices = @transform_4, window_bounds = array<i64: 256, 256>}, {pipeline_mode = #tpu.pipeline_mode<synchronous>, transform_indices = @transform_5, window_bounds = array<i64: 256, 256>}, {transform_indices = @transform_6, window_bounds = array<i64: 128, 256>}, {transform_indices = @transform_7, window_bounds = array<i64: 128, 256>}, {transform_indices = @transform_8, window_bounds = array<i64: 128, 256>}, {transform_indices = @transform_9, window_bounds = array<i64: 128, 256>}]} {
    %c0 = arith.constant 0 : index
    %c0_0 = arith.constant 0 : index
    %0 = vector.load %arg1[%c0, %c0_0] : memref<128x256xbf16, #tpu.memory_space<vmem>>, vector<128x256xbf16>
    %c0_1 = arith.constant 0 : index
    %c0_2 = arith.constant 0 : index
    %1 = vector.load %arg2[%c0_1, %c0_2] : memref<128x256xbf16, #tpu.memory_space<vmem>>, vector<128x256xbf16>
    %c0_3 = arith.constant 0 : index
    %c0_4 = arith.constant 0 : index
    %2 = vector.load %arg3[%c0_3, %c0_4] : memref<256x256xbf16, #tpu.memory_space<vmem>>, vector<256x256xbf16>
    %c0_5 = arith.constant 0 : index
    %c0_6 = arith.constant 0 : index
    %3 = vector.load %arg4[%c0_5, %c0_6] : memref<256x256xbf16, #tpu.memory_space<vmem>>, vector<256x256xbf16>
    %cst = arith.constant dense<0.000000e+00> : vector<128x256xf32>
    %4 = tpu.matmul %0, %2, %cst {dimension_numbers = #tpu.dot_dimension_numbers<[1], [0], [0], [1], [0, 0, 1, 1], [], []>} : vector<128x256xbf16>, vector<256x256xbf16>, vector<128x256xf32> -> vector<128x256xf32>
    %cst_7 = arith.constant dense<0.000000e+00> : vector<128x256xf32>
    %5 = tpu.matmul %1, %3, %cst_7 {dimension_numbers = #tpu.dot_dimension_numbers<[1], [0], [0], [1], [0, 0, 1, 1], [], []>} : vector<128x256xbf16>, vector<256x256xbf16>, vector<128x256xf32> -> vector<128x256xf32>
    %6 = arith.subf %4, %5 : vector<128x256xf32>
    %cst_8 = arith.constant dense<0.000000e+00> : vector<128x256xf32>
    %7 = tpu.matmul %0, %3, %cst_8 {dimension_numbers = #tpu.dot_dimension_numbers<[1], [0], [0], [1], [0, 0, 1, 1], [], []>} : vector<128x256xbf16>, vector<256x256xbf16>, vector<128x256xf32> -> vector<128x256xf32>
    %cst_9 = arith.constant dense<0.000000e+00> : vector<128x256xf32>
    %8 = tpu.matmul %1, %2, %cst_9 {dimension_numbers = #tpu.dot_dimension_numbers<[1], [0], [0], [1], [0, 0, 1, 1], [], []>} : vector<128x256xbf16>, vector<256x256xbf16>, vector<128x256xf32> -> vector<128x256xf32>
    %9 = arith.addf %7, %8 : vector<128x256xf32>
    %10 = arith.truncf %6 : vector<128x256xf32> to vector<128x256xbf16>
    %11 = arith.truncf %9 : vector<128x256xf32> to vector<128x256xbf16>
    %c0_10 = arith.constant 0 : index
    %c0_11 = arith.constant 0 : index
    %12 = vector.load %arg5[%c0_10, %c0_11] : memref<256x256xbf16, #tpu.memory_space<vmem>>, vector<256x256xbf16>
    %c0_12 = arith.constant 0 : index
    %c0_13 = arith.constant 0 : index
    %13 = vector.load %arg6[%c0_12, %c0_13] : memref<256x256xbf16, #tpu.memory_space<vmem>>, vector<256x256xbf16>
    %cst_14 = arith.constant dense<0.000000e+00> : vector<128x256xf32>
    %14 = tpu.matmul %10, %12, %cst_14 {dimension_numbers = #tpu.dot_dimension_numbers<[1], [0], [0], [1], [0, 0, 1, 1], [], []>} : vector<128x256xbf16>, vector<256x256xbf16>, vector<128x256xf32> -> vector<128x256xf32>
    %cst_15 = arith.constant dense<0.000000e+00> : vector<128x256xf32>
    %15 = tpu.matmul %11, %13, %cst_15 {dimension_numbers = #tpu.dot_dimension_numbers<[1], [0], [0], [1], [0, 0, 1, 1], [], []>} : vector<128x256xbf16>, vector<256x256xbf16>, vector<128x256xf32> -> vector<128x256xf32>
    %16 = arith.subf %14, %15 : vector<128x256xf32>
    %cst_16 = arith.constant dense<0.000000e+00> : vector<128x256xf32>
    %17 = tpu.matmul %10, %13, %cst_16 {dimension_numbers = #tpu.dot_dimension_numbers<[1], [0], [0], [1], [0, 0, 1, 1], [], []>} : vector<128x256xbf16>, vector<256x256xbf16>, vector<128x256xf32> -> vector<128x256xf32>
    %cst_17 = arith.constant dense<0.000000e+00> : vector<128x256xf32>
    %18 = tpu.matmul %11, %12, %cst_17 {dimension_numbers = #tpu.dot_dimension_numbers<[1], [0], [0], [1], [0, 0, 1, 1], [], []>} : vector<128x256xbf16>, vector<256x256xbf16>, vector<128x256xf32> -> vector<128x256xf32>
    %19 = arith.addf %17, %18 : vector<128x256xf32>
    %c0_18 = arith.constant 0 : index
    %c0_19 = arith.constant 0 : index
    %20 = vector.load %arg7[%c0_18, %c0_19] : memref<128x256xf32, #tpu.memory_space<vmem>>, vector<128x256xf32>
    %c0_20 = arith.constant 0 : index
    %c0_21 = arith.constant 0 : index
    %21 = vector.load %arg8[%c0_20, %c0_21] : memref<128x256xf32, #tpu.memory_space<vmem>>, vector<128x256xf32>
    %22 = arith.mulf %20, %16 : vector<128x256xf32>
    %23 = arith.mulf %21, %19 : vector<128x256xf32>
    %24 = arith.subf %22, %23 : vector<128x256xf32>
    %c0_22 = arith.constant 0 : index
    %c0_23 = arith.constant 0 : index
    %25 = vector.load %arg9[%c0_22, %c0_23] : memref<128x256xf32, #tpu.memory_space<vmem>>, vector<128x256xf32>
    tpu.vector_store %arg9[%c0_22, %c0_23], %24 {strides = array<i32>} : memref<128x256xf32, #tpu.memory_space<vmem>>, vector<128x256xf32>,
    %26 = arith.mulf %20, %19 : vector<128x256xf32>
    %27 = arith.mulf %21, %16 : vector<128x256xf32>
    %28 = arith.addf %26, %27 : vector<128x256xf32>
    %c0_24 = arith.constant 0 : index
    %c0_25 = arith.constant 0 : index
    %29 = vector.load %arg10[%c0_24, %c0_25] : memref<128x256xf32, #tpu.memory_space<vmem>>, vector<128x256xf32>
    tpu.vector_store %arg10[%c0_24, %c0_25], %28 {strides = array<i32>} : memref<128x256xf32, #tpu.memory_space<vmem>>, vector<128x256xf32>,
    return
  }
  func.func @transform_0(%arg0: i32) -> (i32, i32) {
    %c0_i32 = arith.constant 0 : i32
    %c0_i32_0 = arith.constant 0 : i32
    return %arg0, %c0_i32 : i32, i32
  }
  func.func @transform_1(%arg0: i32) -> (i32, i32) {
    %c0_i32 = arith.constant 0 : i32
    %c0_i32_0 = arith.constant 0 : i32
    return %arg0, %c0_i32 : i32, i32
  }
  func.func @transform_2(%arg0: i32) -> (i32, i32) {
    %c0_i32 = arith.constant 0 : i32
    %c0_i32_0 = arith.constant 0 : i32
    %c0_i32_1 = arith.constant 0 : i32
    return %c0_i32, %c0_i32_0 : i32, i32
  }
  func.func @transform_3(%arg0: i32) -> (i32, i32) {
    %c0_i32 = arith.constant 0 : i32
    %c0_i32_0 = arith.constant 0 : i32
    %c0_i32_1 = arith.constant 0 : i32
    return %c0_i32, %c0_i32_0 : i32, i32
  }
  func.func @transform_4(%arg0: i32) -> (i32, i32) {
    %c0_i32 = arith.constant 0 : i32
    %c0_i32_0 = arith.constant 0 : i32
    %c0_i32_1 = arith.constant 0 : i32
    return %c0_i32, %c0_i32_0 : i32, i32
  }
  func.func @transform_5(%arg0: i32) -> (i32, i32) {
    %c0_i32 = arith.constant 0 : i32
    %c0_i32_0 = arith.constant 0 : i32
    %c0_i32_1 = arith.constant 0 : i32
    return %c0_i32, %c0_i32_0 : i32, i32
  }
  func.func @transform_6(%arg0: i32) -> (i32, i32) {
    %c0_i32 = arith.constant 0 : i32
    %c0_i32_0 = arith.constant 0 : i32
    return %arg0, %c0_i32 : i32, i32
  }
  func.func @transform_7(%arg0: i32) -> (i32, i32) {
    %c0_i32 = arith.constant 0 : i32
    %c0_i32_0 = arith.constant 0 : i32
    return %arg0, %c0_i32 : i32, i32
  }
  func.func @transform_8(%arg0: i32) -> (i32, i32) {
    %c0_i32 = arith.constant 0 : i32
    %c0_i32_0 = arith.constant 0 : i32
    return %arg0, %c0_i32 : i32, i32
  }
  func.func @transform_9(%arg0: i32) -> (i32, i32) {
    %c0_i32 = arith.constant 0 : i32
    %c0_i32_0 = arith.constant 0 : i32
    return %arg0, %c0_i32 : i32, i32
  }
}

</mosaic_0001>

<bundles_post_ra>
// kernel: custom-call.1
= control target key start
LH: loop header
LB: loop body
LE: loop exit
PB: predicated region body
PF: predicated region fallthrough
CT: control target
= control target key end

     0   :  { %s56_s0 = inlined_call_operand.hbm [shape: c64[256,256], index: 0, kind: input, shape index: {}]   ;;  %s57_s1 = inlined_call_operand.vmem [shape: f32[256,256], index: 1, kind: output, shape index: {}]  }
   0x1   :  { %s2_s8 = scalar_lea.hbm %s56_s0, 512 }
   0x2   :  { %3 = vsyncpa [#allocation0], 0  ;;  %s5_s9 = sshll.u32 %s2_s8, 4  ;;  %s7_s12 = sshll.u32 %s57_s1, 4  ;;  %s6_s9 = int_to_ptr.hbm [resolvable:$true] %s5_s9  ;;  %s8_s12 = int_to_ptr.vmem [resolvable:$true] %s7_s12 }
   0x3   :  { %10 = dma.hbm_to_vmem [thread:$0]  %s6_s9, 8192, %s8_s12, [#allocation0] }
   0x4   :  { %38 = dma.done.wait [#allocation0], 8192  }
   0x5   :  { %39 = vsyncadd [#allocation0], 4294959104 }
   0x6   :  { %13 = vsyncpa [#allocation0], 1 }

// kernel: custom-call
= control target key start
LH: loop header
LB: loop body
LE: loop exit
PB: predicated region body
PF: predicated region fallthrough
CT: control target
= control target key end

     0   :  { %2 = vsyncpa [#allocation0], 0  ;;  %s55_s0 = inlined_call_operand.hbm [shape: c64[256,256], index: 0, kind: input, shape index: {}]   ;;  %s56_s1 = inlined_call_operand.vmem [shape: f32[256,256], index: 1, kind: output, shape index: {}]  }
   0x1   :  { %s4_s8 = sshll.u32 %s55_s0, 4  ;;  %s6_s11 = sshll.u32 %s56_s1, 4  ;;  %s5_s8 = int_to_ptr.hbm [resolvable:$true] %s4_s8  ;;  %s7_s11 = int_to_ptr.vmem [resolvable:$true] %s6_s11 }
   0x2   :  { %9 = dma.hbm_to_vmem [thread:$0]  %s5_s8, 8192, %s7_s11, [#allocation0] }
   0x3   :  { %37 = dma.done.wait [#allocation0], 8192  }
   0x4   :  { %38 = vsyncadd [#allocation0], 4294959104 }
   0x5   :  { %12 = vsyncpa [#allocation0], 1 }

// kernel: custom-call.2
= control target key start
LH: loop header
LB: loop body
LE: loop exit
PB: predicated region body
PF: predicated region fallthrough
CT: control target
= control target key end

     0   :  { %s105_s0 = inlined_call_operand.vmem [shape: f32[256,256], index: 0, kind: input, shape index: {}]   ;;  %s106_s1 = inlined_call_operand.vmem [shape: f32[256,256], index: 1, kind: input, shape index: {}]   ;;  %s107_s2 = inlined_call_operand.hbm [shape: c64[256,256], index: 2, kind: output, shape index: {}]  }
   0x1   :  { %s3_s11 = scalar_lea.hbm %s107_s2, 512 }
   0x2   :  { %4 = vsyncpa [#allocation0], 0  ;;  %s6_s14 = sshll.u32 %s105_s0, 4  ;;  %s8_s17 = sshll.u32 %s107_s2, 4  ;;  %s7_s14 = int_to_ptr.vmem [resolvable:$true] %s6_s14  ;;  %s9_s17 = int_to_ptr.hbm [resolvable:$true] %s8_s17 }
   0x3   :  { %11 = dma.vmem_to_hbm [thread:$0]  %s7_s14, 8192, %s9_s17, [#allocation0] }
   0x4   :  { %74 = dma.done.wait [#allocation0], 8192  }
   0x5   :  { %75 = vsyncadd [#allocation0], 4294959104 }
   0x6   :  { %14 = vsyncpa [#allocation0], 1 }
   0x7   :  { %15 = vsyncpa [#allocation1], 0  ;;  %s17_s20 = sshll.u32 %s106_s1, 4  ;;  %s19_s21 = sshll.u32 %s3_s11, 4  ;;  %s18_s20 = int_to_ptr.vmem [resolvable:$true] %s17_s20  ;;  %s20_s21 = int_to_ptr.hbm [resolvable:$true] %s19_s21 }
   0x8   :  { %22 = dma.vmem_to_hbm [thread:$0]  %s18_s20, 8192, %s20_s21, [#allocation1] }
   0x9   :  { %76 = dma.done.wait [#allocation1], 8192  }
   0xa   :  { %77 = vsyncadd [#allocation1], 4294959104 }
   0xb   :  { %25 = vsyncpa [#allocation1], 1 }

// kernel: _fresnel_forward.2
= control target key start
LH: loop header
LB: loop body
LE: loop exit
PB: predicated region body
PF: predicated region fallthrough
CT: control target
= control target key end

     0   :  { %11 = vsyncpa [#allocation3], 0  ;;  %s1929_s0 = inlined_call_operand.vmem [shape: f32[256,256], index: 0, kind: input, shape index: {}]   ;;  %s1930_s1 = inlined_call_operand.vmem [shape: f32[256,256], index: 1, kind: input, shape index: {}]   ;;  %s1931_s2 = inlined_call_operand.hbm [shape: f32[256,256], index: 2, kind: input, shape index: {}]   ;;  %s1932_s3 = inlined_call_operand.hbm [shape: f32[256,256], index: 3, kind: input, shape index: {}]   ;;  %s1933_s4 = inlined_call_operand.vmem [shape: bf16[256,256], index: 4, kind: output, shape index: {0}]   ;;  %s1934_s5 = inlined_call_operand.vmem [shape: bf16[256,256], index: 5, kind: output, shape index: {1}]  }
   0x1   :  { %13 = vsyncpa [#allocation3 + $0x1], 0 }
   0x2   :  { %14 = vsyncpa [#allocation5], 0 }
   0x3   :  { %16 = vsyncpa [#allocation5 + $0x1], 0  ;;  %s1113_s18 = smov 0   ;;  %s1115_s19 = smov 0  }
   0x4   :  { %s1117_s20 = smov 0   ;;  %s1119_s21 = smov 0  }
   0x5 LB: > { %s898_s22 = sadd.s32 4294967295, %s1079_s21   ;;  %s1133_s23 = sadd.s32 1, %s1079_s21   ;;  %s1079_s21 = sphi %s1119_s21, %s2047_s21   ;;  %s1075_s20 = sphi %s1117_s20, %s2046_s20   ;;  %s1071_s19 = sphi %s1115_s19, %s2045_s19   ;;  %s1067_s18 = sphi %s1113_s18, %s2044_s18  }
   0x6   : > { %s78_s24 = ssub.s32 %s1079_s21, %s1133_s23  ;;  %s81_s25 = sadd.s32 1, %s1075_s20 }
   0x7   : > { %p79_p0 = scmp.eq.s32.totalorder %s78_s24, 0  ;;  %p88_p1 = scmp.ne.s32.totalorder %s1075_s20, %s1071_s19 }
   0x8   : > { %p89_p2 = scmp.eq.s32.totalorder %s1079_s21, 0  ;;  %p94_p3 = scmp.ne.s32.totalorder %s1071_s19, %s1067_s18 }
   0x9   : > { %s1143_s26 = scalar_select %p79_p0, %s1075_s20, %s81_s25  }
   0xa   : > { %p1145_p4 = por %p89_p2, %p88_p1  ;;  %p95_p5 = scmp.eq.s32.totalorder %s898_s22, 0 }
   0xb   : > { %p946_p6 = scmp.lt.s32.totalorder %s1079_s21, 2  ;;  %s1157_s29 = sand.u32 1, %s1075_s20  }
   0xc   : > { %p1152_p7 = por %p95_p5, %p94_p3  ;;  %s902_s30 = sshll.u32 %s1157_s29, 8 }
   0xd   : > { %s928_s6 = sshll.u32 %s1079_s21, 8  ;;  %s220_s10 = scalar_lea.vmem [#allocation2], %s902_s30 }
   0xe   : > { %s226_s9 = scalar_lea.hbm %s1931_s2, %s928_s6  ;;  %s229_s11 = sshll.u32 %s220_s10, 4  ;;  %s230_s11 = int_to_ptr.vmem [resolvable:$true] %s229_s11 }
   0xf   : > { %s227_s12 = sshll.u32 %s226_s9, 4  ;;  %p1170_p8 = pnand %p946_p6, %p1145_p4  ;;  %s228_s12 = int_to_ptr.hbm [resolvable:$true] %s227_s12 }
  0x10   : > { %p910_p9 = scmp.ge.s32.totalorder %s1079_s21, 1  ;;  %s217_s14 = scalar_lea.sflag [#allocation3], %s1157_s29 }
  0x11   : > { %s981_s15 = sshra.s32 %s228_s12, 4  ;;  %p985_p11 = pneg %p1170_p8  ;;  %s982_s15 = int_to_ptr.hbm [resolvable:$true] %s981_s15 }
  0x12   : > { %s983_s16 = scalar_lea.hbm %s982_s15, 256  ;;  %s988_s24 = scalar_lea.hbm %s1931_s2, 512 }
  0x13   : > { %p984_p10 = scmp.ne.s32.totalorder %s982_s15, %s983_s16  ;;  %p989_p0 = scmp.lt.s32.totalorder %s982_s15, %s1931_s2 }
  0x14   : > { %p990_p1 = scmp.lt.s32.totalorder %s988_s24, %s983_s16 }
  0x15   : > { %p986_p12 = pnand %p985_p11, %p984_p10 }
  0x16   : > { %p991_p2 = por %p990_p1, %p989_p0 }
  0x17   : > { %p987_p13 = pneg %p986_p12 }
  0x19   : > { %p992_p3 = pnand %p991_p2, %p987_p13 }
  0x1b   : > { %995 = shalt.err (!%p992_p3)
}
  0x1c   : > { %s1081_s7 = smov 256   ;;  %s1082_s8 = smov 16  }
  0x1d   : > { %942 = dma.hbm_to_vmem [thread:$0]  (!%p1170_p8), %s228_s12, 4096, %s230_s11, %s217_s14, %s1081_s7, %s1081_s7, %s1082_s8  }
  0x1e   : > { %p260_p4 = scmp.lt.s32.totalorder %s1079_s21, 3  ;;  %s249_s15 = scalar_lea.hbm %s1932_s3, %s928_s6 }
  0x1f   : > { %s250_s17 = sshll.u32 %s249_s15, 4  ;;  %s243_s18 = scalar_lea.vmem [#allocation4], %s902_s30  ;;  %s251_s17 = int_to_ptr.hbm [resolvable:$true] %s250_s17 }
  0x20   : > { %p1197_p5 = pnand %p910_p9, %p260_p4  ;;  %s252_s24 = sshll.u32 %s243_s18, 4  ;;  %s253_s24 = int_to_ptr.vmem [resolvable:$true] %s252_s24 }
  0x21   : > { %s240_s25 = scalar_lea.sflag [#allocation5], %s1157_s29  ;;  %s1011_s27 = sshra.s32 %s251_s17, 4  ;;  %s1012_s27 = int_to_ptr.hbm [resolvable:$true] %s1011_s27 }
  0x22   : > { %s1013_s11 = scalar_lea.hbm %s1012_s27, 256  ;;  %s1018_s14 = scalar_lea.hbm %s1932_s3, 512 }
  0x23   : > { %p1014_p6 = scmp.ne.s32.totalorder %s1012_s27, %s1013_s11  ;;  %p1019_p9 = scmp.lt.s32.totalorder %s1012_s27, %s1932_s3 }
  0x24   : > { %p1020_p13 = scmp.lt.s32.totalorder %s1018_s14, %s1013_s11 }
  0x25   : > { %p1016_p10 = pnand %p1014_p6, %p985_p11 }
  0x26   : > { %p1021_p0 = por %p1020_p13, %p1019_p9 }
  0x27   : > { %p1017_p12 = pneg %p1016_p10 }
  0x29   : > { %p1022_p1 = pnand %p1021_p0, %p1017_p12 }
  0x2b   : > { %1025 = shalt.err (!%p1022_p1)
}
  0x2c   : > { %945 = dma.hbm_to_vmem [thread:$0]  (!%p1170_p8), %s251_s17, 4096, %s253_s24, %s240_s25, %s1081_s7, %s1081_s7, %s1082_s8  }
  0x2d   : > { %264 = sbr.rel (%p1197_p5) target bundleno = 143 (0x8f), region = 36 }
  0x32   : > { %s266_s29 = sand.u32 1, %s1071_s19  }
  0x33   : > { %s911_s30 = sshll.u32 %s266_s29, 8  ;;  %s267_s15 = scalar_lea.sflag [#allocation3], %s266_s29 }
  0x34   : > { %s1218_s18 = scalar_lea.vmem [#allocation2], %s911_s30 }
  0x35   : > { %1058 = dma.done.wait (%p1152_p7), %s267_s15, 4096  }
  0x36   : > { %1060 = vsyncadd (%p1152_p7), %s267_s15, 4294963200  ;;  %s277_s27 = scalar_lea.sflag [#allocation5], %s266_s29  ;;  %s1224_s11 = scalar_lea.vmem [#allocation4], %s911_s30 }
  0x37   : > { %1062 = dma.done.wait (%p1152_p7), %s277_s27, 4096  }
  0x38   : > { %1064 = vsyncadd (%p1152_p7), %s277_s27, 4294963200  ;;  %s913_s13 = sshll.u32 %s898_s22, 4  ;;  %v1258_v4 = vld [vmem:[%s1218_s18] sm:$0xff]  ;;  %v1261_v5 = vld [vmem:[%s1218_s18 + $0x8] sm:$0xff] }
  0x39   : > { %p333_p8 = scmp.lt.s32.totalorder %s913_s13, 31  ;;  %v458_v6 = vld [vmem:[%s1224_s11] sm:$0xff]  ;;  %v459_v7 = vld [vmem:[%s1224_s11 + $0x8] sm:$0xff]  ;;  %v1283_v16 = vld [vmem:[%s1218_s18 + $0x10] sm:$0xff] }
  0x3a   : > { %v1286_v17 = vld [vmem:[%s1218_s18 + $0x18] sm:$0xff]  ;;  %v460_v18 = vld [vmem:[%s1224_s11 + $0x10] sm:$0xff]  ;;  %v1318_v30 = vld [vmem:[%s1218_s18 + $0x20] sm:$0xff] }
  0x3b   : > { %s2049_s13 = smov (!%p333_p8, %s913_s13), 31  ;;  %v1290_v21 = vld [vmem:[%s1224_s11 + $0x18] sm:$0xff]  ;;  %v1321_v32 = vld [vmem:[%s1218_s18 + $0x28] sm:$0xff]  ;;  %v1324_v33 = vld [vmem:[%s1224_s11 + $0x20] sm:$0xff] }
  0x3c   : > { %s931_s7 = sshll.u32 %s2049_s13, 4  ;;  %s933_s22 = sshll.u32 %s2049_s13, 3  ;;  %v1327_v34 = vld [vmem:[%s1224_s11 + $0x28] sm:$0xff]  ;;  %v1351_v45 = vld [vmem:[%s1218_s18 + $0x30] sm:$0xff]  ;;  %v1354_v46 = vld [vmem:[%s1218_s18 + $0x38] sm:$0xff] }
  0x3d   : > { %s1238_s17 = scalar_lea.vmem %s1929_s0, %s931_s7  ;;  %s1243_s21 = scalar_lea.vmem %s1930_s1, %s931_s7  ;;  %v1357_v49 = vld [vmem:[%s1224_s11 + $0x30] sm:$0xff]  ;;  %v1360_v50 = vld [vmem:[%s1224_s11 + $0x38] sm:$0xff]  ;;  %v1385_v61 = vld [vmem:[%s1218_s18 + $0x40] sm:$0xff] }
  0x3e   : > { %v1246_v0 = vld [vmem:[%s1238_s17] sm:$0xff]  ;;  %v1249_v1 = vld [vmem:[%s1238_s17 + $0x8] sm:$0xff]  ;;  %v364_v10 = vld [vmem:[%s1238_s17 + $0x10] sm:$0xff]  ;;  %s1306_s12 = scalar_lea.vmem %s1933_s4, %s933_s22  ;;  %s1456_s10 = scalar_lea.vmem %s1934_s5, %s933_s22 }
  0x3f   : > { %v1252_v2 = vld [vmem:[%s1243_s21] sm:$0xff]  ;;  %v1255_v3 = vld [vmem:[%s1243_s21 + $0x8] sm:$0xff]  ;;  %v490_v8 = vmul.f32 %v1258_v4, %v1246_v0  ;;  %v491_v9 = vmul.f32 %v1261_v5, %v1249_v1  ;;  %v1274_v13 = vld [vmem:[%s1238_s17 + $0x18] sm:$0xff]  ;;  %v492_v22 = vmul.f32 %v1283_v16, %v364_v10  ;;  %v618_v60 = vmul.f32 %v458_v6, %v1246_v0 }
  0x40   : > { %v522_v11 = vmul.f32 %v458_v6, %v1252_v2  ;;  %v523_v12 = vmul.f32 %v459_v7, %v1255_v3  ;;  %v1277_v14 = vld [vmem:[%s1243_s21 + $0x10] sm:$0xff]  ;;  %v1280_v15 = vld [vmem:[%s1243_s21 + $0x18] sm:$0xff]  ;;  %v493_v23 = vmul.f32 %v1286_v17, %v1274_v13  ;;  %v1296_v24 = vld [vmem:[%s1238_s17 + $0x20] sm:$0xff]  ;;  %v620_v0 = vmul.f32 %v460_v18, %v364_v10 }
  0x41   : > { %v1299_v25 = vld [vmem:[%s1238_s17 + $0x28] sm:$0xff]  ;;  %v524_v26 = vmul.f32 %v460_v18, %v1277_v14  ;;  %v525_v27 = vmul.f32 %v1290_v21, %v1280_v15  ;;  %v1312_v28 = vld [vmem:[%s1243_s21 + $0x20] sm:$0xff]  ;;  %v494_v35 = vmul.f32 %v1318_v30, %v1296_v24  ;;  %v1336_v40 = vld [vmem:[%s1238_s17 + $0x30] sm:$0xff] }
  0x42   : > { %v554_v19 = vsub.f32 %v490_v8, %v522_v11  ;;  %v555_v20 = vsub.f32 %v491_v9, %v523_v12  ;;  %v1315_v29 = vld [vmem:[%s1243_s21 + $0x28] sm:$0xff]  ;;  %v495_v38 = vmul.f32 %v1321_v32, %v1299_v25  ;;  %v526_v39 = vmul.f32 %v1324_v33, %v1312_v28  ;;  %v1339_v41 = vld [vmem:[%s1238_s17 + $0x38] sm:$0xff]  ;;  %v1342_v42 = vld [vmem:[%s1243_s21 + $0x30] sm:$0xff] }
  0x43   : > { %v556_v36 = vsub.f32 %v492_v22, %v524_v26  ;;  %v557_v37 = vsub.f32 %v493_v23, %v525_v27  ;;  %v527_v43 = vmul.f32 %v1327_v34, %v1315_v29  ;;  %v1348_v44 = vld [vmem:[%s1243_s21 + $0x38] sm:$0xff]  ;;  %v496_v51 = vmul.f32 %v1351_v45, %v1336_v40  ;;  %v1367_v53 = vld [vmem:[%s1238_s17 + $0x40] sm:$0xff]  ;;  %v1374_v57 = vld [vmem:[%s1238_s17 + $0x48] sm:$0xff] }
  0x44   : > { %v586_v31 = vpack.c.bf16 %v555_v20, %v554_v19  ;;  %v558_v48 = vsub.f32 %v494_v35, %v526_v39  ;;  %v497_v52 = vmul.f32 %v1354_v46, %v1339_v41  ;;  %v528_v55 = vmul.f32 %v1357_v49, %v1342_v42  ;;  %v1377_v58 = vld [vmem:[%s1243_s21 + $0x40] sm:$0xff]  ;;  %v1380_v59 = vld [vmem:[%s1243_s21 + $0x48] sm:$0xff]  ;;  %v1407_v22 = vld [vmem:[%s1238_s17 + $0x58] sm:$0xff] }
  0x45   : > { %v587_v47 = vpack.c.bf16 %v557_v37, %v556_v36  ;;  %v559_v54 = vsub.f32 %v495_v38, %v527_v43  ;;  %v529_v56 = vmul.f32 %v1360_v50, %v1348_v44  ;;  %v1388_v62 = vld [vmem:[%s1218_s18 + $0x48] sm:$0xff]  ;;  %v1391_v63 = vld [vmem:[%s1224_s11 + $0x40] sm:$0xff]  ;;  %v619_v8 = vmul.f32 %v459_v7, %v1249_v1  ;;  %v1404_v7 = vld [vmem:[%s1238_s17 + $0x50] sm:$0xff] }
  0x46   : > { %602 = vst [vmem:[%s1306_s12] sm:$0xff] %v586_v31  ;;  %v650_v9 = vmul.f32 %v1258_v4, %v1252_v2  ;;  %v651_v11 = vmul.f32 %v1261_v5, %v1255_v3  ;;  %v560_v12 = vsub.f32 %v496_v51, %v528_v55  ;;  %v1399_v20 = vld [vmem:[%s1224_s11 + $0x48] sm:$0xff]  ;;  %v498_v1 = vmul.f32 %v1385_v61, %v1367_v53  ;;  %v1416_v5 = vld [vmem:[%s1243_s21 + $0x50] sm:$0xff]  ;;  %v1419_v10 = vld [vmem:[%s1243_s21 + $0x58] sm:$0xff] }
  0x47   : > { %603 = vst [vmem:[%s1306_s12 + $0x8] sm:$0xff] %v587_v47  ;;  %v588_v6 = vpack.c.bf16 %v559_v54, %v558_v48  ;;  %v561_v19 = vsub.f32 %v497_v52, %v529_v56  ;;  %v499_v2 = vmul.f32 %v1388_v62, %v1374_v57  ;;  %v530_v3 = vmul.f32 %v1391_v63, %v1377_v58  ;;  %v1422_v18 = vld [vmem:[%s1218_s18 + $0x50] sm:$0xff]  ;;  %v1426_v27 = vld [vmem:[%s1218_s18 + $0x58] sm:$0xff]  ;;  %v1443_v51 = vld [vmem:[%s1238_s17 + $0x60] sm:$0xff] }
  0x48   : > { %v531_v4 = vmul.f32 %v1399_v20, %v1380_v59  ;;  %v682_v23 = vadd.f32 %v650_v9, %v618_v60  ;;  %v1429_v31 = vld [vmem:[%s1224_s11 + $0x50] sm:$0xff]  ;;  %v1432_v35 = vld [vmem:[%s1224_s11 + $0x58] sm:$0xff]  ;;  %v500_v36 = vmul.f32 %v1422_v18, %v1404_v7  ;;  %v683_v37 = vadd.f32 %v651_v11, %v619_v8  ;;  %v1446_v52 = vld [vmem:[%s1238_s17 + $0x68] sm:$0xff] }
  0x49   : > { %604 = vst [vmem:[%s1306_s12 + $0x10] sm:$0xff] %v588_v6  ;;  %v589_v26 = vpack.c.bf16 %v561_v19, %v560_v12  ;;  %v621_v38 = vmul.f32 %v1290_v21, %v1274_v13  ;;  %v562_v39 = vsub.f32 %v498_v1, %v530_v3  ;;  %v501_v47 = vmul.f32 %v1426_v27, %v1407_v22  ;;  %v1449_v54 = vld [vmem:[%s1243_s21 + $0x60] sm:$0xff]  ;;  %v1462_v21 = vld [vmem:[%s1243_s21 + $0x68] sm:$0xff]  ;;  %v1492_v3 = vld [vmem:[%s1238_s17 + $0x78] sm:$0xff] }
  0x4a   : > { %v563_v43 = vsub.f32 %v499_v2, %v531_v4  ;;  %v532_v48 = vmul.f32 %v1429_v31, %v1416_v5  ;;  %v533_v13 = vmul.f32 %v1432_v35, %v1419_v10  ;;  %v1465_v55 = vld [vmem:[%s1218_s18 + $0x60] sm:$0xff]  ;;  %v1468_v56 = vld [vmem:[%s1218_s18 + $0x68] sm:$0xff]  ;;  %v714_v60 = vpack.c.bf16 %v683_v37, %v682_v23  ;;  %v1495_v4 = vld [vmem:[%s1243_s21 + $0x70] sm:$0xff] }
  0x4b   : > { %605 = vst [vmem:[%s1306_s12 + $0x18] sm:$0xff] %v589_v26  ;;  %v652_v8 = vmul.f32 %v1283_v16, %v1277_v14  ;;  %v653_v9 = vmul.f32 %v1286_v17, %v1280_v15  ;;  %v1475_v12 = vld [vmem:[%s1224_s11 + $0x60] sm:$0xff]  ;;  %v1478_v19 = vld [vmem:[%s1224_s11 + $0x68] sm:$0xff]  ;;  %v502_v1 = vmul.f32 %v1465_v55, %v1443_v51  ;;  %v503_v2 = vmul.f32 %v1468_v56, %v1446_v52  ;;  %v1485_v14 = vld [vmem:[%s1238_s17 + $0x70] sm:$0xff] }
  0x4c   : > { %v590_v11 = vpack.c.bf16 %v563_v43, %v562_v39  ;;  %v564_v6 = vsub.f32 %v500_v36, %v532_v48  ;;  %v565_v16 = vsub.f32 %v501_v47, %v533_v13  ;;  %v534_v15 = vmul.f32 %v1475_v12, %v1449_v54  ;;  %1974 = vst [vmem:[#allocation8_spill] sm:$0xff] %v1495_v4  ;;  %v1498_v23 = vld [vmem:[%s1243_s21 + $0x78] sm:$0xff]  ;;  %v1503_v36 = vld [vmem:[%s1218_s18 + $0x70] sm:$0xff] }
  0x4d   : > { %v535_v17 = vmul.f32 %v1478_v19, %v1462_v21  ;;  %1975 = vst [vmem:[#allocation9_spill] sm:$0xff] %v1498_v23  ;;  %v684_v26 = vadd.f32 %v652_v8, %v620_v0  ;;  %v1506_v37 = vld [vmem:[%s1218_s18 + $0x78] sm:$0xff]  ;;  %v1509_v39 = vld [vmem:[%s1224_s11 + $0x70] sm:$0xff]  ;;  %v685_v43 = vadd.f32 %v653_v9, %v621_v38  ;;  %v622_v47 = vmul.f32 %v1324_v33, %v1296_v24  ;;  %v1523_v9 = vld [vmem:[%s1238_s17 + $0x80] sm:$0xff] }
  0x4e   : > { %730 = vst [vmem:[%s1456_s10] sm:$0xff] %v714_v60  ;;  %v623_v48 = vmul.f32 %v1327_v34, %v1299_v25  ;;  %v654_v0 = vmul.f32 %v1318_v30, %v1312_v28  ;;  %v591_v13 = vpack.c.bf16 %v565_v16, %v564_v6  ;;  %v566_v60 = vsub.f32 %v502_v1, %v534_v15  ;;  %v1526_v24 = vld [vmem:[%s1238_s17 + $0x88] sm:$0xff]  ;;  %v1535_v33 = vld [vmem:[%s1243_s21 + $0x80] sm:$0xff] }
  0x4f   : > { %606 = vst [vmem:[%s1306_s12 + $0x20] sm:$0xff] %v590_v11  ;;  %v567_v8 = vsub.f32 %v503_v2, %v535_v17  ;;  %v1518_v11 = vld [vmem:[%s1224_s11 + $0x78] sm:$0xff]  ;;  %v504_v38 = vmul.f32 %v1503_v36, %v1485_v14  ;;  %v505_v25 = vmul.f32 %v1506_v37, %v1492_v3  ;;  %v536_v28 = vmul.f32 %v1509_v39, %v1495_v4  ;;  %v1538_v34 = vld [vmem:[%s1243_s21 + $0x88] sm:$0xff]  ;;  %v1541_v6 = vld [vmem:[%s1218_s18 + $0x80] sm:$0xff] }
  0x50   : > { %1976 = vst [vmem:[#allocation10_spill] sm:$0xff] %v1503_v36  ;;  %v537_v30 = vmul.f32 %v1518_v11, %v1498_v23  ;;  %v715_v1 = vpack.c.bf16 %v685_v43, %v684_v26  ;;  %v1545_v16 = vld [vmem:[%s1218_s18 + $0x88] sm:$0xff]  ;;  %v1548_v15 = vld [vmem:[%s1224_s11 + $0x80] sm:$0xff]  ;;  %v655_v23 = vmul.f32 %v1321_v32, %v1315_v29  ;;  %v686_v26 = vadd.f32 %v654_v0, %v622_v47  ;;  %v1562_v36 = vld [vmem:[%s1238_s17 + $0x90] sm:$0xff] }
  0x51   : > { %1977 = vst [vmem:[#allocation11_spill] sm:$0xff] %v1506_v37  ;;  %v592_v2 = vpack.c.bf16 %v567_v8, %v566_v60  ;;  %v1551_v17 = vld [vmem:[%s1224_s11 + $0x88] sm:$0xff]  ;;  %v506_v37 = vmul.f32 %v1541_v6, %v1523_v9  ;;  %v568_v43 = vsub.f32 %v504_v38, %v536_v28  ;;  %v507_v60 = vmul.f32 %v1545_v16, %v1526_v24  ;;  %v1565_v4 = vld [vmem:[%s1238_s17 + $0x98] sm:$0xff]  ;;  %v1578_v47 = vld [vmem:[%s1218_s18 + $0x90] sm:$0xff] }
  0x52   : > { %1978 = vst [vmem:[#allocation12_spill] sm:$0xff] %v1518_v11  ;;  %v538_v8 = vmul.f32 %v1548_v15, %v1535_v33  ;;  %v1568_v11 = vld [vmem:[%s1243_s21 + $0x90] sm:$0xff]  ;;  %v539_v29 = vmul.f32 %v1551_v17, %v1538_v34  ;;  %v1575_v32 = vld [vmem:[%s1243_s21 + $0x98] sm:$0xff]  ;;  %v687_v38 = vadd.f32 %v655_v23, %v623_v48  ;;  %v625_v28 = vmul.f32 %v1360_v50, %v1339_v41  ;;  %v1608_v48 = vld [vmem:[%s1243_s21 + $0xa0] sm:$0xff] }
  0x53   : > { %1979 = vst [vmem:[#allocation13_spill] sm:$0xff] %v1538_v34  ;;  %v1581_v0 = vld [vmem:[%s1218_s18 + $0x98] sm:$0xff]  ;;  %v508_v34 = vmul.f32 %v1578_v47, %v1562_v36 }
  0x54   : > { %607 = vst [vmem:[%s1306_s12 + $0x28] sm:$0xff] %v591_v13  ;;  %v569_v13 = vsub.f32 %v505_v25, %v537_v30  ;;  %v624_v25 = vmul.f32 %v1357_v49, %v1336_v40  ;;  %v509_v23 = vmul.f32 %v1581_v0, %v1565_v4  ;;  %v1598_v40 = vld [vmem:[%s1238_s17 + $0xa0] sm:$0xff]  ;;  %v571_v49 = vsub.f32 %v507_v60, %v539_v29  ;;  %v1618_v60 = vld [vmem:[%s1218_s18 + $0xa8] sm:$0xff] }
  0x55   : > { %1980 = vst [vmem:[#allocation14_spill] sm:$0xff] %v1545_v16  ;;  %v1591_v16 = vld [vmem:[%s1224_s11 + $0x98] sm:$0xff]  ;;  %v1621_v29 = vld [vmem:[%s1224_s11 + $0xa0] sm:$0xff] }
  0x56   : > { %1981 = vst [vmem:[#allocation15_spill] sm:$0xff] %v1568_v11  ;;  %v593_v30 = vpack.c.bf16 %v569_v13, %v568_v43  ;;  %v541_v50 = vmul.f32 %v1591_v16, %v1575_v32  ;;  %v1611_v43 = vld [vmem:[%s1243_s21 + $0xa8] sm:$0xff]  ;;  %v716_v13 = vpack.c.bf16 %v687_v38, %v686_v26  ;;  %v626_v26 = vmul.f32 %v1391_v63, %v1367_v53  ;;  %v1650_v63 = vld [vmem:[%s1243_s21 + $0xb0] sm:$0xff] }
  0x57   : > { %731 = vst [vmem:[%s1456_s10 + $0x8] sm:$0xff] %v715_v1  ;;  %v570_v1 = vsub.f32 %v506_v37, %v538_v8  ;;  %v1605_v37 = vld [vmem:[%s1238_s17 + $0xa8] sm:$0xff]  ;;  %v1615_v8 = vld [vmem:[%s1218_s18 + $0xa0] sm:$0xff]  ;;  %v627_v38 = vmul.f32 %v1399_v20, %v1374_v57  ;;  %v542_v53 = vmul.f32 %v1621_v29, %v1608_v48  ;;  %v1653_v20 = vld [vmem:[%s1243_s21 + $0xb8] sm:$0xff] }
  0x58   : > { %608 = vst [vmem:[%s1306_s12 + $0x30] sm:$0xff] %v592_v2  ;;  %v1588_v2 = vld [vmem:[%s1224_s11 + $0x90] sm:$0xff] }
  0x59   : > { %1982 = vst [vmem:[#allocation16_spill] sm:$0xff] %v1575_v32  ;;  %v540_v41 = vmul.f32 %v1588_v2, %v1568_v11  ;;  %v657_v32 = vmul.f32 %v1354_v46, %v1348_v44  ;;  %v573_v11 = vsub.f32 %v509_v23, %v541_v50  ;;  %v1637_v44 = vld [vmem:[%s1238_s17 + $0xb0] sm:$0xff]  ;;  %v511_v46 = vmul.f32 %v1618_v60, %v1605_v37  ;;  %v1666_v50 = vld [vmem:[%s1224_s11 + $0xb8] sm:$0xff] }
  0x5a   : > { %1983 = vst [vmem:[#allocation17_spill] sm:$0xff] %v1578_v47 }
  0x5b   : > { %1984 = vst [vmem:[#allocation18_spill] sm:$0xff] %v1581_v0  ;;  %v656_v0 = vmul.f32 %v1351_v45, %v1342_v42  ;;  %v572_v47 = vsub.f32 %v508_v34, %v540_v41  ;;  %v510_v42 = vmul.f32 %v1615_v8, %v1598_v40  ;;  %v1640_v45 = vld [vmem:[%s1238_s17 + $0xb8] sm:$0xff]  ;;  %v1656_v34 = vld [vmem:[%s1218_s18 + $0xb0] sm:$0xff] }
  0x5c   : > { %1985 = vst [vmem:[#allocation19_spill] sm:$0xff] %v1591_v16  ;;  %v1632_v16 = vld [vmem:[%s1224_s11 + $0xa8] sm:$0xff]  ;;  %v1663_v41 = vld [vmem:[%s1224_s11 + $0xb0] sm:$0xff] }
  0x5d   : > { %1986 = vst [vmem:[#allocation20_spill] sm:$0xff] %v1611_v43  ;;  %v543_v57 = vmul.f32 %v1632_v16, %v1611_v43  ;;  %v595_v23 = vpack.c.bf16 %v573_v11, %v572_v47  ;;  %v658_v43 = vmul.f32 %v1385_v61, %v1377_v58  ;;  %v544_v47 = vmul.f32 %v1663_v41, %v1650_v63  ;;  %v1689_v61 = vld [vmem:[%s1243_s21 + $0xc8] sm:$0xff] }
  0x5e   : > { %609 = vst [vmem:[%s1306_s12 + $0x38] sm:$0xff] %v593_v30  ;;  %v594_v30 = vpack.c.bf16 %v571_v49, %v570_v1  ;;  %v688_v1 = vadd.f32 %v656_v0, %v624_v25  ;;  %v1660_v49 = vld [vmem:[%s1218_s18 + $0xb8] sm:$0xff]  ;;  %v574_v0 = vsub.f32 %v510_v42, %v542_v53  ;;  %v545_v58 = vmul.f32 %v1666_v50, %v1653_v20 }
  0x5f   : > { %1987 = vst [vmem:[#allocation21_spill] sm:$0xff] %v1615_v8  ;;  %v575_v25 = vsub.f32 %v511_v46, %v543_v57  ;;  %v513_v11 = vmul.f32 %v1660_v49, %v1640_v45  ;;  %v1680_v8 = vld [vmem:[%s1238_s17 + $0xc8] sm:$0xff]  ;;  %v659_v46 = vmul.f32 %v1388_v62, %v1380_v59  ;;  %v690_v53 = vadd.f32 %v658_v43, %v626_v26  ;;  %v1717_v26 = vld [vmem:[%s1238_s17 + $0xd8] sm:$0xff] }
  0x60   : > { %1988 = vst [vmem:[#allocation22_spill] sm:$0xff] %v1618_v60  ;;  %v689_v60 = vadd.f32 %v657_v32, %v625_v28  ;;  %v1692_v32 = vld [vmem:[%s1218_s18 + $0xc0] sm:$0xff]  ;;  %v1695_v28 = vld [vmem:[%s1218_s18 + $0xc8] sm:$0xff] }
  0x61   : > { %732 = vst [vmem:[%s1456_s10 + $0x10] sm:$0xff] %v716_v13  ;;  %v512_v13 = vmul.f32 %v1656_v34, %v1637_v44  ;;  %v596_v57 = vpack.c.bf16 %v575_v25, %v574_v0  ;;  %v577_v59 = vsub.f32 %v513_v11, %v545_v58  ;;  %v1723_v0 = vld [vmem:[%s1243_s21 + $0xd8] sm:$0xff]  ;;  %v691_v25 = vadd.f32 %v659_v46, %v627_v38  ;;  %v1734_v58 = vld [vmem:[%s1224_s11 + $0xd0] sm:$0xff] }
  0x62   : > { %1989 = vst [vmem:[#allocation23_spill] sm:$0xff] %v1650_v63  ;;  %v717_v42 = vpack.c.bf16 %v689_v60, %v688_v1  ;;  %v515_v60 = vmul.f32 %v1695_v28, %v1680_v8  ;;  %v1710_v1 = vld [vmem:[%s1238_s17 + $0xd0] sm:$0xff]  ;;  %v1731_v11 = vld [vmem:[%s1218_s18 + $0xd8] sm:$0xff]  ;;  %v661_v38 = vmul.f32 %v1426_v27, %v1419_v10  ;;  %v1762_v27 = vld [vmem:[%s1243_s21 + $0xe0] sm:$0xff] }
  0x63   : > { %1990 = vst [vmem:[#allocation24_spill] sm:$0xff] %v1653_v20  ;;  %v1703_v20 = vld [vmem:[%s1224_s11 + $0xc8] sm:$0xff] }
  0x64   : > { %1991 = vst [vmem:[#allocation25_spill] sm:$0xff] %v1656_v34  ;;  %v1683_v34 = vld [vmem:[%s1243_s21 + $0xc0] sm:$0xff]  ;;  %v547_v43 = vmul.f32 %v1703_v20, %v1689_v61 }
  0x65   : > { %610 = vst [vmem:[%s1306_s12 + $0x40] sm:$0xff] %v594_v30  ;;  %v1677_v30 = vld [vmem:[%s1238_s17 + $0xc0] sm:$0xff] }
  0x66   : > { %1992 = vst [vmem:[#allocation26_spill] sm:$0xff] %v1660_v49  ;;  %v1700_v49 = vld [vmem:[%s1224_s11 + $0xc0] sm:$0xff]  ;;  %v514_v63 = vmul.f32 %v1692_v32, %v1677_v30 }
  0x67   : > { %1993 = vst [vmem:[#allocation27_spill] sm:$0xff] %v1683_v34  ;;  %v546_v62 = vmul.f32 %v1700_v49, %v1683_v34  ;;  %v1745_v34 = vld [vmem:[%s1224_s11 + $0xd8] sm:$0xff] }
  0x68   : > { %611 = vst [vmem:[%s1306_s12 + $0x48] sm:$0xff] %v595_v23  ;;  %v576_v23 = vsub.f32 %v512_v13, %v544_v47  ;;  %v1720_v13 = vld [vmem:[%s1243_s21 + $0xd0] sm:$0xff] }
  0x69   : > { %1994 = vst [vmem:[#allocation28_spill] sm:$0xff] %v1689_v61  ;;  %v1728_v47 = vld [vmem:[%s1218_s18 + $0xd0] sm:$0xff]  ;;  %v629_v61 = vmul.f32 %v1432_v35, %v1407_v22  ;;  %v1753_v22 = vld [vmem:[%s1238_s17 + $0xe8] sm:$0xff]  ;;  %v548_v10 = vmul.f32 %v1734_v58, %v1720_v13 }
  0x6a   : > { %1995 = vst [vmem:[#allocation29_spill] sm:$0xff] %v1692_v32  ;;  %v597_v46 = vpack.c.bf16 %v577_v59, %v576_v23  ;;  %v579_v32 = vsub.f32 %v515_v60, %v547_v43  ;;  %v1765_v35 = vld [vmem:[%s1243_s21 + $0xe8] sm:$0xff]  ;;  %v718_v23 = vpack.c.bf16 %v691_v25, %v690_v53 }
  0x6b   : > { %1996 = vst [vmem:[#allocation30_spill] sm:$0xff] %v1695_v28  ;;  %v628_v28 = vmul.f32 %v1429_v31, %v1404_v7  ;;  %v516_v7 = vmul.f32 %v1728_v47, %v1710_v1  ;;  %v1750_v31 = vld [vmem:[%s1238_s17 + $0xe0] sm:$0xff]  ;;  %v1772_v59 = vld [vmem:[%s1218_s18 + $0xe8] sm:$0xff] }
  0x6c   : > { %1997 = vst [vmem:[#allocation31_spill] sm:$0xff] %v1720_v13  ;;  %v1778_v43 = vld [vmem:[%s1224_s11 + $0xe8] sm:$0xff]  ;;  %v519_v25 = vmul.f32 %v1772_v59, %v1753_v22 }
  0x6d   : > { %1998 = vst [vmem:[#allocation32_spill] sm:$0xff] %v1723_v0  ;;  %v580_v13 = vsub.f32 %v516_v7, %v548_v10  ;;  %v631_v10 = vmul.f32 %v1478_v19, %v1446_v52  ;;  %v662_v52 = vmul.f32 %v1465_v55, %v1449_v54  ;;  %v632_v19 = vmul.f32 %v1509_v39, %v1485_v14  ;;  %v2012_v54 = vld [vmem:[#allocation9_spill] sm:$0xff]  ;;  %v2013_v55 = vld [vmem:[#allocation11_spill] sm:$0xff] }
  0x6e   : > { %733 = vst [vmem:[%s1456_s10 + $0x18] sm:$0xff] %v717_v42  ;;  %v660_v42 = vmul.f32 %v1422_v18, %v1416_v5  ;;  %v517_v5 = vmul.f32 %v1731_v11, %v1717_v26  ;;  %v549_v18 = vmul.f32 %v1745_v34, %v1723_v0  ;;  %v635_v14 = vmul.f32 %v1551_v17, %v1526_v24  ;;  %v2014_v39 = vld [vmem:[#allocation13_spill] sm:$0xff] }
  0x6f   : > { %612 = vst [vmem:[%s1306_s12 + $0x50] sm:$0xff] %v596_v57  ;;  %v578_v57 = vsub.f32 %v514_v63, %v546_v62  ;;  %v1768_v63 = vld [vmem:[%s1218_s18 + $0xe0] sm:$0xff]  ;;  %v2018_v24 = vld [vmem:[#allocation17_spill] sm:$0xff] }
  0x70   : > { %1999 = vst [vmem:[#allocation33_spill] sm:$0xff] %v1728_v47  ;;  %v1775_v62 = vld [vmem:[%s1224_s11 + $0xe0] sm:$0xff]  ;;  %v692_v0 = vadd.f32 %v660_v42, %v628_v28  ;;  %v693_v47 = vadd.f32 %v661_v38, %v629_v61  ;;  %v581_v53 = vsub.f32 %v517_v5, %v549_v18  ;;  %v551_v61 = vmul.f32 %v1778_v43, %v1765_v35  ;;  %v1800_v28 = vld [vmem:[%s1243_s21 + $0xf8] sm:$0xff]  ;;  %v1803_v42 = vld [vmem:[%s1218_s18 + $0xf0] sm:$0xff] }
  0x71   : > { %2000 = vst [vmem:[#allocation34_spill] sm:$0xff] %v1731_v11  ;;  %v598_v60 = vpack.c.bf16 %v579_v32, %v578_v57  ;;  %v518_v11 = vmul.f32 %v1768_v63, %v1750_v31  ;;  %v550_v32 = vmul.f32 %v1775_v62, %v1762_v27  ;;  %v1790_v57 = vld [vmem:[%s1238_s17 + $0xf8] sm:$0xff]  ;;  %v630_v5 = vmul.f32 %v1475_v12, %v1443_v51 }
  0x72   : > { %2001 = vst [vmem:[#allocation35_spill] sm:$0xff] %v1745_v34  ;;  %v1793_v34 = vld [vmem:[%s1243_s21 + $0xf0] sm:$0xff]  ;;  %v1806_v38 = vld [vmem:[%s1218_s18 + $0xf8] sm:$0xff]  ;;  %v719_v7 = vpack.c.bf16 %v693_v47, %v692_v0  ;;  %v599_v18 = vpack.c.bf16 %v581_v53, %v580_v13  ;;  %v663_v12 = vmul.f32 %v1468_v56, %v1462_v21  ;;  %v2009_v13 = vld [vmem:[#allocation12_spill] sm:$0xff]  ;;  %v634_v21 = vmul.f32 %v1548_v15, %v1523_v9 }
  0x73   : > { %2002 = vst [vmem:[#allocation36_spill] sm:$0xff] %v1762_v27  ;;  %v583_v27 = vsub.f32 %v519_v25, %v551_v61  ;;  %v633_v47 = vmul.f32 %v2009_v13, %v1492_v3  ;;  %v2011_v53 = vld [vmem:[#allocation10_spill] sm:$0xff]  ;;  %v666_v3 = vmul.f32 %v1541_v6, %v1535_v33 }
  0x74   : > { %2003 = vst [vmem:[#allocation37_spill] sm:$0xff] %v1765_v35  ;;  %v2020_v33 = vld [vmem:[#allocation18_spill] sm:$0xff] }
  0x75   : > { %2004 = vst [vmem:[#allocation38_spill] sm:$0xff] %v1768_v63  ;;  %v521_v63 = vmul.f32 %v1806_v38, %v1790_v57  ;;  %v698_v15 = vadd.f32 %v666_v3, %v634_v21  ;;  %v2029_v21 = vld [vmem:[#allocation29_spill] sm:$0xff] }
  0x76   : > { %613 = vst [vmem:[%s1306_s12 + $0x58] sm:$0xff] %v597_v46  ;;  %v1787_v46 = vld [vmem:[%s1238_s17 + $0xf0] sm:$0xff] }
  0x77   : > { %2005 = vst [vmem:[#allocation39_spill] sm:$0xff] %v1772_v59  ;;  %v1816_v59 = vld [vmem:[%s1224_s11 + $0xf8] sm:$0xff]  ;;  %v520_v35 = vmul.f32 %v1803_v42, %v1787_v46 }
  0x78   : > { %734 = vst [vmem:[%s1456_s10 + $0x20] sm:$0xff] %v718_v23  ;;  %v582_v23 = vsub.f32 %v518_v11, %v550_v32  ;;  %v553_v51 = vmul.f32 %v1816_v59, %v1800_v28  ;;  %v2010_v11 = vld [vmem:[#allocation8_spill] sm:$0xff] }
  0x79   : > { %614 = vst [vmem:[%s1306_s12 + $0x60] sm:$0xff] %v598_v60  ;;  %v1813_v60 = vld [vmem:[%s1224_s11 + $0xf0] sm:$0xff]  ;;  %v664_v25 = vmul.f32 %v2011_v53, %v2010_v11 }
  0x7a   : > { %2006 = vst [vmem:[#allocation40_spill] sm:$0xff] %v1800_v28  ;;  %v552_v0 = vmul.f32 %v1813_v60, %v1793_v34  ;;  %v600_v32 = vpack.c.bf16 %v583_v27, %v582_v23  ;;  %v695_v28 = vadd.f32 %v663_v12, %v631_v10  ;;  %v2015_v27 = vld [vmem:[#allocation14_spill] sm:$0xff]  ;;  %v636_v10 = vmul.f32 %v1588_v2, %v1562_v36  ;;  %v2016_v23 = vld [vmem:[#allocation19_spill] sm:$0xff] }
  0x7b   : > { %2007 = vst [vmem:[#allocation41_spill] sm:$0xff] %v1803_v42  ;;  %v696_v42 = vadd.f32 %v664_v25, %v632_v19  ;;  %v637_v9 = vmul.f32 %v2016_v23, %v1565_v4  ;;  %v639_v36 = vmul.f32 %v1632_v16, %v1605_v37  ;;  %v2021_v4 = vld [vmem:[#allocation21_spill] sm:$0xff]  ;;  %v2023_v11 = vld [vmem:[#allocation22_spill] sm:$0xff] }
  0x7c   : > { %2008 = vst [vmem:[#allocation42_spill] sm:$0xff] %v1806_v38  ;;  %v584_v61 = vsub.f32 %v520_v35, %v552_v0  ;;  %v694_v38 = vadd.f32 %v662_v52, %v630_v5  ;;  %v667_v35 = vmul.f32 %v2015_v27, %v2014_v39  ;;  %v2019_v52 = vld [vmem:[#allocation16_spill] sm:$0xff]  ;;  %v670_v2 = vmul.f32 %v2021_v4, %v1608_v48  ;;  %v2025_v16 = vld [vmem:[#allocation25_spill] sm:$0xff]  ;;  %v2036_v23 = vld [vmem:[#allocation34_spill] sm:$0xff] }
  0x7d   : > { %735 = vst [vmem:[%s1456_s10 + $0x28] sm:$0xff] %v719_v7  ;;  %v585_v7 = vsub.f32 %v521_v63, %v553_v51  ;;  %v2017_v51 = vld [vmem:[#allocation15_spill] sm:$0xff]  ;;  %v669_v6 = vmul.f32 %v2020_v33, %v2019_v52  ;;  %v644_v27 = vmul.f32 %v1734_v58, %v1710_v1  ;;  %v647_v1 = vmul.f32 %v1778_v43, %v1753_v22  ;;  %v2037_v58 = vld [vmem:[#allocation36_spill] sm:$0xff]  ;;  %v2039_v33 = vld [vmem:[#allocation37_spill] sm:$0xff] }
  0x7e   : > { %615 = vst [vmem:[%s1306_s12 + $0x68] sm:$0xff] %v599_v18  ;;  %v665_v18 = vmul.f32 %v2013_v55, %v2012_v54  ;;  %v720_v63 = vpack.c.bf16 %v695_v28, %v694_v38  ;;  %v699_v0 = vadd.f32 %v667_v35, %v635_v14  ;;  %v668_v17 = vmul.f32 %v2018_v24, %v2017_v51  ;;  %v2032_v35 = vld [vmem:[#allocation35_spill] sm:$0xff]  ;;  %v2038_v51 = vld [vmem:[#allocation38_spill] sm:$0xff] }
  0x7f   : > { %616 = vst [vmem:[%s1306_s12 + $0x70] sm:$0xff] %v600_v32  ;;  %v601_v56 = vpack.c.bf16 %v585_v7, %v584_v61  ;;  %v638_v38 = vmul.f32 %v1621_v29, %v1598_v40  ;;  %v701_v13 = vadd.f32 %v669_v6, %v637_v9  ;;  %v641_v40 = vmul.f32 %v1666_v50, %v1640_v45  ;;  %v2024_v29 = vld [vmem:[#allocation23_spill] sm:$0xff]  ;;  %v2026_v61 = vld [vmem:[#allocation24_spill] sm:$0xff]  ;;  %v2027_v7 = vld [vmem:[#allocation26_spill] sm:$0xff] }
  0x80   : > { %v697_v5 = vadd.f32 %v665_v18, %v633_v47  ;;  %736 = vst [vmem:[%s1456_s10 + $0x30] sm:$0xff] %v720_v63  ;;  %v722_v12 = vpack.c.bf16 %v699_v0, %v698_v15  ;;  %v700_v19 = vadd.f32 %v668_v17, %v636_v10  ;;  %v2022_v47 = vld [vmem:[#allocation20_spill] sm:$0xff]  ;;  %v672_v37 = vmul.f32 %v2025_v16, %v2024_v29  ;;  %v2040_v6 = vld [vmem:[#allocation39_spill] sm:$0xff] }
  0x81   : > { %617 = vst [vmem:[%s1306_s12 + $0x78] sm:$0xff] %v601_v56  ;;  %v671_v53 = vmul.f32 %v2023_v11, %v2022_v47  ;;  %v702_v25 = vadd.f32 %v670_v2, %v638_v38  ;;  %v673_v54 = vmul.f32 %v2027_v7, %v2026_v61  ;;  %v642_v55 = vmul.f32 %v1700_v49, %v1677_v30  ;;  %v2030_v50 = vld [vmem:[#allocation28_spill] sm:$0xff]  ;;  %v2031_v56 = vld [vmem:[#allocation30_spill] sm:$0xff] }
  0x82   : > { %v721_v28 = vpack.c.bf16 %v697_v5, %v696_v42  ;;  %v640_v42 = vmul.f32 %v1663_v41, %v1637_v44  ;;  %738 = vst [vmem:[%s1456_s10 + $0x40] sm:$0xff] %v722_v12  ;;  %v723_v48 = vpack.c.bf16 %v701_v13, %v700_v19  ;;  %v643_v44 = vmul.f32 %v1703_v20, %v1680_v8  ;;  %v2028_v41 = vld [vmem:[#allocation27_spill] sm:$0xff]  ;;  %v2034_v8 = vld [vmem:[#allocation33_spill] sm:$0xff]  ;;  %v2035_v10 = vld [vmem:[#allocation32_spill] sm:$0xff] }
  0x83   : > { %v703_v32 = vadd.f32 %v671_v53, %v639_v36  ;;  %v674_v45 = vmul.f32 %v2029_v21, %v2028_v41  ;;  %v675_v14 = vmul.f32 %v2031_v56, %v2030_v50  ;;  %v705_v39 = vadd.f32 %v673_v54, %v641_v40  ;;  %v2033_v5 = vld [vmem:[#allocation31_spill] sm:$0xff]  ;;  %v2042_v2 = vld [vmem:[#allocation40_spill] sm:$0xff]  ;;  %v2043_v12 = vld [vmem:[#allocation42_spill] sm:$0xff] }
  0x84   : > { %737 = vst [vmem:[%s1456_s10 + $0x38] sm:$0xff] %v721_v28  ;;  %v704_v18 = vadd.f32 %v672_v37, %v640_v42  ;;  %v645_v49 = vmul.f32 %v2032_v35, %v1717_v26  ;;  %v676_v20 = vmul.f32 %v2034_v8, %v2033_v5  ;;  %v677_v9 = vmul.f32 %v2036_v23, %v2035_v10 }
  0x85   : > { %739 = vst [vmem:[%s1456_s10 + $0x48] sm:$0xff] %v723_v48  ;;  %v724_v3 = vpack.c.bf16 %v703_v32, %v702_v25  ;;  %v706_v30 = vadd.f32 %v674_v45, %v642_v55  ;;  %v707_v63 = vadd.f32 %v675_v14, %v643_v44  ;;  %v646_v0 = vmul.f32 %v1775_v62, %v1750_v31  ;;  %v2041_v62 = vld [vmem:[#allocation41_spill] sm:$0xff] }
  0x86   : > { %v725_v15 = vpack.c.bf16 %v705_v39, %v704_v18  ;;  %v678_v26 = vmul.f32 %v2038_v51, %v2037_v58  ;;  %v708_v17 = vadd.f32 %v676_v20, %v644_v27  ;;  %v709_v52 = vadd.f32 %v677_v9, %v645_v49 }
  0x87   : > { %740 = vst [vmem:[%s1456_s10 + $0x50] sm:$0xff] %v724_v3  ;;  %v726_v24 = vpack.c.bf16 %v707_v63, %v706_v30  ;;  %v679_v28 = vmul.f32 %v2040_v6, %v2039_v33  ;;  %v648_v31 = vmul.f32 %v1813_v60, %v1787_v46  ;;  %v649_v22 = vmul.f32 %v1816_v59, %v1790_v57 }
  0x88   : > { %741 = vst [vmem:[%s1456_s10 + $0x58] sm:$0xff] %v725_v15  ;;  %v710_v38 = vadd.f32 %v678_v26, %v646_v0  ;;  %v680_v43 = vmul.f32 %v2041_v62, %v1793_v34  ;;  %v727_v36 = vpack.c.bf16 %v709_v52, %v708_v17  ;;  %v681_v19 = vmul.f32 %v2043_v12, %v2042_v2 }
  0x89   : > { %742 = vst [vmem:[%s1456_s10 + $0x60] sm:$0xff] %v726_v24  ;;  %v711_v4 = vadd.f32 %v679_v28, %v647_v1 }
  0x8a   : > { %v712_v13 = vadd.f32 %v680_v43, %v648_v31  ;;  %743 = vst [vmem:[%s1456_s10 + $0x68] sm:$0xff] %v727_v36  ;;  %v713_v11 = vadd.f32 %v681_v19, %v649_v22 }
  0x8b   : > { %v728_v47 = vpack.c.bf16 %v711_v4, %v710_v38 }
  0x8c   : > { %v729_v53 = vpack.c.bf16 %v713_v11, %v712_v13 }
  0x8d   : > { %744 = vst [vmem:[%s1456_s10 + $0x70] sm:$0xff] %v728_v47 }
  0x8e   : > { %745 = vst [vmem:[%s1456_s10 + $0x78] sm:$0xff] %v729_v53 }
  0x8f PF: > { %p19_p7 = scmp.ge.s32.totalorder %s1133_s23, 4   ;;  %s2044_s18 = smov %s1071_s19 }
  0x90   : > { %s2045_s19 = smov %s1075_s20  ;;  %s2046_s20 = smov %s1143_s26 }
  0x91   : > { %s2047_s21 = smov %s1133_s23  ;;  %21 = sbr.rel (!%p19_p7) target bundleno = 5 (0x5), region = 107 }
  0x96   :  { %789 = vsyncpa [#allocation3], 1 }
  0x97   :  { %791 = vsyncpa [#allocation3 + $0x1], 1 }
  0x98   :  { %792 = vsyncpa [#allocation5], 1 }
  0x99   :  { %794 = vsyncpa [#allocation5 + $0x1], 1 }

// kernel: _fresnel_forward.3
= control target key start
LH: loop header
LB: loop body
LE: loop exit
PB: predicated region body
PF: predicated region fallthrough
CT: control target
= control target key end

     0   :  { %s7098_s0 = inlined_call_operand.hbm [shape: bf16[256,256], index: 0, kind: input, shape index: {}]   ;;  %s7099_s1 = inlined_call_operand.hbm [shape: bf16[256,256], index: 1, kind: input, shape index: {}]   ;;  %s7100_s2 = inlined_call_operand.vmem [shape: bf16[256,256], index: 2, kind: input, shape index: {}]   ;;  %s7101_s3 = inlined_call_operand.vmem [shape: bf16[256,256], index: 3, kind: input, shape index: {}]   ;;  %s7102_s4 = inlined_call_operand.hbm [shape: bf16[256,256], index: 4, kind: input, shape index: {}]   ;;  %s7103_s5 = inlined_call_operand.hbm [shape: bf16[256,256], index: 5, kind: input, shape index: {}]   ;;  %s7104_s6 = inlined_call_operand.hbm [shape: f32[256,256], index: 6, kind: input, shape index: {}]   ;;  %s7105_s7 = inlined_call_operand.hbm [shape: f32[256,256], index: 7, kind: input, shape index: {}]   ;;  %s7106_s8 = inlined_call_operand.vmem [shape: f32[256,256], index: 8, kind: output, shape index: {0}]   ;;  %s7107_s9 = inlined_call_operand.vmem [shape: f32[256,256], index: 9, kind: output, shape index: {1}]  }
   0x1   :  { %7216 = sst [smem:[#allocation69_spill]] %s7098_s0 }
   0x2   :  { %7217 = sst [smem:[#allocation70_spill]] %s7099_s1 }
   0x3   :  { %7218 = sst [smem:[#allocation71_spill]] %s7102_s4 }
   0x4   :  { %7219 = sst [smem:[#allocation72_spill]] %s7107_s9 }
   0x5   :  { %15 = vsyncpa [#allocation3], 0 }
   0x6   :  { %17 = vsyncpa [#allocation3 + $0x1], 0 }
   0x7   :  { %18 = vsyncpa [#allocation5], 0 }
   0x8   :  { %20 = vsyncpa [#allocation5 + $0x1], 0 }
   0x9   :  { %21 = vsyncpa [#allocation8], 0  ;;  %s4884_s30 = smov 0   ;;  %s4886_s10 = smov 0  }
   0xa   :  { %s4888_s11 = smov 0   ;;  %s4890_s12 = smov 0  }
   0xb LB: > { %s4903_s13 = sadd.s32 4294967295, %s4826_s12   ;;  %p47_p0 = scmp.ne.s32.totalorder %s4818_s10, %s4814_s30  ;;  %s4826_s12 = sphi %s4890_s12, %s7411_s12   ;;  %s4822_s11 = sphi %s4888_s11, %s7415_s11   ;;  %s4818_s10 = sphi %s4886_s10, %s7414_s10   ;;  %s4814_s30 = sphi %s4884_s30, %s7413_s30  }
   0xc   : > { %p48_p1 = scmp.eq.s32.totalorder %s4903_s13, 0  ;;  %p3668_p2 = scmp.ge.s32.totalorder %s4826_s12, 1 }
   0xd   : > { %p272_p3 = scmp.lt.s32.totalorder %s4826_s12, 3  ;;  %s7221_s4 = sld [smem:[#allocation71_spill]] }
   0xe   : > { %p4911_p4 = por %p48_p1, %p47_p0  ;;  %s4828_s19 = smov [#allocation6]  }
   0xf   : > { %p4918_p5 = pnand %p3668_p2, %p272_p3  ;;  %s291_s20 = sshll.u32 %s4828_s19, 4  ;;  %s292_s20 = int_to_ptr.vmem [resolvable:$true] %s291_s20 }
  0x10   : > { %s4931_s22 = sadd.s32 1, %s4826_s12   ;;  %s7108_s23 = smov 128  }
  0x11   : > { %p4529_p6 = pneg %p4918_p5  ;;  %7224 = sst [smem:[#allocation17_spill]] %s4931_s22 }
  0x12   : > { %s7110_s24 = smov 8   ;;  %s31_s25 = ssub.s32 %s4826_s12, %s4931_s22 }
  0x13   : > { %s289_s17 = sshll.u32 %s7221_s4, 4  ;;  %p4926_p7 = pnand %p4529_p6, %p48_p1  ;;  %s290_s17 = int_to_ptr.hbm [resolvable:$true] %s289_s17 }
  0x14   : > { %s34_s26 = sadd.s32 1, %s4822_s11  ;;  %p32_p8 = scmp.eq.s32.totalorder %s31_s25, 0 }
  0x15   : > { %4532 = dma.hbm_to_vmem [thread:$0]  (!%p4926_p7), %s290_s17, 4096, %s292_s20, [#allocation5], %s7108_s23, %s7108_s23, %s7110_s24  }
  0x16   : > { %p41_p9 = scmp.ne.s32.totalorder %s4822_s11, %s4818_s10  ;;  %p42_p10 = scmp.eq.s32.totalorder %s4826_s12, 0 }
  0x17   : > { %p4551_p11 = scmp.lt.s32.totalorder %s4826_s12, 2  ;;  %s7112_s29 = sand.u32 1, %s4822_s11  }
  0x18   : > { %s4946_s27 = scalar_select %p32_p8, %s4822_s11, %s34_s26  }
  0x19   : > { %p43_p12 = por %p42_p10, %p41_p9  ;;  %s4952_s30 = sshll.u32 %s7112_s29, 7 }
  0x1a   : > { %7225 = sst [smem:[#allocation18_spill]] %s4946_s27  ;;  %s4344_s15 = sshll.u32 %s4826_s12, 7 }
  0x1b   : > { %s7226_s0 = sld [smem:[#allocation69_spill]]  ;;  %s323_s25 = scalar_lea.vmem [#allocation2], %s4952_s30 }
  0x1c   : > { %s332_s23 = sshll.u32 %s323_s25, 4  ;;  %p4961_p13 = pnand %p4551_p11, %p43_p12  ;;  %s333_s23 = int_to_ptr.vmem [resolvable:$true] %s332_s23 }
  0x1d   : > { %s7228_s1 = sld [smem:[#allocation70_spill]]  ;;  %s7229_s27 = sand.u32 1, %s4826_s12  }
  0x1e   : > { %s4970_s16 = scalar_lea.sflag [#allocation3], %s7229_s27  ;;  %p4626_p2 = pneg %p4961_p13 }
  0x21   : > { %s329_s19 = scalar_lea.hbm %s7226_s0, %s4344_s15  ;;  %s4629_s24 = scalar_lea.hbm %s7226_s0, 256 }
  0x22   : > { %s330_s20 = sshll.u32 %s329_s19, 4  ;;  %s331_s20 = int_to_ptr.hbm [resolvable:$true] %s330_s20 }
  0x23   : > { %s352_s29 = scalar_lea.hbm %s7228_s1, %s4344_s15  ;;  %s4622_s17 = sshra.s32 %s331_s20, 4  ;;  %s4623_s17 = int_to_ptr.hbm [resolvable:$true] %s4622_s17 }
  0x24   : > { %s353_s4 = sshll.u32 %s352_s29, 4  ;;  %s4624_s19 = scalar_lea.hbm %s4623_s17, 128  ;;  %s354_s4 = int_to_ptr.hbm [resolvable:$true] %s353_s4 }
  0x25   : > { %p4625_p0 = scmp.ne.s32.totalorder %s4623_s17, %s4624_s19  ;;  %p4630_p8 = scmp.lt.s32.totalorder %s4623_s17, %s7226_s0 }
  0x26   : > { %p4631_p9 = scmp.lt.s32.totalorder %s4629_s24, %s4624_s19 }
  0x27   : > { %p4627_p3 = pnand %p4626_p2, %p4625_p0 }
  0x28   : > { %p4632_p10 = por %p4631_p9, %p4630_p8 }
  0x29   : > { %p4628_p6 = pneg %p4627_p3 }
  0x2b   : > { %p4633_p11 = pnand %p4632_p10, %p4628_p6 }
  0x2d   : > { %4636 = shalt.err (!%p4633_p11)
}
  0x2e   : > { %s7230_s27 = smov 8   ;;  %s7231_s29 = smov 128  }
  0x2f   : > { %4539 = dma.hbm_to_vmem [thread:$0]  (!%p4961_p13), %s331_s20, 2048, %s333_s23, %s4970_s16, %s7231_s29, %s7231_s29, %s7230_s27  }
  0x30   : > { %s346_s22 = scalar_lea.vmem [#allocation4], %s4952_s30  ;;  %s7232_s17 = sand.u32 1, %s4822_s11  }
  0x31   : > { %s355_s25 = sshll.u32 %s346_s22, 4  ;;  %s4992_s19 = sshll.u32 %s7232_s17, 8  ;;  %s356_s25 = int_to_ptr.vmem [resolvable:$true] %s355_s25 }
  0x32   : > { %s7233_s24 = sand.u32 1, %s4826_s12   ;;  %s4652_s15 = sshra.s32 %s354_s4, 4  ;;  %s4653_s15 = int_to_ptr.hbm [resolvable:$true] %s4652_s15 }
  0x33   : > { %s4996_s28 = scalar_lea.sflag [#allocation5], %s7233_s24  ;;  %s4654_s0 = scalar_lea.hbm %s4653_s15, 128 }
  0x34   : > { %p4655_p12 = scmp.ne.s32.totalorder %s4653_s15, %s4654_s0  ;;  %s4659_s30 = scalar_lea.hbm %s7228_s1, 256 }
  0x35   : > { %p4660_p6 = scmp.lt.s32.totalorder %s4653_s15, %s7228_s1  ;;  %p4661_p8 = scmp.lt.s32.totalorder %s4659_s30, %s4654_s0 }
  0x36   : > { %p4657_p0 = pnand %p4655_p12, %p4626_p2 }
  0x37   : > { %p4662_p9 = por %p4661_p8, %p4660_p6 }
  0x38   : > { %p4658_p3 = pneg %p4657_p0 }
  0x3a   : > { %p4663_p10 = pnand %p4662_p9, %p4658_p3 }
  0x3c   : > { %4666 = shalt.err (!%p4663_p10)
}
  0x3d   : > { %4542 = dma.hbm_to_vmem [thread:$0]  (!%p4961_p13), %s354_s4, 2048, %s356_s25, %s4996_s28, %s7231_s29, %s7231_s29, %s7230_s27  }
  0x3e   : > { %s303_s24 = sshll.u32 %s7103_s5, 4  ;;  %s4831_s0 = smov [#allocation7]   ;;  %s304_s24 = int_to_ptr.hbm [resolvable:$true] %s303_s24 }
  0x3f   : > { %s305_s15 = sshll.u32 %s4831_s0, 4  ;;  %s4348_s23 = sshll.u32 %s4826_s12, 8  ;;  %s306_s15 = int_to_ptr.vmem [resolvable:$true] %s305_s15 }
  0x40   : > { %4535 = dma.hbm_to_vmem [thread:$0]  (!%p4926_p7), %s304_s24, 4096, %s306_s15, [#allocation8], %s7231_s29, %s7231_s29, %s7230_s27  }
  0x41   : > { %s369_s30 = scalar_lea.vmem [#allocation9], %s4992_s19  ;;  %s375_s4 = scalar_lea.hbm %s7104_s6, %s4348_s23 }
  0x42   : > { %s378_s20 = sshll.u32 %s369_s30, 4  ;;  %s376_s25 = sshll.u32 %s375_s4, 4  ;;  %s379_s20 = int_to_ptr.vmem [resolvable:$true] %s378_s20  ;;  %s377_s25 = int_to_ptr.hbm [resolvable:$true] %s376_s25 }
  0x43   : > { %s4712_s9 = sshra.s32 %s377_s25, 4  ;;  %s4719_s12 = scalar_lea.hbm %s7104_s6, 512  ;;  %s4713_s9 = int_to_ptr.hbm [resolvable:$true] %s4712_s9 }
  0x44   : > { %s4714_s17 = scalar_lea.hbm %s4713_s9, 256  ;;  %p4720_p7 = scmp.lt.s32.totalorder %s4713_s9, %s7104_s6 }
  0x45   : > { %p4715_p11 = scmp.ne.s32.totalorder %s4713_s9, %s4714_s17  ;;  %p4721_p3 = scmp.lt.s32.totalorder %s4719_s12, %s4714_s17 }
  0x47   : > { %p4717_p12 = pnand %p4715_p11, %p4626_p2  ;;  %p4722_p6 = por %p4721_p3, %p4720_p7 }
  0x49   : > { %p4718_p0 = pneg %p4717_p12 }
  0x4b   : > { %p4723_p8 = pnand %p4722_p6, %p4718_p0 }
  0x4d   : > { %4726 = shalt.err (!%p4723_p8)
}
  0x4e   : > { %s4832_s1 = smov 256   ;;  %s4833_s0 = smov 16  }
  0x4f   : > { %4545 = dma.hbm_to_vmem [thread:$0]  (!%p4961_p13), %s377_s25, 4096, %s379_s20, %s4970_s16, %s4832_s1, %s4832_s1, %s4833_s0  }
  0x50   : > { %s398_s22 = scalar_lea.hbm %s7105_s7, %s4348_s23  ;;  %s392_s21 = scalar_lea.vmem [#allocation10], %s4992_s19 }
  0x51   : > { %s399_s4 = sshll.u32 %s398_s22, 4  ;;  %s401_s27 = sshll.u32 %s392_s21, 4  ;;  %s400_s4 = int_to_ptr.hbm [resolvable:$true] %s399_s4  ;;  %s402_s27 = int_to_ptr.vmem [resolvable:$true] %s401_s27 }
  0x52   : > { %s4742_s9 = sshra.s32 %s400_s4, 4  ;;  %s4749_s16 = scalar_lea.hbm %s7105_s7, 512  ;;  %s4743_s9 = int_to_ptr.hbm [resolvable:$true] %s4742_s9 }
  0x53   : > { %s4744_s17 = scalar_lea.hbm %s4743_s9, 256  ;;  %p4750_p12 = scmp.lt.s32.totalorder %s4743_s9, %s7105_s7 }
  0x54   : > { %p4745_p9 = scmp.ne.s32.totalorder %s4743_s9, %s4744_s17  ;;  %p4751_p0 = scmp.lt.s32.totalorder %s4749_s16, %s4744_s17 }
  0x56   : > { %p4747_p10 = pnand %p4745_p9, %p4626_p2  ;;  %p4752_p7 = por %p4751_p0, %p4750_p12 }
  0x58   : > { %p4748_p11 = pneg %p4747_p10 }
  0x5a   : > { %p4753_p3 = pnand %p4752_p7, %p4748_p11 }
  0x5c   : > { %4756 = shalt.err (!%p4753_p3)
}
  0x5d   : > { %4548 = dma.hbm_to_vmem [thread:$0]  (!%p4961_p13), %s400_s4, 4096, %s402_s27, %s4996_s28, %s4832_s1, %s4832_s1, %s4833_s0  }
  0x5e   : > { %413 = sbr.rel (%p4918_p5) target bundleno = 1308 (0x51c), region = 52 }
  0x63   : > { %s415_s19 = sand.u32 1, %s4903_s13   ;;  %s417_s23 = sand.u32 1, %s4818_s10  }
  0x64   : > { %s3689_s24 = sshll.u32 %s417_s23, 7  ;;  %s416_s15 = scalar_lea.sflag [#allocation3], %s415_s19 }
  0x65   : > { %s5058_s30 = scalar_lea.vmem [#allocation2], %s3689_s24 }
  0x66   : > { %4789 = dma.done.wait (%p4911_p4), %s416_s15, 2048  }
  0x67   : > { %4791 = vsyncadd (%p4911_p4), %s416_s15, 4294965248  ;;  %s426_s26 = scalar_lea.sflag [#allocation5], %s415_s19  ;;  %s5064_s28 = scalar_lea.vmem [#allocation4], %s3689_s24 }
  0x68   : > { %4793 = dma.done.wait (%p4911_p4), %s426_s26, 2048  }
  0x69   : > { %4795 = vsyncadd (%p4911_p4), %s426_s26, 4294965248 }
  0x6a   : > { %4797 = dma.done.wait (%p48_p1), [#allocation5], 4096  }
  0x6b   : > { %4799 = vsyncadd (%p48_p1), [#allocation5], 4294963200 }
  0x6c   : > { %4801 = dma.done.wait (%p48_p1), [#allocation8], 4096  }
  0x6d   : > { %4803 = vsyncadd (%p48_p1), [#allocation8], 4294963200  ;;  %s3693_s18 = sshll.u32 %s417_s23, 8 }
  0x6e   : > { %s5078_s1 = scalar_lea.vmem [#allocation9], %s3693_s18 }
  0x6f   : > { %4805 = dma.done.wait (%p4911_p4), %s416_s15, 4096  }
  0x70   : > { %4807 = vsyncadd (%p4911_p4), %s416_s15, 4294963200  ;;  %s5084_s0 = scalar_lea.vmem [#allocation10], %s3693_s18 }
  0x71   : > { %4809 = dma.done.wait (%p4911_p4), %s426_s26, 4096  }
  0x72   : > { %4811 = vsyncadd (%p4911_p4), %s426_s26, 4294963200  ;;  %v3823_v0 = vld [vmem:[%s7100_s2 + $0x70] sm:$0xf]  ;;  %v4400_v1 = vld [vmem:[%s7100_s2 + $0x74] sm:$0xf0]  ;;  %s7394_s14 = sld [smem:[#allocation72_spill]] }
  0x73   : > { %v3887_v2 = vld [vmem:[%s7100_s2 + $0xf0] sm:$0xf]  ;;  %v5099_v3 = vor.u32 %v4400_v1, %v3823_v0  ;;  %v4416_v4 = vld [vmem:[%s7100_s2 + $0xf4] sm:$0xf0]  ;;  %v4399_v5 = vld [vmem:[%s7100_s2 + $0x74] sm:$0xf] }
  0x74   : > { %v3825_v6 = vld [vmem:[%s7100_s2 + $0x78] sm:$0xf0]  ;;  %v5110_v7 = vor.u32 %v4416_v4, %v3887_v2  ;;  %v4415_v9 = vld [vmem:[%s7100_s2 + $0xf4] sm:$0xf]  ;;  %v3815_v11 = vld [vmem:[%s7100_s2 + $0x60] sm:$0xf] }
  0x75   : > { %v5112_v8 = vor.u32 %v4399_v5, %v3825_v6  ;;  %v3889_v10 = vld [vmem:[%s7100_s2 + $0xf8] sm:$0xf0]  ;;  %871 = vmatpush.bf16.msra.mxu0 %v5099_v3  ;;  %v4398_v13 = vld [vmem:[%s7100_s2 + $0x64] sm:$0xf0]  ;;  %v3879_v14 = vld [vmem:[%s7100_s2 + $0xe0] sm:$0xf] }
  0x76   : > { %v5124_v12 = vor.u32 %v4415_v9, %v3889_v10  ;;  %v4414_v15 = vld [vmem:[%s7100_s2 + $0xe4] sm:$0xf0]  ;;  %920 = vmatpush.bf16.msra.mxu1 %v5110_v7  ;;  %v5137_v16 = vor.u32 %v4398_v13, %v3815_v11  ;;  %v4397_v18 = vld [vmem:[%s7100_s2 + $0x64] sm:$0xf]  ;;  %v3817_v19 = vld [vmem:[%s7100_s2 + $0x68] sm:$0xf0] }
  0x77   : > { %969 = vmatpush.bf16.msra.mxu2 %v5112_v8  ;;  %v5139_v17 = vor.u32 %v4414_v15, %v3879_v14  ;;  %v4413_v20 = vld [vmem:[%s7100_s2 + $0xe4] sm:$0xf]  ;;  %v5151_v21 = vor.u32 %v4397_v18, %v3817_v19  ;;  %v3881_v22 = vld [vmem:[%s7100_s2 + $0xe8] sm:$0xf0]  ;;  %v3807_v23 = vld [vmem:[%s7100_s2 + $0x50] sm:$0xf] }
  0x78   : > { %1018 = vmatpush.bf16.msra.mxu3 %v5124_v12  ;;  %v4396_v24 = vld [vmem:[%s7100_s2 + $0x54] sm:$0xf0]  ;;  %v5162_v25 = vor.u32 %v4413_v20, %v3881_v22  ;;  %v3871_v26 = vld [vmem:[%s7100_s2 + $0xd0] sm:$0xf]  ;;  %v4395_v28 = vld [vmem:[%s7100_s2 + $0x54] sm:$0xf] }
  0x79   : > { %v4412_v27 = vld [vmem:[%s7100_s2 + $0xd4] sm:$0xf0]  ;;  %872 = vmatpush.bf16.msra.mxu0 %v5137_v16  ;;  %v5174_v29 = vor.u32 %v4396_v24, %v3807_v23  ;;  %v3809_v30 = vld [vmem:[%s7100_s2 + $0x58] sm:$0xf0]  ;;  %v4411_v31 = vld [vmem:[%s7100_s2 + $0xd4] sm:$0xf] }
  0x7a   : > { %v3873_v32 = vld [vmem:[%s7100_s2 + $0xd8] sm:$0xf0]  ;;  %921 = vmatpush.bf16.msra.mxu1 %v5139_v17  ;;  %v5187_v33 = vor.u32 %v4412_v27, %v3871_v26  ;;  %v5189_v34 = vor.u32 %v4395_v28, %v3809_v30  ;;  %v3799_v35 = vld [vmem:[%s7100_s2 + $0x40] sm:$0xf]  ;;  %v4394_v36 = vld [vmem:[%s7100_s2 + $0x44] sm:$0xf0] }
  0x7b   : > { %970 = vmatpush.bf16.msra.mxu2 %v5151_v21  ;;  %v3863_v37 = vld [vmem:[%s7100_s2 + $0xc0] sm:$0xf]  ;;  %v5201_v38 = vor.u32 %v4411_v31, %v3873_v32  ;;  %v4410_v39 = vld [vmem:[%s7100_s2 + $0xc4] sm:$0xf0]  ;;  %v4393_v40 = vld [vmem:[%s7100_s2 + $0x44] sm:$0xf]  ;;  %v5219_v44 = vor.u32 %v4394_v36, %v3799_v35 }
  0x7c   : > { %1019 = vmatpush.bf16.msra.mxu3 %v5162_v25  ;;  %v3801_v41 = vld [vmem:[%s7100_s2 + $0x48] sm:$0xf0]  ;;  %v4409_v42 = vld [vmem:[%s7100_s2 + $0xc4] sm:$0xf]  ;;  %v5223_v45 = vor.u32 %v4410_v39, %v3863_v37  ;;  %v3791_v47 = vld [vmem:[%s7100_s2 + $0x30] sm:$0xf] }
  0x7d   : > { %v3865_v43 = vld [vmem:[%s7100_s2 + $0xc8] sm:$0xf0]  ;;  %873 = vmatpush.bf16.msra.mxu0 %v5174_v29  ;;  %v5225_v46 = vor.u32 %v4393_v40, %v3801_v41  ;;  %v4392_v48 = vld [vmem:[%s7100_s2 + $0x34] sm:$0xf0]  ;;  %v3855_v49 = vld [vmem:[%s7100_s2 + $0xb0] sm:$0xf] }
  0x7e   : > { %922 = vmatpush.bf16.msra.mxu1 %v5187_v33  ;;  %v5237_v50 = vor.u32 %v4409_v42, %v3865_v43  ;;  %v4408_v51 = vld [vmem:[%s7100_s2 + $0xb4] sm:$0xf0]  ;;  %v4391_v52 = vld [vmem:[%s7100_s2 + $0x34] sm:$0xf]  ;;  %v3793_v53 = vld [vmem:[%s7100_s2 + $0x38] sm:$0xf0]  ;;  %v5255_v56 = vor.u32 %v4392_v48, %v3791_v47 }
  0x7f   : > { %971 = vmatpush.bf16.msra.mxu2 %v5189_v34  ;;  %v4407_v54 = vld [vmem:[%s7100_s2 + $0xb4] sm:$0xf]  ;;  %v3857_v55 = vld [vmem:[%s7100_s2 + $0xb8] sm:$0xf0]  ;;  %v5259_v57 = vor.u32 %v4408_v51, %v3855_v49  ;;  %v5261_v58 = vor.u32 %v4391_v52, %v3793_v53  ;;  %v3783_v59 = vld [vmem:[%s7100_s2 + $0x20] sm:$0xf] }
  0x80   : > { %1020 = vmatpush.bf16.msra.mxu3 %v5201_v38  ;;  %v4390_v60 = vld [vmem:[%s7100_s2 + $0x24] sm:$0xf0]  ;;  %v3847_v61 = vld [vmem:[%s7100_s2 + $0xa0] sm:$0xf]  ;;  %v5273_v62 = vor.u32 %v4407_v54, %v3857_v55  ;;  %v4389_v0 = vld [vmem:[%s7100_s2 + $0x24] sm:$0xf] }
  0x81   : > { %874 = vmatpush.bf16.msra.mxu0 %v5219_v44  ;;  %v4406_v63 = vld [vmem:[%s7100_s2 + $0xa4] sm:$0xf0]  ;;  %v3785_v1 = vld [vmem:[%s7100_s2 + $0x28] sm:$0xf0]  ;;  %v4405_v2 = vld [vmem:[%s7100_s2 + $0xa4] sm:$0xf]  ;;  %v5291_v5 = vor.u32 %v4390_v60, %v3783_v59 }
  0x82   : > { %923 = vmatpush.bf16.msra.mxu1 %v5223_v45  ;;  %v3849_v4 = vld [vmem:[%s7100_s2 + $0xa8] sm:$0xf0]  ;;  %v5295_v6 = vor.u32 %v4406_v63, %v3847_v61  ;;  %v5297_v9 = vor.u32 %v4389_v0, %v3785_v1  ;;  %v3775_v10 = vld [vmem:[%s7100_s2 + $0x10] sm:$0xf]  ;;  %v4388_v11 = vld [vmem:[%s7100_s2 + $0x14] sm:$0xf0] }
  0x83   : > { %972 = vmatpush.bf16.msra.mxu2 %v5225_v46  ;;  %v3839_v13 = vld [vmem:[%s7100_s2 + $0x90] sm:$0xf]  ;;  %v5309_v14 = vor.u32 %v4405_v2, %v3849_v4  ;;  %v4404_v15 = vld [vmem:[%s7100_s2 + $0x94] sm:$0xf0]  ;;  %v4387_v18 = vld [vmem:[%s7100_s2 + $0x14] sm:$0xf]  ;;  %v5327_v23 = vor.u32 %v4388_v11, %v3775_v10 }
  0x84   : > { %1021 = vmatpush.bf16.msra.mxu3 %v5237_v50  ;;  %v3777_v19 = vld [vmem:[%s7100_s2 + $0x18] sm:$0xf0]  ;;  %v4403_v20 = vld [vmem:[%s7100_s2 + $0x94] sm:$0xf]  ;;  %v3767_v24 = vld [vmem:[%s7100_s2] sm:$0xf]  ;;  %v5337_v27 = vor.u32 %v4404_v15, %v3839_v13 }
  0x85   : > { %875 = vmatpush.bf16.msra.mxu0 %v5255_v56  ;;  %v3841_v22 = vld [vmem:[%s7100_s2 + $0x98] sm:$0xf0]  ;;  %v4386_v26 = vld [vmem:[%s7100_s2 + $0x4] sm:$0xf0]  ;;  %v5339_v28 = vor.u32 %v4387_v18, %v3777_v19  ;;  %v3831_v30 = vld [vmem:[%s7100_s2 + $0x80] sm:$0xf] }
  0x86   : > { %924 = vmatpush.bf16.msra.mxu1 %v5259_v57  ;;  %v4402_v31 = vld [vmem:[%s7100_s2 + $0x84] sm:$0xf0]  ;;  %v4385_v32 = vld [vmem:[%s7100_s2 + $0x4] sm:$0xf]  ;;  %v5351_v35 = vor.u32 %v4403_v20, %v3841_v22  ;;  %v3769_v36 = vld [vmem:[%s7100_s2 + $0x8] sm:$0xf0]  ;;  %v5370_v43 = vor.u32 %v4386_v26, %v3767_v24 }
  0x87   : > { %973 = vmatpush.bf16.msra.mxu2 %v5261_v58  ;;  %v4401_v37 = vld [vmem:[%s7100_s2 + $0x84] sm:$0xf]  ;;  %v3833_v39 = vld [vmem:[%s7100_s2 + $0x88] sm:$0xf0]  ;;  %v3703_v40 = vld [vmem:[%s5058_s30] sm:$0xf]  ;;  %v5381_v51 = vor.u32 %v4402_v31, %v3831_v30  ;;  %v5383_v52 = vor.u32 %v4385_v32, %v3769_v36 }
  0x88   : > { %1022 = vmatpush.bf16.msra.mxu3 %v5273_v62  ;;  %v4431_v41 = vld [vmem:[%s7101_s3 + $0x74] sm:$0xf]  ;;  %v4017_v42 = vld [vmem:[%s7101_s3 + $0x78] sm:$0xf0]  ;;  %v4354_v47 = vld [vmem:[%s5058_s30 + $0x4] sm:$0xf0]  ;;  %v5388_v55 = vor.u32 %v4401_v37, %v3833_v39 }
  0x89   : > { %876 = vmatpush.bf16.msra.mxu0 %v5291_v5  ;;  %v4447_v48 = vld [vmem:[%s7101_s3 + $0xf4] sm:$0xf]  ;;  %v4081_v49 = vld [vmem:[%s7101_s3 + $0xf8] sm:$0xf0]  ;;  %v4353_v53 = vld [vmem:[%s5058_s30 + $0x4] sm:$0xf]  ;;  %v5390_v59 = vor.u32 %v4431_v41, %v4017_v42  ;;  %v5401_v0 = vor.u32 %v4354_v47, %v3703_v40 }
  0x8a   : > { %925 = vmatpush.bf16.msra.mxu1 %v5295_v6  ;;  %v3705_v54 = vld [vmem:[%s5058_s30 + $0x8] sm:$0xf0]  ;;  %v4015_v60 = vld [vmem:[%s7101_s3 + $0x70] sm:$0xf]  ;;  %v4432_v61 = vld [vmem:[%s7101_s3 + $0x74] sm:$0xf0]  ;;  %v5403_v1 = vor.u32 %v4447_v48, %v4081_v49 }
  0x8b   : > { %974 = vmatpush.bf16.msra.mxu2 %v5297_v9  ;;  %v4079_v63 = vld [vmem:[%s7101_s3 + $0xf0] sm:$0xf]  ;;  %7234 = vst [vmem:[#allocation19_spill] sm:$0xff] %v5401_v0  ;;  %v4448_v2 = vld [vmem:[%s7101_s3 + $0xf4] sm:$0xf0]  ;;  %v5415_v11 = vor.u32 %v4353_v53, %v3705_v54  ;;  %v5425_v18 = vor.u32 %v4432_v61, %v4015_v60 }
  0x8c   : > { %1023 = vmatpush.bf16.msra.mxu3 %v5309_v14  ;;  %v4429_v4 = vld [vmem:[%s7101_s3 + $0x64] sm:$0xf]  ;;  %v4009_v10 = vld [vmem:[%s7101_s3 + $0x68] sm:$0xf0]  ;;  %v5429_v19 = vor.u32 %v4448_v2, %v4079_v63  ;;  %v4007_v22 = vld [vmem:[%s7101_s3 + $0x60] sm:$0xf] }
  0x8d   : > { %877 = vmatpush.bf16.msra.mxu0 %v5327_v23  ;;  %7235 = vst [vmem:[#allocation20_spill] sm:$0xff] %v5415_v11  ;;  %v4445_v13 = vld [vmem:[%s7101_s3 + $0xe4] sm:$0xf]  ;;  %v4073_v15 = vld [vmem:[%s7101_s3 + $0xe8] sm:$0xf0]  ;;  %v5431_v20 = vor.u32 %v4429_v4, %v4009_v10 }
  0x8e   : > { %926 = vmatpush.bf16.msra.mxu1 %v5337_v27  ;;  %v4430_v24 = vld [vmem:[%s7101_s3 + $0x64] sm:$0xf0]  ;;  %v5441_v26 = vor.u32 %v4445_v13, %v4073_v15  ;;  %v4071_v30 = vld [vmem:[%s7101_s3 + $0xe0] sm:$0xf]  ;;  %v4427_v36 = vld [vmem:[%s7101_s3 + $0x54] sm:$0xf] }
  0x8f   : > { %975 = vmatpush.bf16.msra.mxu2 %v5339_v28  ;;  %v4446_v31 = vld [vmem:[%s7101_s3 + $0xe4] sm:$0xf0]  ;;  %v5453_v32 = vor.u32 %v4430_v24, %v4007_v22  ;;  %v4001_v37 = vld [vmem:[%s7101_s3 + $0x58] sm:$0xf0]  ;;  %v4443_v39 = vld [vmem:[%s7101_s3 + $0xd4] sm:$0xf] }
  0x90   : > { %1024 = vmatpush.bf16.msra.mxu3 %v5351_v35  ;;  %v5466_v40 = vor.u32 %v4446_v31, %v4071_v30  ;;  %v5468_v41 = vor.u32 %v4427_v36, %v4001_v37  ;;  %v4065_v42 = vld [vmem:[%s7101_s3 + $0xd8] sm:$0xf0]  ;;  %v3999_v47 = vld [vmem:[%s7101_s3 + $0x50] sm:$0xf]  ;;  %v4428_v48 = vld [vmem:[%s7101_s3 + $0x54] sm:$0xf0] }
  0x91   : > { %878 = vmatpush.bf16.msra.mxu0 %v5370_v43  ;;  %v5480_v49 = vor.u32 %v4443_v39, %v4065_v42  ;;  %v4063_v53 = vld [vmem:[%s7101_s3 + $0xd0] sm:$0xf]  ;;  %v4444_v54 = vld [vmem:[%s7101_s3 + $0xd4] sm:$0xf0]  ;;  %v5489_v60 = vor.u32 %v4428_v48, %v3999_v47  ;;  %v4355_v4 = vld [vmem:[%s5058_s30 + $0x14] sm:$0xf] }
  0x92   : > { %927 = vmatpush.bf16.msra.mxu1 %v5381_v51  ;;  %v5493_v61 = vor.u32 %v4444_v54, %v4063_v53  ;;  %v3711_v63 = vld [vmem:[%s5058_s30 + $0x10] sm:$0xf]  ;;  %v4356_v2 = vld [vmem:[%s5058_s30 + $0x14] sm:$0xf0]  ;;  %v3713_v10 = vld [vmem:[%s5058_s30 + $0x18] sm:$0xf0] }
  0x93   : > { %976 = vmatpush.bf16.msra.mxu2 %v5383_v52  ;;  %v5502_v13 = vor.u32 %v4356_v2, %v3711_v63  ;;  %v5504_v15 = vor.u32 %v4355_v4, %v3713_v10  ;;  %v4425_v22 = vld [vmem:[%s7101_s3 + $0x44] sm:$0xf]  ;;  %v3993_v24 = vld [vmem:[%s7101_s3 + $0x48] sm:$0xf0]  ;;  %v3991_v37 = vld [vmem:[%s7101_s3 + $0x40] sm:$0xf] }
  0x94   : > { %1025 = vmatpush.bf16.msra.mxu3 %v5388_v55  ;;  %879 = vmatmul.bf16.vlgmr.msra.gmra.mxu0 %v5401_v0  ;;  %v4441_v30 = vld [vmem:[%s7101_s3 + $0xc4] sm:$0xf]  ;;  %v5519_v31 = vor.u32 %v4425_v22, %v3993_v24  ;;  %v4057_v36 = vld [vmem:[%s7101_s3 + $0xc8] sm:$0xf0]  ;;  %v4426_v39 = vld [vmem:[%s7101_s3 + $0x44] sm:$0xf0] }
  0x95   : > { %928 = vmatmul.bf16.vlgmr.msra.gmra.mxu1 %v5415_v11  ;;  %1307 = vmatpush.bf16.msrb.mxu0 %v5425_v18  ;;  %7236 = vst [vmem:[#allocation21_spill] sm:$0xff] %v5502_v13  ;;  %v5530_v42 = vor.u32 %v4441_v30, %v4057_v36  ;;  %v5532_v47 = vor.u32 %v4426_v39, %v3991_v37  ;;  %v4055_v48 = vld [vmem:[%s7101_s3 + $0xc0] sm:$0xf]  ;;  %v4442_v53 = vld [vmem:[%s7101_s3 + $0xc4] sm:$0xf0] }
  0x96   : > { %977 = vmatmul.bf16.vlgmr.msra.gmra.mxu2 %v5401_v0  ;;  %1356 = vmatpush.bf16.msrb.mxu1 %v5429_v19  ;;  %7237 = vst [vmem:[#allocation22_spill] sm:$0xff] %v5504_v15  ;;  %v5541_v54 = vor.u32 %v4442_v53, %v4055_v48  ;;  %v3719_v63 = vld [vmem:[%s5058_s30 + $0x20] sm:$0xf]  ;;  %v4358_v2 = vld [vmem:[%s5058_s30 + $0x24] sm:$0xf0] }
  0x97   : > { %1405 = vmatpush.bf16.msrb.mxu2 %v5390_v59  ;;  %1026 = vmatmul.bf16.vlgmr.msra.gmra.mxu3 %v5415_v11  ;;  %v4357_v4 = vld [vmem:[%s5058_s30 + $0x24] sm:$0xf]  ;;  %v3721_v10 = vld [vmem:[%s5058_s30 + $0x28] sm:$0xf0]  ;;  %v5550_v22 = vor.u32 %v4358_v2, %v3719_v63  ;;  %v4423_v30 = vld [vmem:[%s7101_s3 + $0x34] sm:$0xf] }
  0x98   : > { %1454 = vmatpush.bf16.msrb.mxu3 %v5403_v1  ;;  %v5552_v24 = vor.u32 %v4357_v4, %v3721_v10  ;;  %v3985_v36 = vld [vmem:[%s7101_s3 + $0x38] sm:$0xf0]  ;;  %v4439_v37 = vld [vmem:[%s7101_s3 + $0xb4] sm:$0xf]  ;;  %v3983_v53 = vld [vmem:[%s7101_s3 + $0x30] sm:$0xf] }
  0x99   : > { %1308 = vmatpush.bf16.msrb.mxu0 %v5453_v32  ;;  %7238 = vst [vmem:[#allocation23_spill] sm:$0xff] %v5550_v22  ;;  %v5567_v39 = vor.u32 %v4423_v30, %v3985_v36  ;;  %v4049_v48 = vld [vmem:[%s7101_s3 + $0xb8] sm:$0xf0]  ;;  %v4424_v63 = vld [vmem:[%s7101_s3 + $0x34] sm:$0xf0] }
  0x9a   : > { %1357 = vmatpush.bf16.msrb.mxu1 %v5466_v40  ;;  %7239 = vst [vmem:[#allocation24_spill] sm:$0xff] %v5552_v24  ;;  %v5578_v2 = vor.u32 %v4439_v37, %v4049_v48  ;;  %v5580_v4 = vor.u32 %v4424_v63, %v3983_v53  ;;  %v4047_v10 = vld [vmem:[%s7101_s3 + $0xb0] sm:$0xf]  ;;  %v4440_v30 = vld [vmem:[%s7101_s3 + $0xb4] sm:$0xf0] }
  0x9b   : > { %1406 = vmatpush.bf16.msrb.mxu2 %v5431_v20  ;;  %v5589_v36 = vor.u32 %v4440_v30, %v4047_v10  ;;  %v3727_v37 = vld [vmem:[%s5058_s30 + $0x30] sm:$0xf]  ;;  %v4360_v48 = vld [vmem:[%s5058_s30 + $0x34] sm:$0xf0]  ;;  %v4359_v53 = vld [vmem:[%s5058_s30 + $0x34] sm:$0xf] }
  0x9c   : > { %1455 = vmatpush.bf16.msrb.mxu3 %v5441_v26  ;;  %v3729_v63 = vld [vmem:[%s5058_s30 + $0x38] sm:$0xf0]  ;;  %v4421_v10 = vld [vmem:[%s7101_s3 + $0x24] sm:$0xf]  ;;  %v3977_v30 = vld [vmem:[%s7101_s3 + $0x28] sm:$0xf0] }
  0x9d   : > { %1309 = vmatpush.bf16.msrb.mxu0 %v5489_v60 }
  0x9e   : > { %1358 = vmatpush.bf16.msrb.mxu1 %v5493_v61 }
  0x9f   : > { %1407 = vmatpush.bf16.msrb.mxu2 %v5468_v41 }
  0xa0   : > { %1456 = vmatpush.bf16.msrb.mxu3 %v5480_v49 }
  0xa1   : > { %1310 = vmatpush.bf16.msrb.mxu0 %v5532_v47 }
  0xa2   : > { %1359 = vmatpush.bf16.msrb.mxu1 %v5541_v54 }
  0xa3   : > { %1408 = vmatpush.bf16.msrb.mxu2 %v5519_v31 }
  0xa4   : > { %884 = vmatmul.bf16.gmra.mxu0 %v5502_v13  ;;  %1457 = vmatpush.bf16.msrb.mxu3 %v5530_v42 }
  0xa5   : > { %933 = vmatmul.bf16.gmra.mxu1 %v5504_v15  ;;  %1311 = vmatpush.bf16.msrb.mxu0 %v5580_v4 }
  0xa6   : > { %982 = vmatmul.bf16.gmra.mxu2 %v5502_v13  ;;  %1360 = vmatpush.bf16.msrb.mxu1 %v5589_v36 }
  0xa7   : > { %1031 = vmatmul.bf16.gmra.mxu3 %v5504_v15  ;;  %1409 = vmatpush.bf16.msrb.mxu2 %v5567_v39 }
  0xa8   : > { %1458 = vmatpush.bf16.msrb.mxu3 %v5578_v2 }
  0xb4   : > { %889 = vmatmul.bf16.gmra.mxu0 %v5550_v22 }
  0xb5   : > { %938 = vmatmul.bf16.gmra.mxu1 %v5552_v24 }
  0xb6   : > { %987 = vmatmul.bf16.gmra.mxu2 %v5550_v22  ;;  %v5600_v22 = vor.u32 %v4359_v53, %v3729_v63  ;;  %v4041_v53 = vld [vmem:[%s7101_s3 + $0xa8] sm:$0xf0]  ;;  %v3975_v63 = vld [vmem:[%s7101_s3 + $0x20] sm:$0xf] }
  0xb7   : > { %1036 = vmatmul.bf16.gmra.mxu3 %v5552_v24  ;;  %v5598_v24 = vor.u32 %v4360_v48, %v3727_v37  ;;  %v4437_v37 = vld [vmem:[%s7101_s3 + $0xa4] sm:$0xf]  ;;  %v5615_v48 = vor.u32 %v4421_v10, %v3977_v30  ;;  %v4039_v10 = vld [vmem:[%s7101_s3 + $0xa0] sm:$0xf]  ;;  %v4438_v30 = vld [vmem:[%s7101_s3 + $0xa4] sm:$0xf0] }
  0xb8   : > { %7241 = vst [vmem:[#allocation26_spill] sm:$0xff] %v5600_v22  ;;  %v5637_v13 = vor.u32 %v4438_v30, %v4039_v10  ;;  %v4419_v10 = vld [vmem:[%s7101_s3 + $0x14] sm:$0xf]  ;;  %v3969_v30 = vld [vmem:[%s7101_s3 + $0x18] sm:$0xf0] }
  0xb9   : > { %7240 = vst [vmem:[#allocation25_spill] sm:$0xff] %v5598_v24  ;;  %1410 = vmatpush.bf16.msrb.mxu2 %v5615_v48 }
  0xba   : > { %7242 = vst [vmem:[#allocation27_spill] sm:$0xff] %v5615_v48  ;;  %1361 = vmatpush.bf16.msrb.mxu1 %v5637_v13 }
  0xbb   : > { %7245 = vst [vmem:[#allocation30_spill] sm:$0xff] %v5637_v13 }
  0xc4   : > { %894 = vmatmul.bf16.gmra.mxu0 %v5598_v24 }
  0xc5   : > { %943 = vmatmul.bf16.gmra.mxu1 %v5600_v22 }
  0xc6   : > { %992 = vmatmul.bf16.gmra.mxu2 %v5598_v24  ;;  %v5626_v24 = vor.u32 %v4437_v37, %v4041_v53  ;;  %v4362_v37 = vld [vmem:[%s5058_s30 + $0x44] sm:$0xf0]  ;;  %v4361_v53 = vld [vmem:[%s5058_s30 + $0x44] sm:$0xf] }
  0xc7   : > { %1041 = vmatmul.bf16.gmra.mxu3 %v5600_v22  ;;  %v4422_v22 = vld [vmem:[%s7101_s3 + $0x24] sm:$0xf0] }
  0xc8   : > { %7243 = vst [vmem:[#allocation28_spill] sm:$0xff] %v5626_v24  ;;  %v5628_v15 = vor.u32 %v4422_v22, %v3975_v63  ;;  %1459 = vmatpush.bf16.msrb.mxu3 %v5626_v24  ;;  %v3735_v22 = vld [vmem:[%s5058_s30 + $0x40] sm:$0xf]  ;;  %v3737_v63 = vld [vmem:[%s5058_s30 + $0x48] sm:$0xf0] }
  0xc9   : > { %v5646_v11 = vor.u32 %v4362_v37, %v3735_v22  ;;  %v5648_v0 = vor.u32 %v4361_v53, %v3737_v63  ;;  %v4435_v22 = vld [vmem:[%s7101_s3 + $0x94] sm:$0xf]  ;;  %v5663_v37 = vor.u32 %v4419_v10, %v3969_v30  ;;  %v4033_v53 = vld [vmem:[%s7101_s3 + $0x98] sm:$0xf0]  ;;  %v3967_v63 = vld [vmem:[%s7101_s3 + $0x10] sm:$0xf] }
  0xca   : > { %7244 = vst [vmem:[#allocation29_spill] sm:$0xff] %v5628_v15  ;;  %1312 = vmatpush.bf16.msrb.mxu0 %v5628_v15  ;;  %v4031_v10 = vld [vmem:[%s7101_s3 + $0x90] sm:$0xf]  ;;  %v4436_v30 = vld [vmem:[%s7101_s3 + $0x94] sm:$0xf0] }
  0xcb   : > { %7246 = vst [vmem:[#allocation31_spill] sm:$0xff] %v5646_v11  ;;  %1411 = vmatpush.bf16.msrb.mxu2 %v5663_v37  ;;  %v5685_v15 = vor.u32 %v4436_v30, %v4031_v10  ;;  %v4417_v10 = vld [vmem:[%s7101_s3 + $0x4] sm:$0xf]  ;;  %v3961_v30 = vld [vmem:[%s7101_s3 + $0x8] sm:$0xf0] }
  0xcc   : > { %7247 = vst [vmem:[#allocation32_spill] sm:$0xff] %v5648_v0 }
  0xcd   : > { %7249 = vst [vmem:[#allocation34_spill] sm:$0xff] %v5685_v15  ;;  %1362 = vmatpush.bf16.msrb.mxu1 %v5685_v15  ;;  %v4434_v15 = vld [vmem:[%s7101_s3 + $0x84] sm:$0xf0] }
  0xd4   : > { %899 = vmatmul.bf16.gmra.mxu0 %v5646_v11 }
  0xd5   : > { %948 = vmatmul.bf16.gmra.mxu1 %v5648_v0 }
  0xd6   : > { %997 = vmatmul.bf16.gmra.mxu2 %v5646_v11  ;;  %v5674_v11 = vor.u32 %v4435_v22, %v4033_v53  ;;  %v4364_v22 = vld [vmem:[%s5058_s30 + $0x54] sm:$0xf0]  ;;  %v4363_v53 = vld [vmem:[%s5058_s30 + $0x54] sm:$0xf] }
  0xd7   : > { %1046 = vmatmul.bf16.gmra.mxu3 %v5648_v0  ;;  %v4420_v0 = vld [vmem:[%s7101_s3 + $0x14] sm:$0xf0] }
  0xd8   : > { %v5676_v13 = vor.u32 %v4420_v0, %v3967_v63  ;;  %1460 = vmatpush.bf16.msrb.mxu3 %v5674_v11  ;;  %v3743_v0 = vld [vmem:[%s5058_s30 + $0x50] sm:$0xf]  ;;  %v3745_v63 = vld [vmem:[%s5058_s30 + $0x58] sm:$0xf0] }
  0xd9   : > { %v5694_v24 = vor.u32 %v4364_v22, %v3743_v0  ;;  %v5696_v48 = vor.u32 %v4363_v53, %v3745_v63  ;;  %v4433_v0 = vld [vmem:[%s7101_s3 + $0x84] sm:$0xf]  ;;  %v5711_v22 = vor.u32 %v4417_v10, %v3961_v30  ;;  %v4025_v53 = vld [vmem:[%s7101_s3 + $0x88] sm:$0xf0]  ;;  %v3959_v63 = vld [vmem:[%s7101_s3] sm:$0xf] }
  0xda   : > { %7248 = vst [vmem:[#allocation33_spill] sm:$0xff] %v5676_v13  ;;  %1313 = vmatpush.bf16.msrb.mxu0 %v5676_v13  ;;  %v4023_v30 = vld [vmem:[%s7101_s3 + $0x80] sm:$0xf] }
  0xdb   : > { %7250 = vst [vmem:[#allocation35_spill] sm:$0xff] %v5694_v24  ;;  %1412 = vmatpush.bf16.msrb.mxu2 %v5711_v22  ;;  %v5733_v13 = vor.u32 %v4434_v15, %v4023_v30 }
  0xdc   : > { %7251 = vst [vmem:[#allocation36_spill] sm:$0xff] %v5696_v48 }
  0xdd   : > { %1363 = vmatpush.bf16.msrb.mxu1 %v5733_v13 }
  0xdf   : > { %1633 = vmatpush.bf16.msra.mxu2 %v5112_v8  ;;  %v4367_v8 = vld [vmem:[%s5058_s30 + $0x74] sm:$0xf] }
  0xe1   : > { %1584 = vmatpush.bf16.msra.mxu1 %v5110_v7  ;;  %v4368_v7 = vld [vmem:[%s5058_s30 + $0x74] sm:$0xf0] }
  0xe3   : > { %1634 = vmatpush.bf16.msra.mxu2 %v5151_v21  ;;  %v3895_v21 = vld [vmem:[%s5064_s28] sm:$0xf] }
  0xe4   : > { %904 = vmatmul.bf16.gmra.mxu0 %v5694_v24 }
  0xe5   : > { %953 = vmatmul.bf16.gmra.mxu1 %v5696_v48 }
  0xe6   : > { %1002 = vmatmul.bf16.gmra.mxu2 %v5694_v24  ;;  %v5722_v24 = vor.u32 %v4433_v0, %v4025_v53  ;;  %v4366_v0 = vld [vmem:[%s5058_s30 + $0x64] sm:$0xf0]  ;;  %v4365_v53 = vld [vmem:[%s5058_s30 + $0x64] sm:$0xf]  ;;  %1585 = vmatpush.bf16.msra.mxu1 %v5139_v17 }
  0xe7   : > { %1051 = vmatmul.bf16.gmra.mxu3 %v5696_v48  ;;  %v4418_v48 = vld [vmem:[%s7101_s3 + $0x4] sm:$0xf0]  ;;  %1635 = vmatpush.bf16.msra.mxu2 %v5189_v34 }
  0xe8   : > { %v5724_v10 = vor.u32 %v4418_v48, %v3959_v63  ;;  %1461 = vmatpush.bf16.msrb.mxu3 %v5722_v24  ;;  %v3751_v48 = vld [vmem:[%s5058_s30 + $0x60] sm:$0xf]  ;;  %v3753_v63 = vld [vmem:[%s5058_s30 + $0x68] sm:$0xf0] }
  0xe9   : > { %v5747_v15 = vor.u32 %v4366_v0, %v3751_v48  ;;  %v5751_v30 = vor.u32 %v4365_v53, %v3753_v63 }
  0xea   : > { %1314 = vmatpush.bf16.msrb.mxu0 %v5724_v10  ;;  %1586 = vmatpush.bf16.msra.mxu1 %v5187_v33  ;;  %v3897_v33 = vld [vmem:[%s5064_s28 + $0x8] sm:$0xf0] }
  0xeb   : > { %1636 = vmatpush.bf16.msra.mxu2 %v5225_v46 }
  0xec   : > { %1682 = vmatpush.bf16.msra.mxu3 %v5124_v12  ;;  %v3761_v12 = vld [vmem:[%s5058_s30 + $0x78] sm:$0xf0] }
  0xed   : > { %v5778_v17 = vor.u32 %v4367_v8, %v3761_v12  ;;  %v3919_v12 = vld [vmem:[%s5064_s28 + $0x30] sm:$0xf] }
  0xee   : > { %1535 = vmatpush.bf16.msra.mxu0 %v5099_v3  ;;  %1587 = vmatpush.bf16.msra.mxu1 %v5223_v45  ;;  %v3759_v3 = vld [vmem:[%s5058_s30 + $0x70] sm:$0xf]  ;;  %s3695_s30 = sshll.u32 %s4903_s13, 4 }
  0xef   : > { %1637 = vmatpush.bf16.msra.mxu2 %v5261_v58  ;;  %7253 = vst [vmem:[#allocation38_spill] sm:$0xff] %v5778_v17  ;;  %p522_p1 = scmp.lt.s32.totalorder %s3695_s30, 31 }
  0xf0   : > { %1683 = vmatpush.bf16.msra.mxu3 %v5162_v25  ;;  %v4370_v25 = vld [vmem:[%s5064_s28 + $0x4] sm:$0xf0] }
  0xf1   : > { %v5798_v34 = vor.u32 %v4370_v25, %v3895_v21  ;;  %v4375_v21 = vld [vmem:[%s5064_s28 + $0x34] sm:$0xf]  ;;  %v3921_v25 = vld [vmem:[%s5064_s28 + $0x38] sm:$0xf0]  ;;  %s7417_s30 = smov (!%p522_p1, %s3695_s30), 31 }
  0xf2   : > { %1536 = vmatpush.bf16.msra.mxu0 %v5137_v16  ;;  %1588 = vmatpush.bf16.msra.mxu1 %v5259_v57  ;;  %v5775_v16 = vor.u32 %v4368_v7, %v3759_v3 }
  0xf3   : > { %1638 = vmatpush.bf16.msra.mxu2 %v5297_v9  ;;  %v4372_v9 = vld [vmem:[%s5064_s28 + $0x14] sm:$0xf0] }
  0xf4   : > { %909 = vmatmul.bf16.gmra.mxu0 %v5747_v15  ;;  %1684 = vmatpush.bf16.msra.mxu3 %v5201_v38  ;;  %7252 = vst [vmem:[#allocation37_spill] sm:$0xff] %v5775_v16 }
  0xf5   : > { %958 = vmatmul.bf16.gmra.mxu1 %v5751_v30 }
  0xf6   : > { %1007 = vmatmul.bf16.gmra.mxu2 %v5747_v15  ;;  %1537 = vmatpush.bf16.msra.mxu0 %v5174_v29  ;;  %v4369_v29 = vld [vmem:[%s5064_s28 + $0x4] sm:$0xf] }
  0xf7   : > { %1056 = vmatmul.bf16.gmra.mxu3 %v5751_v30  ;;  %1589 = vmatpush.bf16.msra.mxu1 %v5295_v6  ;;  %v3903_v6 = vld [vmem:[%s5064_s28 + $0x10] sm:$0xf] }
  0xf8   : > { %1685 = vmatpush.bf16.msra.mxu3 %v5237_v50  ;;  %1639 = vmatpush.bf16.msra.mxu2 %v5339_v28  ;;  %v5827_v28 = vor.u32 %v4372_v9, %v3903_v6 }
  0xfa   : > { %1538 = vmatpush.bf16.msra.mxu0 %v5219_v44  ;;  %v5800_v44 = vor.u32 %v4369_v29, %v3897_v33 }
  0xfb   : > { %1590 = vmatpush.bf16.msra.mxu1 %v5337_v27 }
  0xfc   : > { %1686 = vmatpush.bf16.msra.mxu3 %v5273_v62  ;;  %1640 = vmatpush.bf16.msra.mxu2 %v5383_v52 }
  0xfe   : > { %1539 = vmatpush.bf16.msra.mxu0 %v5255_v56 }
  0xff   : > { %1591 = vmatpush.bf16.msra.mxu1 %v5381_v51 }
 0x100   : > { %1687 = vmatpush.bf16.msra.mxu3 %v5309_v14  ;;  %v4371_v14 = vld [vmem:[%s5064_s28 + $0x14] sm:$0xf] }
 0x102   : > { %1540 = vmatpush.bf16.msra.mxu0 %v5291_v5 }
 0x104   : > { %914 = vmatmul.bf16.gmra.mxu0 %v5775_v16  ;;  %1688 = vmatpush.bf16.msra.mxu3 %v5351_v35 }
 0x105   : > { %963 = vmatmul.bf16.gmra.mxu1 %v5778_v17 }
 0x106   : > { %1012 = vmatmul.bf16.gmra.mxu2 %v5775_v16  ;;  %1541 = vmatpush.bf16.msra.mxu0 %v5327_v23  ;;  %v3905_v23 = vld [vmem:[%s5064_s28 + $0x18] sm:$0xf0] }
 0x107   : > { %1061 = vmatmul.bf16.gmra.mxu3 %v5778_v17  ;;  %v5830_v51 = vor.u32 %v4371_v14, %v3905_v23 }
 0x108   : > { %1689 = vmatpush.bf16.msra.mxu3 %v5388_v55 }
 0x10a   : > { %1542 = vmatpush.bf16.msra.mxu0 %v5370_v43 }
 0x111   : > { %v880_v38 = vpop.f32.mrf.mxu0 }
 0x112   : > { %v929_v45 = vpop.f32.mrf.mxu1 }
 0x113   : > { %v5802_v46 = vadd.f32 %v929_v45, %v880_v38  ;;  %v5890_v45 = vor.u32 %v4375_v21, %v3921_v25 }
 0x114   : > { %1315 = vmatmul.bf16.vlgmr.msrb.gmra.mxu0 %v5798_v34 }
 0x115   : > { %1364 = vmatmul.bf16.vlgmr.msrb.gmra.mxu1 %v5800_v44  ;;  %1731 = vmatpush.bf16.msrb.mxu0 %v5425_v18 }
 0x116   : > { %1413 = vmatmul.bf16.vlgmr.msrb.gmra.mxu2 %v5798_v34  ;;  %1780 = vmatpush.bf16.msrb.mxu1 %v5429_v19 }
 0x117   : > { %1462 = vmatmul.bf16.vlgmr.msrb.gmra.mxu3 %v5800_v44  ;;  %1829 = vmatpush.bf16.msrb.mxu2 %v5390_v59 }
 0x118   : > { %1878 = vmatpush.bf16.msrb.mxu3 %v5403_v1 }
 0x119   : > { %v978_v50 = vpop.f32.mrf.mxu2  ;;  %v882_v57 = vpop.f32.mrf.mxu0  ;;  %1732 = vmatpush.bf16.msrb.mxu0 %v5453_v32  ;;  %v7254_v32 = vld [vmem:[#allocation27_spill] sm:$0xff] }
 0x11a   : > { %v1027_v56 = vpop.f32.mrf.mxu3  ;;  %v931_v62 = vpop.f32.mrf.mxu1  ;;  %1781 = vmatpush.bf16.msrb.mxu1 %v5466_v40 }
 0x11b   : > { %v5812_v58 = vadd.f32 %v1027_v56, %v978_v50  ;;  %1830 = vmatpush.bf16.msrb.mxu2 %v5431_v20  ;;  %v5815_v5 = vadd.f32 %v931_v62, %v882_v57 }
 0x11c   : > { %1879 = vmatpush.bf16.msrb.mxu3 %v5441_v26 }
 0x11d   : > { %1733 = vmatpush.bf16.msrb.mxu0 %v5489_v60  ;;  %v7257_v60 = vld [vmem:[#allocation30_spill] sm:$0xff] }
 0x11e   : > { %1782 = vmatpush.bf16.msrb.mxu1 %v5493_v61  ;;  %v3911_v61 = vld [vmem:[%s5064_s28 + $0x20] sm:$0xf] }
 0x11f   : > { %1831 = vmatpush.bf16.msrb.mxu2 %v5468_v41  ;;  %v7255_v41 = vld [vmem:[#allocation28_spill] sm:$0xff] }
 0x120   : > { %1880 = vmatpush.bf16.msrb.mxu3 %v5480_v49  ;;  %v7256_v49 = vld [vmem:[#allocation29_spill] sm:$0xff] }
 0x121   : > { %v980_v27 = vpop.f32.mrf.mxu2  ;;  %v885_v43 = vpop.f32.mrf.mxu0  ;;  %1734 = vmatpush.bf16.msrb.mxu0 %v5532_v47  ;;  %v3913_v47 = vld [vmem:[%s5064_s28 + $0x28] sm:$0xf0] }
 0x122   : > { %v1029_v35 = vpop.f32.mrf.mxu3  ;;  %v934_v55 = vpop.f32.mrf.mxu1  ;;  %1783 = vmatpush.bf16.msrb.mxu1 %v5541_v54  ;;  %v7258_v54 = vld [vmem:[#allocation33_spill] sm:$0xff] }
 0x123   : > { %v5832_v52 = vadd.f32 %v1029_v35, %v980_v27  ;;  %1832 = vmatpush.bf16.msrb.mxu2 %v5519_v31  ;;  %v5835_v59 = vadd.f32 %v934_v55, %v885_v43  ;;  %v4374_v31 = vld [vmem:[%s5064_s28 + $0x24] sm:$0xf0]  ;;  %v3927_v35 = vld [vmem:[%s5064_s28 + $0x40] sm:$0xf]  ;;  %v4377_v55 = vld [vmem:[%s5064_s28 + $0x44] sm:$0xf] }
 0x124   : > { %1881 = vmatpush.bf16.msrb.mxu3 %v5530_v42  ;;  %1320 = vmatmul.bf16.gmra.mxu0 %v5827_v28  ;;  %v4373_v42 = vld [vmem:[%s5064_s28 + $0x24] sm:$0xf]  ;;  %v4378_v43 = vld [vmem:[%s5064_s28 + $0x44] sm:$0xf0] }
 0x125   : > { %1369 = vmatmul.bf16.gmra.mxu1 %v5830_v51  ;;  %1735 = vmatpush.bf16.msrb.mxu0 %v5580_v4  ;;  %v7259_v4 = vld [vmem:[#allocation34_spill] sm:$0xff]  ;;  %v5866_v0 = vor.u32 %v4373_v42, %v3913_v47 }
 0x126   : > { %1418 = vmatmul.bf16.gmra.mxu2 %v5827_v28  ;;  %1784 = vmatpush.bf16.msrb.mxu1 %v5589_v36 }
 0x127   : > { %1467 = vmatmul.bf16.gmra.mxu3 %v5830_v51  ;;  %1833 = vmatpush.bf16.msrb.mxu2 %v5567_v39 }
 0x128   : > { %1882 = vmatpush.bf16.msrb.mxu3 %v5578_v2  ;;  %v5863_v2 = vor.u32 %v4374_v31, %v3911_v61 }
 0x129   : > { %v983_v1 = vpop.f32.mrf.mxu2  ;;  %v887_v19 = vpop.f32.mrf.mxu0  ;;  %1736 = vmatpush.bf16.msrb.mxu0 %v7256_v49 }
 0x12a   : > { %v1032_v18 = vpop.f32.mrf.mxu3  ;;  %v936_v26 = vpop.f32.mrf.mxu1  ;;  %1785 = vmatpush.bf16.msrb.mxu1 %v7257_v60 }
 0x12b   : > { %v5848_v20 = vadd.f32 %v1032_v18, %v983_v1  ;;  %1834 = vmatpush.bf16.msrb.mxu2 %v7254_v32  ;;  %v5851_v40 = vadd.f32 %v936_v26, %v887_v19  ;;  %v3929_v1 = vld [vmem:[%s5064_s28 + $0x48] sm:$0xf0]  ;;  %v5908_v19 = vor.u32 %v4378_v43, %v3927_v35  ;;  %v4382_v35 = vld [vmem:[%s5064_s28 + $0x64] sm:$0xf0]  ;;  %v4381_v43 = vld [vmem:[%s5064_s28 + $0x64] sm:$0xf] }
 0x12c   : > { %1883 = vmatpush.bf16.msrb.mxu3 %v7255_v41  ;;  %v5910_v41 = vor.u32 %v4377_v55, %v3929_v1  ;;  %v3945_v55 = vld [vmem:[%s5064_s28 + $0x68] sm:$0xf0] }
 0x12d   : > { %1737 = vmatpush.bf16.msrb.mxu0 %v7258_v54 }
 0x12e   : > { %1786 = vmatpush.bf16.msrb.mxu1 %v7259_v4 }
 0x12f   : > { %1835 = vmatpush.bf16.msrb.mxu2 %v5663_v37 }
 0x130   : > { %1884 = vmatpush.bf16.msrb.mxu3 %v5674_v11 }
 0x131   : > { %v985_v39 = vpop.f32.mrf.mxu2  ;;  %v890_v48 = vpop.f32.mrf.mxu0  ;;  %1738 = vmatpush.bf16.msrb.mxu0 %v5724_v10  ;;  %v4376_v10 = vld [vmem:[%s5064_s28 + $0x34] sm:$0xf0] }
 0x132   : > { %v1034_v36 = vpop.f32.mrf.mxu3  ;;  %v939_v63 = vpop.f32.mrf.mxu1  ;;  %1787 = vmatpush.bf16.msrb.mxu1 %v5733_v13  ;;  %v5888_v13 = vor.u32 %v4376_v10, %v3919_v12 }
 0x133   : > { %v5868_v53 = vadd.f32 %v1034_v36, %v985_v39  ;;  %1836 = vmatpush.bf16.msrb.mxu2 %v5711_v22  ;;  %v5871_v37 = vadd.f32 %v939_v63, %v890_v48  ;;  %v3935_v36 = vld [vmem:[%s5064_s28 + $0x50] sm:$0xf]  ;;  %v4380_v48 = vld [vmem:[%s5064_s28 + $0x54] sm:$0xf0]  ;;  %v4379_v63 = vld [vmem:[%s5064_s28 + $0x54] sm:$0xf] }
 0x134   : > { %1885 = vmatpush.bf16.msrb.mxu3 %v5722_v24  ;;  %1325 = vmatmul.bf16.gmra.mxu0 %v5863_v2 }
 0x135   : > { %1374 = vmatmul.bf16.gmra.mxu1 %v5866_v0 }
 0x136   : > { %1423 = vmatmul.bf16.gmra.mxu2 %v5863_v2 }
 0x137   : > { %1472 = vmatmul.bf16.gmra.mxu3 %v5866_v0 }
 0x139   : > { %v988_v11 = vpop.f32.mrf.mxu2  ;;  %v892_v3 = vpop.f32.mrf.mxu0 }
 0x13a   : > { %v1037_v22 = vpop.f32.mrf.mxu3  ;;  %v941_v8 = vpop.f32.mrf.mxu1 }
 0x13b   : > { %v5880_v7 = vadd.f32 %v1037_v22, %v988_v11  ;;  %v5882_v24 = vadd.f32 %v941_v8, %v892_v3  ;;  %v3937_v11 = vld [vmem:[%s5064_s28 + $0x58] sm:$0xf0]  ;;  %v5928_v3 = vor.u32 %v4380_v48, %v3935_v36 }
 0x13c   : > { %v5930_v10 = vor.u32 %v4379_v63, %v3937_v11 }
 0x141   : > { %v990_v29 = vpop.f32.mrf.mxu2  ;;  %v895_v38 = vpop.f32.mrf.mxu0 }
 0x142   : > { %v1039_v33 = vpop.f32.mrf.mxu3  ;;  %v944_v56 = vpop.f32.mrf.mxu1 }
 0x143   : > { %v5892_v50 = vadd.f32 %v1039_v33, %v990_v29  ;;  %v5894_v57 = vadd.f32 %v944_v56, %v895_v38 }
 0x144   : > { %1330 = vmatmul.bf16.gmra.mxu0 %v5888_v13 }
 0x145   : > { %1379 = vmatmul.bf16.gmra.mxu1 %v5890_v45 }
 0x146   : > { %1428 = vmatmul.bf16.gmra.mxu2 %v5888_v13 }
 0x147   : > { %1477 = vmatmul.bf16.gmra.mxu3 %v5890_v45 }
 0x149   : > { %v993_v62 = vpop.f32.mrf.mxu2  ;;  %v897_v9 = vpop.f32.mrf.mxu0 }
 0x14a   : > { %v1042_v6 = vpop.f32.mrf.mxu3  ;;  %v946_v23 = vpop.f32.mrf.mxu1 }
 0x14b   : > { %v5900_v14 = vadd.f32 %v1042_v6, %v993_v62  ;;  %v5902_v27 = vadd.f32 %v946_v23, %v897_v9  ;;  %v3943_v23 = vld [vmem:[%s5064_s28 + $0x60] sm:$0xf] }
 0x151   : > { %v995_v18 = vpop.f32.mrf.mxu2  ;;  %v900_v32 = vpop.f32.mrf.mxu0 }
 0x152   : > { %v1044_v26 = vpop.f32.mrf.mxu3  ;;  %v949_v60 = vpop.f32.mrf.mxu1 }
 0x153   : > { %v5912_v49 = vadd.f32 %v1044_v26, %v995_v18  ;;  %v5914_v61 = vadd.f32 %v949_v60, %v900_v32  ;;  %v5948_v18 = vor.u32 %v4382_v35, %v3943_v23  ;;  %v5950_v60 = vor.u32 %v4381_v43, %v3945_v55 }
 0x154   : > { %1335 = vmatmul.bf16.gmra.mxu0 %v5908_v19 }
 0x155   : > { %1384 = vmatmul.bf16.gmra.mxu1 %v5910_v41 }
 0x156   : > { %1433 = vmatmul.bf16.gmra.mxu2 %v5908_v19 }
 0x157   : > { %1482 = vmatmul.bf16.gmra.mxu3 %v5910_v41 }
 0x159   : > { %v998_v31 = vpop.f32.mrf.mxu2  ;;  %v902_v47 = vpop.f32.mrf.mxu0 }
 0x15a   : > { %v1047_v42 = vpop.f32.mrf.mxu3  ;;  %v951_v39 = vpop.f32.mrf.mxu1 }
 0x15b   : > { %v5920_v54 = vadd.f32 %v1047_v42, %v998_v31  ;;  %v5922_v4 = vadd.f32 %v951_v39, %v902_v47 }
 0x161   : > { %v1000_v22 = vpop.f32.mrf.mxu2  ;;  %v905_v12 = vpop.f32.mrf.mxu0 }
 0x162   : > { %v1049_v8 = vpop.f32.mrf.mxu3  ;;  %v954_v25 = vpop.f32.mrf.mxu1 }
 0x163   : > { %v5932_v21 = vadd.f32 %v1049_v8, %v1000_v22  ;;  %v5934_v29 = vadd.f32 %v954_v25, %v905_v12  ;;  %v3951_v8 = vld [vmem:[%s5064_s28 + $0x70] sm:$0xf]  ;;  %v4384_v12 = vld [vmem:[%s5064_s28 + $0x74] sm:$0xf0]  ;;  %v4383_v25 = vld [vmem:[%s5064_s28 + $0x74] sm:$0xf] }
 0x164   : > { %1340 = vmatmul.bf16.gmra.mxu0 %v5928_v3 }
 0x165   : > { %1389 = vmatmul.bf16.gmra.mxu1 %v5930_v10 }
 0x166   : > { %1438 = vmatmul.bf16.gmra.mxu2 %v5928_v3 }
 0x167   : > { %1487 = vmatmul.bf16.gmra.mxu3 %v5930_v10 }
 0x169   : > { %v1003_v33 = vpop.f32.mrf.mxu2  ;;  %v907_v56 = vpop.f32.mrf.mxu0 }
 0x16a   : > { %v1052_v38 = vpop.f32.mrf.mxu3  ;;  %v956_v6 = vpop.f32.mrf.mxu1 }
 0x16b   : > { %v5940_v62 = vadd.f32 %v1052_v38, %v1003_v33  ;;  %v5942_v9 = vadd.f32 %v956_v6, %v907_v56  ;;  %v3953_v33 = vld [vmem:[%s5064_s28 + $0x78] sm:$0xf0]  ;;  %v5968_v56 = vor.u32 %v4384_v12, %v3951_v8  ;;  %s4351_s28 = sshll.u32 %s7417_s30, 4 }
 0x16c   : > { %v5970_v35 = vor.u32 %v4383_v25, %v3953_v33  ;;  %s6859_s17 = scalar_lea.vmem %s7106_s8, %s4351_s28  ;;  %s6864_s16 = scalar_lea.vmem %s7394_s14, %s4351_s28 }
 0x171   : > { %v1005_v1 = vpop.f32.mrf.mxu2  ;;  %v910_v32 = vpop.f32.mrf.mxu0 }
 0x172   : > { %v1054_v26 = vpop.f32.mrf.mxu3  ;;  %v959_v42 = vpop.f32.mrf.mxu1 }
 0x173   : > { %v5952_v31 = vadd.f32 %v1054_v26, %v1005_v1  ;;  %v5954_v47 = vadd.f32 %v959_v42, %v910_v32 }
 0x174   : > { %1345 = vmatmul.bf16.gmra.mxu0 %v5948_v18 }
 0x175   : > { %1394 = vmatmul.bf16.gmra.mxu1 %v5950_v60 }
 0x176   : > { %1443 = vmatmul.bf16.gmra.mxu2 %v5948_v18 }
 0x177   : > { %1492 = vmatmul.bf16.gmra.mxu3 %v5950_v60 }
 0x179   : > { %v1008_v39 = vpop.f32.mrf.mxu2  ;;  %v912_v48 = vpop.f32.mrf.mxu0 }
 0x17a   : > { %v1057_v36 = vpop.f32.mrf.mxu3  ;;  %v961_v11 = vpop.f32.mrf.mxu1 }
 0x17b   : > { %v5960_v63 = vadd.f32 %v1057_v36, %v1008_v39  ;;  %v5962_v22 = vadd.f32 %v961_v11, %v912_v48 }
 0x181   : > { %v1010_v38 = vpop.f32.mrf.mxu2  ;;  %v915_v23 = vpop.f32.mrf.mxu0 }
 0x182   : > { %v1059_v6 = vpop.f32.mrf.mxu3  ;;  %v964_v55 = vpop.f32.mrf.mxu1 }
 0x183   : > { %v5972_v43 = vadd.f32 %v1059_v6, %v1010_v38  ;;  %v5974_v1 = vadd.f32 %v964_v55, %v915_v23 }
 0x184   : > { %1350 = vmatmul.bf16.gmra.mxu0 %v5968_v56 }
 0x185   : > { %1399 = vmatmul.bf16.gmra.mxu1 %v5970_v35 }
 0x186   : > { %1448 = vmatmul.bf16.gmra.mxu2 %v5968_v56 }
 0x187   : > { %1497 = vmatmul.bf16.gmra.mxu3 %v5970_v35 }
 0x189   : > { %v1013_v26 = vpop.f32.mrf.mxu2  ;;  %v917_v42 = vpop.f32.mrf.mxu0 }
 0x18a   : > { %v1062_v32 = vpop.f32.mrf.mxu3  ;;  %v966_v36 = vpop.f32.mrf.mxu1 }
 0x18b   : > { %v5980_v39 = vadd.f32 %v1062_v32, %v1013_v26  ;;  %v5982_v48 = vadd.f32 %v966_v36, %v917_v42 }
 0x191   : > { %v1015_v11 = vpop.f32.mrf.mxu2  ;;  %v1316_v12 = vpop.f32.mrf.mxu0 }
 0x192   : > { %v1064_v8 = vpop.f32.mrf.mxu3  ;;  %v1365_v33 = vpop.f32.mrf.mxu1 }
 0x193   : > { %v5984_v25 = vadd.f32 %v1064_v8, %v1015_v11  ;;  %v1366_v38 = vadd.f32 %v1365_v33, %v1316_v12 }
 0x194   : > { %1543 = vmatmul.bf16.vlgmr.msra.gmra.mxu0 %v5798_v34 }
 0x195   : > { %v1503_v6 = vsub.f32 %v5802_v46, %v1366_v38  ;;  %1592 = vmatmul.bf16.vlgmr.msra.gmra.mxu1 %v5800_v44 }
 0x196   : > { %1641 = vmatmul.bf16.vlgmr.msra.gmra.mxu2 %v5798_v34 }
 0x197   : > { %1690 = vmatmul.bf16.vlgmr.msra.gmra.mxu3 %v5800_v44 }
 0x199   : > { %v1414_v23 = vpop.f32.mrf.mxu2  ;;  %v1318_v26 = vpop.f32.mrf.mxu0 }
 0x19a   : > { %v1463_v55 = vpop.f32.mrf.mxu3  ;;  %v1367_v42 = vpop.f32.mrf.mxu1 }
 0x19b   : > { %v1464_v32 = vadd.f32 %v1463_v55, %v1414_v23  ;;  %v1368_v36 = vadd.f32 %v1367_v42, %v1318_v26 }
 0x19d   : > { %v1504_v11 = vsub.f32 %v5812_v58, %v1464_v32  ;;  %v1505_v8 = vsub.f32 %v5815_v5, %v1368_v36 }
 0x19f   : > { %v5993_v12 = vpack.c.bf16 %v1505_v8, %v1503_v6 }
 0x1a1   : > { %7260 = vst [vmem:[#allocation27_spill] sm:$0xff] %v5993_v12  ;;  %v1416_v33 = vpop.f32.mrf.mxu2  ;;  %v1321_v38 = vpop.f32.mrf.mxu0 }
 0x1a2   : > { %v1465_v46 = vpop.f32.mrf.mxu3  ;;  %v1370_v16 = vpop.f32.mrf.mxu1 }
 0x1a3   : > { %v1466_v17 = vadd.f32 %v1465_v46, %v1416_v33  ;;  %v1371_v34 = vadd.f32 %v1370_v16, %v1321_v38 }
 0x1a4   : > { %1548 = vmatmul.bf16.gmra.mxu0 %v5827_v28 }
 0x1a5   : > { %v1506_v44 = vsub.f32 %v5832_v52, %v1466_v17  ;;  %v1507_v23 = vsub.f32 %v5835_v59, %v1371_v34  ;;  %1597 = vmatmul.bf16.gmra.mxu1 %v5830_v51 }
 0x1a6   : > { %1646 = vmatmul.bf16.gmra.mxu2 %v5827_v28 }
 0x1a7   : > { %v6000_v58 = vpack.c.bf16 %v1506_v44, %v1504_v11  ;;  %1695 = vmatmul.bf16.gmra.mxu3 %v5830_v51 }
 0x1a9   : > { %7261 = vst [vmem:[#allocation28_spill] sm:$0xff] %v6000_v58  ;;  %v1419_v5 = vpop.f32.mrf.mxu2  ;;  %v1323_v55 = vpop.f32.mrf.mxu0 }
 0x1aa   : > { %v1468_v6 = vpop.f32.mrf.mxu3  ;;  %v1372_v32 = vpop.f32.mrf.mxu1 }
 0x1ab   : > { %v1469_v26 = vadd.f32 %v1468_v6, %v1419_v5  ;;  %v1373_v16 = vadd.f32 %v1372_v32, %v1323_v55 }
 0x1ad   : > { %v1508_v17 = vsub.f32 %v5848_v20, %v1469_v26  ;;  %v1509_v52 = vsub.f32 %v5851_v40, %v1373_v16 }
 0x1af   : > { %v6005_v42 = vpack.c.bf16 %v1509_v52, %v1507_v23 }
 0x1b1   : > { %7262 = vst [vmem:[#allocation29_spill] sm:$0xff] %v6005_v42  ;;  %v1421_v59 = vpop.f32.mrf.mxu2  ;;  %v1326_v8 = vpop.f32.mrf.mxu0 }
 0x1b2   : > { %v1470_v36 = vpop.f32.mrf.mxu3  ;;  %v1375_v11 = vpop.f32.mrf.mxu1 }
 0x1b3   : > { %v1471_v28 = vadd.f32 %v1470_v36, %v1421_v59  ;;  %v1376_v33 = vadd.f32 %v1375_v11, %v1326_v8 }
 0x1b4   : > { %1553 = vmatmul.bf16.gmra.mxu0 %v5863_v2 }
 0x1b5   : > { %v1510_v51 = vsub.f32 %v5868_v53, %v1471_v28  ;;  %v1511_v46 = vsub.f32 %v5871_v37, %v1376_v33  ;;  %1602 = vmatmul.bf16.gmra.mxu1 %v5866_v0 }
 0x1b6   : > { %1651 = vmatmul.bf16.gmra.mxu2 %v5863_v2 }
 0x1b7   : > { %v6012_v20 = vpack.c.bf16 %v1510_v51, %v1508_v17  ;;  %1700 = vmatmul.bf16.gmra.mxu3 %v5866_v0 }
 0x1b9   : > { %7263 = vst [vmem:[#allocation30_spill] sm:$0xff] %v6012_v20  ;;  %v1424_v40 = vpop.f32.mrf.mxu2  ;;  %v1328_v34 = vpop.f32.mrf.mxu0 }
 0x1ba   : > { %v1473_v38 = vpop.f32.mrf.mxu3  ;;  %v1377_v23 = vpop.f32.mrf.mxu1 }
 0x1bb   : > { %v1474_v44 = vadd.f32 %v1473_v38, %v1424_v40  ;;  %v1378_v5 = vadd.f32 %v1377_v23, %v1328_v34 }
 0x1bd   : > { %v1512_v53 = vsub.f32 %v5880_v7, %v1474_v44  ;;  %v1513_v6 = vsub.f32 %v5882_v24, %v1378_v5 }
 0x1bf   : > { %v6017_v55 = vpack.c.bf16 %v1513_v6, %v1511_v46 }
 0x1c1   : > { %7264 = vst [vmem:[#allocation33_spill] sm:$0xff] %v6017_v55  ;;  %v1426_v37 = vpop.f32.mrf.mxu2  ;;  %v1331_v32 = vpop.f32.mrf.mxu0 }
 0x1c2   : > { %v1475_v26 = vpop.f32.mrf.mxu3  ;;  %v1380_v16 = vpop.f32.mrf.mxu1 }
 0x1c3   : > { %v1476_v2 = vadd.f32 %v1475_v26, %v1426_v37  ;;  %v1381_v17 = vadd.f32 %v1380_v16, %v1331_v32 }
 0x1c4   : > { %1558 = vmatmul.bf16.gmra.mxu0 %v5888_v13 }
 0x1c5   : > { %v1514_v0 = vsub.f32 %v5892_v50, %v1476_v2  ;;  %v1515_v52 = vsub.f32 %v5894_v57, %v1381_v17  ;;  %1607 = vmatmul.bf16.gmra.mxu1 %v5890_v45 }
 0x1c6   : > { %1656 = vmatmul.bf16.gmra.mxu2 %v5888_v13 }
 0x1c7   : > { %v6024_v7 = vpack.c.bf16 %v1514_v0, %v1512_v53  ;;  %1705 = vmatmul.bf16.gmra.mxu3 %v5890_v45 }
 0x1c9   : > { %7265 = vst [vmem:[#allocation34_spill] sm:$0xff] %v6024_v7  ;;  %v1429_v24 = vpop.f32.mrf.mxu2  ;;  %v1333_v36 = vpop.f32.mrf.mxu0 }
 0x1ca   : > { %v1478_v59 = vpop.f32.mrf.mxu3  ;;  %v1382_v28 = vpop.f32.mrf.mxu1 }
 0x1cb   : > { %v1479_v8 = vadd.f32 %v1478_v59, %v1429_v24  ;;  %v1383_v11 = vadd.f32 %v1382_v28, %v1333_v36 }
 0x1cd   : > { %v1516_v50 = vsub.f32 %v5900_v14, %v1479_v8  ;;  %v1517_v33 = vsub.f32 %v5902_v27, %v1383_v11 }
 0x1cf   : > { %v6029_v51 = vpack.c.bf16 %v1517_v33, %v1515_v52 }
 0x1d1   : > { %7266 = vst [vmem:[#allocation39_spill] sm:$0xff] %v6029_v51  ;;  %v1431_v57 = vpop.f32.mrf.mxu2  ;;  %v1336_v40 = vpop.f32.mrf.mxu0 }
 0x1d2   : > { %v1480_v46 = vpop.f32.mrf.mxu3  ;;  %v1385_v38 = vpop.f32.mrf.mxu1 }
 0x1d3   : > { %v1481_v13 = vadd.f32 %v1480_v46, %v1431_v57  ;;  %v1386_v34 = vadd.f32 %v1385_v38, %v1336_v40  ;;  %v4145_v38 = vld [vmem:[#allocation6 + $0x78] sm:$0xf0] }
 0x1d4   : > { %1563 = vmatmul.bf16.gmra.mxu0 %v5908_v19 }
 0x1d5   : > { %v1518_v45 = vsub.f32 %v5912_v49, %v1481_v13  ;;  %v1519_v44 = vsub.f32 %v5914_v61, %v1386_v34  ;;  %1612 = vmatmul.bf16.gmra.mxu1 %v5910_v41  ;;  %v4479_v34 = vld [vmem:[#allocation6 + $0xf4] sm:$0xf] }
 0x1d6   : > { %1661 = vmatmul.bf16.gmra.mxu2 %v5908_v19 }
 0x1d7   : > { %v6036_v14 = vpack.c.bf16 %v1518_v45, %v1516_v50  ;;  %1710 = vmatmul.bf16.gmra.mxu3 %v5910_v41 }
 0x1d9   : > { %7267 = vst [vmem:[#allocation40_spill] sm:$0xff] %v6036_v14  ;;  %v1434_v27 = vpop.f32.mrf.mxu2  ;;  %v1338_v5 = vpop.f32.mrf.mxu0 }
 0x1da   : > { %v1483_v23 = vpop.f32.mrf.mxu3  ;;  %v1387_v6 = vpop.f32.mrf.mxu1 }
 0x1db   : > { %v1484_v53 = vadd.f32 %v1483_v23, %v1434_v27  ;;  %v1388_v37 = vadd.f32 %v1387_v6, %v1338_v5  ;;  %v4143_v6 = vld [vmem:[#allocation6 + $0x70] sm:$0xf] }
 0x1dd   : > { %v1520_v49 = vsub.f32 %v5920_v54, %v1484_v53  ;;  %v1521_v26 = vsub.f32 %v5922_v4, %v1388_v37  ;;  %v4207_v37 = vld [vmem:[#allocation6 + $0xf0] sm:$0xf] }
 0x1df   : > { %v6041_v32 = vpack.c.bf16 %v1521_v26, %v1519_v44  ;;  %v4209_v44 = vld [vmem:[#allocation6 + $0xf8] sm:$0xf0] }
 0x1e1   : > { %7268 = vst [vmem:[#allocation41_spill] sm:$0xff] %v6041_v32  ;;  %v1436_v61 = vpop.f32.mrf.mxu2  ;;  %v1341_v16 = vpop.f32.mrf.mxu0 }
 0x1e2   : > { %v1485_v2 = vpop.f32.mrf.mxu3  ;;  %v1390_v17 = vpop.f32.mrf.mxu1 }
 0x1e3   : > { %v1486_v19 = vadd.f32 %v1485_v2, %v1436_v61  ;;  %v1391_v0 = vadd.f32 %v1390_v17, %v1341_v16  ;;  %v4480_v61 = vld [vmem:[#allocation6 + $0xf4] sm:$0xf0] }
 0x1e4   : > { %1568 = vmatmul.bf16.gmra.mxu0 %v5928_v3  ;;  %v6073_v16 = vor.u32 %v4480_v61, %v4207_v37  ;;  %v4459_v37 = vld [vmem:[#allocation6 + $0x54] sm:$0xf] }
 0x1e5   : > { %v1522_v41 = vsub.f32 %v5932_v21, %v1486_v19  ;;  %v1523_v52 = vsub.f32 %v5934_v29, %v1391_v0  ;;  %1617 = vmatmul.bf16.gmra.mxu1 %v5930_v10  ;;  %v4475_v61 = vld [vmem:[#allocation6 + $0xd4] sm:$0xf] }
 0x1e6   : > { %1666 = vmatmul.bf16.gmra.mxu2 %v5928_v3  ;;  %2232 = vmatpush.bf16.msra.mxu1 %v6073_v16 }
 0x1e7   : > { %v6048_v54 = vpack.c.bf16 %v1522_v41, %v1520_v49  ;;  %1715 = vmatmul.bf16.gmra.mxu3 %v5930_v10 }
 0x1e9   : > { %7269 = vst [vmem:[#allocation42_spill] sm:$0xff] %v6048_v54  ;;  %v1439_v4 = vpop.f32.mrf.mxu2  ;;  %v1343_v59 = vpop.f32.mrf.mxu0 }
 0x1ea   : > { %v1488_v24 = vpop.f32.mrf.mxu3  ;;  %v1392_v8 = vpop.f32.mrf.mxu1 }
 0x1eb   : > { %v1489_v36 = vadd.f32 %v1488_v24, %v1439_v4  ;;  %v1393_v28 = vadd.f32 %v1392_v8, %v1343_v59  ;;  %v4137_v8 = vld [vmem:[#allocation6 + $0x68] sm:$0xf0] }
 0x1ed   : > { %v1524_v21 = vsub.f32 %v5940_v62, %v1489_v36  ;;  %v1525_v11 = vsub.f32 %v5942_v9, %v1393_v28  ;;  %v4463_v9 = vld [vmem:[#allocation6 + $0x74] sm:$0xf]  ;;  %v4461_v36 = vld [vmem:[#allocation6 + $0x64] sm:$0xf] }
 0x1ee   : > { %v6063_v45 = vor.u32 %v4463_v9, %v4145_v38  ;;  %v4477_v28 = vld [vmem:[#allocation6 + $0xe4] sm:$0xf]  ;;  %v4478_v9 = vld [vmem:[#allocation6 + $0xe4] sm:$0xf0] }
 0x1ef   : > { %v6053_v50 = vpack.c.bf16 %v1525_v11, %v1523_v52  ;;  %v4201_v11 = vld [vmem:[#allocation6 + $0xe8] sm:$0xf0] }
 0x1f0   : > { %2281 = vmatpush.bf16.msra.mxu2 %v6063_v45 }
 0x1f1   : > { %v1441_v29 = vpop.f32.mrf.mxu2  ;;  %v1346_v57 = vpop.f32.mrf.mxu0 }
 0x1f2   : > { %v1490_v33 = vpop.f32.mrf.mxu3  ;;  %v1395_v46 = vpop.f32.mrf.mxu1 }
 0x1f3   : > { %v1491_v3 = vadd.f32 %v1490_v33, %v1441_v29  ;;  %v1396_v40 = vadd.f32 %v1395_v46, %v1346_v57  ;;  %v4135_v46 = vld [vmem:[#allocation6 + $0x60] sm:$0xf] }
 0x1f4   : > { %1573 = vmatmul.bf16.gmra.mxu0 %v5948_v18 }
 0x1f5   : > { %v1526_v10 = vsub.f32 %v5952_v31, %v1491_v3  ;;  %v1527_v13 = vsub.f32 %v5954_v47, %v1396_v40  ;;  %1622 = vmatmul.bf16.gmra.mxu1 %v5950_v60  ;;  %v6065_v31 = vor.u32 %v4479_v34, %v4209_v44  ;;  %v4199_v40 = vld [vmem:[#allocation6 + $0xe0] sm:$0xf] }
 0x1f6   : > { %1671 = vmatmul.bf16.gmra.mxu2 %v5948_v18  ;;  %v6097_v34 = vor.u32 %v4478_v9, %v4199_v40  ;;  %v7279_v40 = vld [vmem:[#allocation22_spill] sm:$0xff]  ;;  %v4121_v9 = vld [vmem:[#allocation6 + $0x48] sm:$0xf0] }
 0x1f7   : > { %v6060_v62 = vpack.c.bf16 %v1526_v10, %v1524_v21  ;;  %1720 = vmatmul.bf16.gmra.mxu3 %v5950_v60  ;;  %v4464_v60 = vld [vmem:[#allocation6 + $0x74] sm:$0xf0]  ;;  %v6087_v21 = vor.u32 %v4461_v36, %v4137_v8  ;;  %v4191_v8 = vld [vmem:[#allocation6 + $0xd0] sm:$0xf] }
 0x1f8   : > { %2330 = vmatpush.bf16.msra.mxu3 %v6065_v31  ;;  %v6070_v26 = vor.u32 %v4464_v60, %v4143_v6  ;;  %7271 = vst [vmem:[#allocation44_spill] sm:$0xff] %v6097_v34  ;;  %2233 = vmatpush.bf16.msra.mxu1 %v6097_v34  ;;  %v7273_v6 = vld [vmem:[#allocation19_spill] sm:$0xff]  ;;  %v4460_v36 = vld [vmem:[#allocation6 + $0x54] sm:$0xf0] }
 0x1f9   : > { %v1444_v27 = vpop.f32.mrf.mxu2  ;;  %v1348_v5 = vpop.f32.mrf.mxu0  ;;  %2282 = vmatpush.bf16.msra.mxu2 %v6087_v21 }
 0x1fa   : > { %v1493_v23 = vpop.f32.mrf.mxu3  ;;  %v1397_v53 = vpop.f32.mrf.mxu1  ;;  %2183 = vmatpush.bf16.msra.mxu0 %v6070_v26 }
 0x1fb   : > { %v1494_v47 = vadd.f32 %v1493_v23, %v1444_v27  ;;  %v1398_v18 = vadd.f32 %v1397_v53, %v1348_v5 }
 0x1fd   : > { %v1528_v49 = vsub.f32 %v5960_v63, %v1494_v47  ;;  %v1529_v2 = vsub.f32 %v5962_v22, %v1398_v18 }
 0x1ff   : > { %v6076_v19 = vpack.c.bf16 %v1529_v2, %v1527_v13 }
 0x201   : > { %v1446_v17 = vpop.f32.mrf.mxu2  ;;  %v1351_v41 = vpop.f32.mrf.mxu0 }
 0x202   : > { %v1495_v0 = vpop.f32.mrf.mxu3  ;;  %v1400_v4 = vpop.f32.mrf.mxu1 }
 0x203   : > { %v1496_v52 = vadd.f32 %v1495_v0, %v1446_v17  ;;  %v1401_v24 = vadd.f32 %v1400_v4, %v1351_v41  ;;  %v4193_v17 = vld [vmem:[#allocation6 + $0xd8] sm:$0xf0] }
 0x204   : > { %1578 = vmatmul.bf16.gmra.mxu0 %v5968_v56  ;;  %v6114_v41 = vor.u32 %v4475_v61, %v4193_v17  ;;  %v4458_v61 = vld [vmem:[#allocation6 + $0x44] sm:$0xf0]  ;;  %v4183_v17 = vld [vmem:[#allocation6 + $0xc0] sm:$0xf] }
 0x205   : > { %v1530_v63 = vsub.f32 %v5972_v43, %v1496_v52  ;;  %v1531_v22 = vsub.f32 %v5974_v1, %v1401_v24  ;;  %1627 = vmatmul.bf16.gmra.mxu1 %v5970_v35  ;;  %v6089_v43 = vor.u32 %v4477_v28, %v4201_v11  ;;  %v4476_v11 = vld [vmem:[#allocation6 + $0xd4] sm:$0xf0] }
 0x206   : > { %1676 = vmatmul.bf16.gmra.mxu2 %v5968_v56 }
 0x207   : > { %v6084_v59 = vpack.c.bf16 %v1530_v63, %v1528_v49  ;;  %1725 = vmatmul.bf16.gmra.mxu3 %v5970_v35  ;;  %v4462_v35 = vld [vmem:[#allocation6 + $0x64] sm:$0xf0]  ;;  %v4129_v49 = vld [vmem:[#allocation6 + $0x58] sm:$0xf0] }
 0x208   : > { %2331 = vmatpush.bf16.msra.mxu3 %v6089_v43  ;;  %v6094_v13 = vor.u32 %v4462_v35, %v4135_v46  ;;  %v6112_v2 = vor.u32 %v4459_v37, %v4129_v49  ;;  %v7278_v35 = vld [vmem:[#allocation21_spill] sm:$0xff]  ;;  %v4119_v49 = vld [vmem:[#allocation6 + $0x40] sm:$0xf] }
 0x209   : > { %v1449_v29 = vpop.f32.mrf.mxu2  ;;  %v1353_v57 = vpop.f32.mrf.mxu0 }
 0x20a   : > { %v1498_v33 = vpop.f32.mrf.mxu3  ;;  %v1402_v3 = vpop.f32.mrf.mxu1  ;;  %7270 = vst [vmem:[#allocation43_spill] sm:$0xff] %v6094_v13  ;;  %2184 = vmatpush.bf16.msra.mxu0 %v6094_v13  ;;  %2283 = vmatpush.bf16.msra.mxu2 %v6112_v2 }
 0x20b   : > { %v1499_v1 = vadd.f32 %v1498_v33, %v1449_v29  ;;  %v1403_v56 = vadd.f32 %v1402_v3, %v1353_v57  ;;  %v6124_v29 = vor.u32 %v4476_v11, %v4191_v8 }
 0x20c   : > { %2332 = vmatpush.bf16.msra.mxu3 %v6114_v41 }
 0x20d   : > { %v1532_v10 = vsub.f32 %v5980_v39, %v1499_v1  ;;  %v1533_v38 = vsub.f32 %v5982_v48, %v1403_v56  ;;  %v7274_v48 = vld [vmem:[#allocation20_spill] sm:$0xff]  ;;  %7277 = vst [vmem:[#allocation46_spill] sm:$0xff] %v6124_v29  ;;  %2234 = vmatpush.bf16.msra.mxu1 %v6124_v29 }
 0x20e   : > { %v4450_v29 = vld [vmem:[#allocation6 + $0x4] sm:$0xf0] }
 0x20f   : > { %v6100_v44 = vpack.c.bf16 %v1533_v38, %v1531_v22  ;;  %v4127_v22 = vld [vmem:[#allocation6 + $0x50] sm:$0xf]  ;;  %v4473_v38 = vld [vmem:[#allocation6 + $0xc4] sm:$0xf] }
 0x210   : > { %v6122_v28 = vor.u32 %v4460_v36, %v4127_v22 }
 0x211   : > { %7272 = vst [vmem:[#allocation45_spill] sm:$0xff] %v6100_v44  ;;  %v1451_v27 = vpop.f32.mrf.mxu2  ;;  %v1544_v5 = vpop.f32.mrf.mxu0  ;;  %v4167_v44 = vld [vmem:[#allocation6 + $0xa0] sm:$0xf] }
 0x212   : > { %v1500_v23 = vpop.f32.mrf.mxu3  ;;  %v1593_v53 = vpop.f32.mrf.mxu1  ;;  %7276 = vst [vmem:[#allocation20_spill] sm:$0xff] %v6122_v28  ;;  %2185 = vmatpush.bf16.msra.mxu0 %v6122_v28  ;;  %v4151_v28 = vld [vmem:[#allocation6 + $0x80] sm:$0xf] }
 0x213   : > { %v1501_v47 = vadd.f32 %v1500_v23, %v1451_v27  ;;  %v6103_v18 = vadd.f32 %v1593_v53, %v1544_v5  ;;  %v4185_v23 = vld [vmem:[#allocation6 + $0xc8] sm:$0xf0] }
 0x214   : > { %1739 = vmatmul.bf16.vlgmr.msrb.gmra.mxu0 %v7273_v6 }
 0x215   : > { %v1534_v39 = vsub.f32 %v5984_v25, %v1501_v47  ;;  %1788 = vmatmul.bf16.vlgmr.msrb.gmra.mxu1 %v7274_v48  ;;  %v6138_v47 = vor.u32 %v4473_v38, %v4185_v23 }
 0x216   : > { %1837 = vmatmul.bf16.vlgmr.msrb.gmra.mxu2 %v7273_v6 }
 0x217   : > { %v6109_v60 = vpack.c.bf16 %v1534_v39, %v1532_v10  ;;  %1886 = vmatmul.bf16.vlgmr.msrb.gmra.mxu3 %v7274_v48  ;;  %v4457_v10 = vld [vmem:[#allocation6 + $0x44] sm:$0xf]  ;;  %7281 = vst [vmem:[#allocation22_spill] sm:$0xff] %v6138_v47 }
 0x218   : > { %v6136_v27 = vor.u32 %v4457_v10, %v4121_v9  ;;  %2333 = vmatpush.bf16.msra.mxu3 %v6138_v47  ;;  %v4177_v9 = vld [vmem:[#allocation6 + $0xb8] sm:$0xf0] }
 0x219   : > { %7275 = vst [vmem:[#allocation19_spill] sm:$0xff] %v6109_v60  ;;  %v1642_v0 = vpop.f32.mrf.mxu2  ;;  %v1546_v52 = vpop.f32.mrf.mxu0  ;;  %v4454_v60 = vld [vmem:[#allocation6 + $0x24] sm:$0xf0] }
 0x21a   : > { %v1691_v25 = vpop.f32.mrf.mxu3  ;;  %v1595_v24 = vpop.f32.mrf.mxu1  ;;  %7280 = vst [vmem:[#allocation21_spill] sm:$0xff] %v6136_v27  ;;  %2284 = vmatpush.bf16.msra.mxu2 %v6136_v27  ;;  %v4335_v27 = vld [vmem:[#allocation7 + $0xf0] sm:$0xf] }
 0x21b   : > { %v6117_v4 = vadd.f32 %v1691_v25, %v1642_v0  ;;  %v6120_v63 = vadd.f32 %v1595_v24, %v1546_v52  ;;  %v6146_v0 = vor.u32 %v4458_v61, %v4119_v49  ;;  %v4474_v25 = vld [vmem:[#allocation6 + $0xc4] sm:$0xf0]  ;;  %v4111_v61 = vld [vmem:[#allocation6 + $0x30] sm:$0xf] }
 0x21c   : > { %v6148_v52 = vor.u32 %v4474_v25, %v4183_v17  ;;  %v4456_v17 = vld [vmem:[#allocation6 + $0x34] sm:$0xf0]  ;;  %v4175_v25 = vld [vmem:[#allocation6 + $0xb0] sm:$0xf] }
 0x21d   : > { %7282 = vst [vmem:[#allocation47_spill] sm:$0xff] %v6146_v0  ;;  %2186 = vmatpush.bf16.msra.mxu0 %v6146_v0  ;;  %v4159_v0 = vld [vmem:[#allocation6 + $0x90] sm:$0xf] }
 0x21e   : > { %7283 = vst [vmem:[#allocation48_spill] sm:$0xff] %v6148_v52  ;;  %2235 = vmatpush.bf16.msra.mxu1 %v6148_v52  ;;  %v4452_v52 = vld [vmem:[#allocation6 + $0x14] sm:$0xf0] }
 0x221   : > { %v1644_v33 = vpop.f32.mrf.mxu2  ;;  %v1549_v1 = vpop.f32.mrf.mxu0 }
 0x222   : > { %v1693_v57 = vpop.f32.mrf.mxu3  ;;  %v1598_v56 = vpop.f32.mrf.mxu1 }
 0x223   : > { %v6128_v3 = vadd.f32 %v1693_v57, %v1644_v33  ;;  %v6130_v46 = vadd.f32 %v1598_v56, %v1549_v1  ;;  %v7284_v57 = vld [vmem:[#allocation23_spill] sm:$0xff]  ;;  %v7285_v1 = vld [vmem:[#allocation24_spill] sm:$0xff]  ;;  %v4455_v56 = vld [vmem:[#allocation6 + $0x34] sm:$0xf] }
 0x224   : > { %1744 = vmatmul.bf16.gmra.mxu0 %v7278_v35 }
 0x225   : > { %1793 = vmatmul.bf16.gmra.mxu1 %v7279_v40 }
 0x226   : > { %1842 = vmatmul.bf16.gmra.mxu2 %v7278_v35  ;;  %v4113_v35 = vld [vmem:[#allocation6 + $0x38] sm:$0xf0] }
 0x227   : > { %1891 = vmatmul.bf16.gmra.mxu3 %v7279_v40  ;;  %v4471_v40 = vld [vmem:[#allocation6 + $0xb4] sm:$0xf]  ;;  %v6160_v10 = vor.u32 %v4455_v56, %v4113_v35 }
 0x228   : > { %v6162_v23 = vor.u32 %v4471_v40, %v4177_v9  ;;  %v7290_v9 = vld [vmem:[#allocation25_spill] sm:$0xff] }
 0x229   : > { %v1647_v5 = vpop.f32.mrf.mxu2  ;;  %v1551_v39 = vpop.f32.mrf.mxu0  ;;  %7286 = vst [vmem:[#allocation23_spill] sm:$0xff] %v6160_v10  ;;  %2285 = vmatpush.bf16.msra.mxu2 %v6160_v10 }
 0x22a   : > { %v1696_v53 = vpop.f32.mrf.mxu3  ;;  %v1600_v48 = vpop.f32.mrf.mxu1  ;;  %7287 = vst [vmem:[#allocation24_spill] sm:$0xff] %v6162_v23  ;;  %2334 = vmatpush.bf16.msra.mxu3 %v6162_v23 }
 0x22b   : > { %v6141_v6 = vadd.f32 %v1696_v53, %v1647_v5  ;;  %v6144_v37 = vadd.f32 %v1600_v48, %v1551_v39 }
 0x231   : > { %v1649_v24 = vpop.f32.mrf.mxu2  ;;  %v1554_v36 = vpop.f32.mrf.mxu0 }
 0x232   : > { %v1698_v22 = vpop.f32.mrf.mxu3  ;;  %v1603_v11 = vpop.f32.mrf.mxu1 }
 0x233   : > { %v6152_v8 = vadd.f32 %v1698_v22, %v1649_v24  ;;  %v6154_v33 = vadd.f32 %v1603_v11, %v1554_v36  ;;  %v6170_v24 = vor.u32 %v4456_v17, %v4111_v61  ;;  %v4472_v22 = vld [vmem:[#allocation6 + $0xb4] sm:$0xf0]  ;;  %v4169_v17 = vld [vmem:[#allocation6 + $0xa8] sm:$0xf0] }
 0x234   : > { %1749 = vmatmul.bf16.gmra.mxu0 %v7284_v57  ;;  %v6172_v36 = vor.u32 %v4472_v22, %v4175_v25 }
 0x235   : > { %1798 = vmatmul.bf16.gmra.mxu1 %v7285_v1  ;;  %7288 = vst [vmem:[#allocation49_spill] sm:$0xff] %v6170_v24  ;;  %2187 = vmatpush.bf16.msra.mxu0 %v6170_v24 }
 0x236   : > { %1847 = vmatmul.bf16.gmra.mxu2 %v7284_v57  ;;  %7289 = vst [vmem:[#allocation50_spill] sm:$0xff] %v6172_v36  ;;  %2236 = vmatpush.bf16.msra.mxu1 %v6172_v36 }
 0x237   : > { %1896 = vmatmul.bf16.gmra.mxu3 %v7285_v1 }
 0x239   : > { %v1652_v38 = vpop.f32.mrf.mxu2  ;;  %v1556_v53 = vpop.f32.mrf.mxu0 }
 0x23a   : > { %v1701_v5 = vpop.f32.mrf.mxu3  ;;  %v1605_v48 = vpop.f32.mrf.mxu1 }
 0x23b   : > { %v6165_v39 = vadd.f32 %v1701_v5, %v1652_v38  ;;  %v6168_v49 = vadd.f32 %v1605_v48, %v1556_v53  ;;  %v7291_v38 = vld [vmem:[#allocation26_spill] sm:$0xff]  ;;  %v4453_v5 = vld [vmem:[#allocation6 + $0x24] sm:$0xf]  ;;  %v4105_v53 = vld [vmem:[#allocation6 + $0x28] sm:$0xf0] }
 0x23c   : > { %v4469_v48 = vld [vmem:[#allocation6 + $0xa4] sm:$0xf]  ;;  %v6184_v61 = vor.u32 %v4453_v5, %v4105_v53  ;;  %v4470_v53 = vld [vmem:[#allocation6 + $0xa4] sm:$0xf0] }
 0x23d   : > { %v6186_v22 = vor.u32 %v4469_v48, %v4169_v17  ;;  %v6196_v36 = vor.u32 %v4470_v53, %v4167_v44  ;;  %v4451_v44 = vld [vmem:[#allocation6 + $0x14] sm:$0xf] }
 0x23e   : > { %7292 = vst [vmem:[#allocation25_spill] sm:$0xff] %v6184_v61  ;;  %2286 = vmatpush.bf16.msra.mxu2 %v6184_v61 }
 0x23f   : > { %7293 = vst [vmem:[#allocation26_spill] sm:$0xff] %v6186_v22  ;;  %2335 = vmatpush.bf16.msra.mxu3 %v6186_v22  ;;  %2237 = vmatpush.bf16.msra.mxu1 %v6196_v36  ;;  %v7297_v22 = vld [vmem:[#allocation32_spill] sm:$0xff] }
 0x240   : > { %7295 = vst [vmem:[#allocation52_spill] sm:$0xff] %v6196_v36  ;;  %v4161_v36 = vld [vmem:[#allocation6 + $0x98] sm:$0xf0] }
 0x241   : > { %v1654_v11 = vpop.f32.mrf.mxu2  ;;  %v1559_v1 = vpop.f32.mrf.mxu0 }
 0x242   : > { %v1703_v57 = vpop.f32.mrf.mxu3  ;;  %v1608_v35 = vpop.f32.mrf.mxu1 }
 0x243   : > { %v6176_v56 = vadd.f32 %v1703_v57, %v1654_v11  ;;  %v6178_v40 = vadd.f32 %v1608_v35, %v1559_v1 }
 0x244   : > { %1754 = vmatmul.bf16.gmra.mxu0 %v7290_v9 }
 0x245   : > { %1803 = vmatmul.bf16.gmra.mxu1 %v7291_v38 }
 0x246   : > { %1852 = vmatmul.bf16.gmra.mxu2 %v7290_v9 }
 0x247   : > { %1901 = vmatmul.bf16.gmra.mxu3 %v7291_v38  ;;  %v4103_v38 = vld [vmem:[#allocation6 + $0x20] sm:$0xf] }
 0x248   : > { %v6194_v5 = vor.u32 %v4454_v60, %v4103_v38  ;;  %v4097_v60 = vld [vmem:[#allocation6 + $0x18] sm:$0xf0]  ;;  %v4467_v38 = vld [vmem:[#allocation6 + $0x94] sm:$0xf] }
 0x249   : > { %v1657_v25 = vpop.f32.mrf.mxu2  ;;  %v1561_v57 = vpop.f32.mrf.mxu0  ;;  %v6208_v53 = vor.u32 %v4451_v44, %v4097_v60  ;;  %v4468_v60 = vld [vmem:[#allocation6 + $0x94] sm:$0xf0] }
 0x24a   : > { %v1706_v11 = vpop.f32.mrf.mxu3  ;;  %v1610_v35 = vpop.f32.mrf.mxu1  ;;  %7294 = vst [vmem:[#allocation51_spill] sm:$0xff] %v6194_v5  ;;  %2188 = vmatpush.bf16.msra.mxu0 %v6194_v5  ;;  %v6220_v23 = vor.u32 %v4468_v60, %v4159_v0  ;;  %v4449_v0 = vld [vmem:[#allocation6 + $0x4] sm:$0xf] }
 0x24b   : > { %v6189_v1 = vadd.f32 %v1706_v11, %v1657_v25  ;;  %v6192_v9 = vadd.f32 %v1610_v35, %v1561_v57  ;;  %v7296_v35 = vld [vmem:[#allocation31_spill] sm:$0xff]  ;;  %2287 = vmatpush.bf16.msra.mxu2 %v6208_v53 }
 0x24c   : > { %7298 = vst [vmem:[#allocation31_spill] sm:$0xff] %v6208_v53  ;;  %2238 = vmatpush.bf16.msra.mxu1 %v6220_v23  ;;  %v7303_v53 = vld [vmem:[#allocation36_spill] sm:$0xff] }
 0x24d   : > { %7301 = vst [vmem:[#allocation54_spill] sm:$0xff] %v6220_v23  ;;  %v4153_v23 = vld [vmem:[#allocation6 + $0x88] sm:$0xf0] }
 0x251   : > { %v1659_v48 = vpop.f32.mrf.mxu2  ;;  %v1564_v25 = vpop.f32.mrf.mxu0 }
 0x252   : > { %v1708_v17 = vpop.f32.mrf.mxu3  ;;  %v1613_v24 = vpop.f32.mrf.mxu1 }
 0x253   : > { %v6200_v11 = vadd.f32 %v1708_v17, %v1659_v48  ;;  %v6202_v57 = vadd.f32 %v1613_v24, %v1564_v25  ;;  %v6210_v48 = vor.u32 %v4467_v38, %v4161_v36 }
 0x254   : > { %1759 = vmatmul.bf16.gmra.mxu0 %v7296_v35 }
 0x255   : > { %1808 = vmatmul.bf16.gmra.mxu1 %v7297_v22  ;;  %7299 = vst [vmem:[#allocation32_spill] sm:$0xff] %v6210_v48  ;;  %2336 = vmatpush.bf16.msra.mxu3 %v6210_v48 }
 0x256   : > { %1857 = vmatmul.bf16.gmra.mxu2 %v7296_v35 }
 0x257   : > { %1906 = vmatmul.bf16.gmra.mxu3 %v7297_v22  ;;  %v4095_v22 = vld [vmem:[#allocation6 + $0x10] sm:$0xf] }
 0x258   : > { %v6218_v44 = vor.u32 %v4452_v52, %v4095_v22  ;;  %v4089_v52 = vld [vmem:[#allocation6 + $0x8] sm:$0xf0]  ;;  %v4465_v22 = vld [vmem:[#allocation6 + $0x84] sm:$0xf] }
 0x259   : > { %v1662_v5 = vpop.f32.mrf.mxu2  ;;  %v1566_v24 = vpop.f32.mrf.mxu0  ;;  %v6232_v60 = vor.u32 %v4449_v0, %v4089_v52  ;;  %v4466_v52 = vld [vmem:[#allocation6 + $0x84] sm:$0xf0] }
 0x25a   : > { %v1711_v17 = vpop.f32.mrf.mxu3  ;;  %v1615_v61 = vpop.f32.mrf.mxu1  ;;  %7300 = vst [vmem:[#allocation53_spill] sm:$0xff] %v6218_v44  ;;  %2189 = vmatpush.bf16.msra.mxu0 %v6218_v44  ;;  %v6244_v47 = vor.u32 %v4466_v52, %v4151_v28  ;;  %v4495_v28 = vld [vmem:[#allocation7 + $0x74] sm:$0xf]  ;;  %v4337_v52 = vld [vmem:[#allocation7 + $0xf8] sm:$0xf0] }
 0x25b   : > { %v6213_v25 = vadd.f32 %v1711_v17, %v1662_v5  ;;  %v6216_v35 = vadd.f32 %v1615_v61, %v1566_v24  ;;  %v7302_v24 = vld [vmem:[#allocation35_spill] sm:$0xff]  ;;  %2288 = vmatpush.bf16.msra.mxu2 %v6232_v60 }
 0x25c   : > { %7304 = vst [vmem:[#allocation35_spill] sm:$0xff] %v6232_v60  ;;  %2239 = vmatpush.bf16.msra.mxu1 %v6244_v47  ;;  %v4496_v60 = vld [vmem:[#allocation7 + $0x74] sm:$0xf0] }
 0x25d   : > { %7307 = vst [vmem:[#allocation56_spill] sm:$0xff] %v6244_v47 }
 0x261   : > { %v1664_v36 = vpop.f32.mrf.mxu2  ;;  %v1569_v38 = vpop.f32.mrf.mxu0 }
 0x262   : > { %v1713_v5 = vpop.f32.mrf.mxu3  ;;  %v1618_v48 = vpop.f32.mrf.mxu1 }
 0x263   : > { %v6224_v17 = vadd.f32 %v1713_v5, %v1664_v36  ;;  %v6226_v61 = vadd.f32 %v1618_v48, %v1569_v38  ;;  %v6234_v36 = vor.u32 %v4465_v22, %v4153_v23 }
 0x264   : > { %1764 = vmatmul.bf16.gmra.mxu0 %v7302_v24 }
 0x265   : > { %1813 = vmatmul.bf16.gmra.mxu1 %v7303_v53  ;;  %7305 = vst [vmem:[#allocation36_spill] sm:$0xff] %v6234_v36  ;;  %2337 = vmatpush.bf16.msra.mxu3 %v6234_v36 }
 0x266   : > { %1862 = vmatmul.bf16.gmra.mxu2 %v7302_v24 }
 0x267   : > { %1911 = vmatmul.bf16.gmra.mxu3 %v7303_v53  ;;  %v4087_v53 = vld [vmem:[#allocation6] sm:$0xf] }
 0x268   : > { %v6242_v0 = vor.u32 %v4450_v29, %v4087_v53  ;;  %v4273_v29 = vld [vmem:[#allocation7 + $0x78] sm:$0xf0] }
 0x269   : > { %v1667_v44 = vpop.f32.mrf.mxu2  ;;  %v1571_v48 = vpop.f32.mrf.mxu0  ;;  %v6256_v53 = vor.u32 %v4495_v28, %v4273_v29  ;;  %v4512_v29 = vld [vmem:[#allocation7 + $0xf4] sm:$0xf0] }
 0x26a   : > { %v1716_v5 = vpop.f32.mrf.mxu3  ;;  %v1620_v10 = vpop.f32.mrf.mxu1  ;;  %7306 = vst [vmem:[#allocation55_spill] sm:$0xff] %v6242_v0  ;;  %2190 = vmatpush.bf16.msra.mxu0 %v6242_v0 }
 0x26b   : > { %v6237_v38 = vadd.f32 %v1716_v5, %v1667_v44  ;;  %v6240_v24 = vadd.f32 %v1620_v10, %v1571_v48  ;;  %v4511_v48 = vld [vmem:[#allocation7 + $0xf4] sm:$0xf]  ;;  %7308 = vst [vmem:[#allocation57_spill] sm:$0xff] %v6256_v53  ;;  %2637 = vmatpush.bf16.msrb.mxu2 %v6256_v53 }
 0x271   : > { %v1669_v23 = vpop.f32.mrf.mxu2  ;;  %v1574_v22 = vpop.f32.mrf.mxu0 }
 0x272   : > { %v1718_v44 = vpop.f32.mrf.mxu3  ;;  %v1623_v36 = vpop.f32.mrf.mxu1 }
 0x273   : > { %v6248_v5 = vadd.f32 %v1718_v44, %v1669_v23  ;;  %v6250_v10 = vadd.f32 %v1623_v36, %v1574_v22  ;;  %v6258_v23 = vor.u32 %v4511_v48, %v4337_v52  ;;  %v6268_v48 = vor.u32 %v4512_v29, %v4335_v27  ;;  %v4493_v27 = vld [vmem:[#allocation7 + $0x64] sm:$0xf] }
 0x274   : > { %1769 = vmatmul.bf16.gmra.mxu0 %v5747_v15 }
 0x275   : > { %1818 = vmatmul.bf16.gmra.mxu1 %v5751_v30  ;;  %7309 = vst [vmem:[#allocation58_spill] sm:$0xff] %v6258_v23  ;;  %2686 = vmatpush.bf16.msrb.mxu3 %v6258_v23  ;;  %v7317_v23 = vld [vmem:[#allocation38_spill] sm:$0xff] }
 0x276   : > { %1867 = vmatmul.bf16.gmra.mxu2 %v5747_v15  ;;  %7313 = vst [vmem:[#allocation62_spill] sm:$0xff] %v6268_v48  ;;  %2588 = vmatpush.bf16.msrb.mxu1 %v6268_v48 }
 0x277   : > { %1916 = vmatmul.bf16.gmra.mxu3 %v5751_v30  ;;  %v4271_v30 = vld [vmem:[#allocation7 + $0x70] sm:$0xf] }
 0x278   : > { %v6266_v28 = vor.u32 %v4496_v60, %v4271_v30  ;;  %v4265_v60 = vld [vmem:[#allocation7 + $0x68] sm:$0xf0]  ;;  %v4509_v30 = vld [vmem:[#allocation7 + $0xe4] sm:$0xf] }
 0x279   : > { %v1672_v47 = vpop.f32.mrf.mxu2  ;;  %v1576_v36 = vpop.f32.mrf.mxu0  ;;  %v6280_v29 = vor.u32 %v4493_v27, %v4265_v60  ;;  %v4510_v60 = vld [vmem:[#allocation7 + $0xe4] sm:$0xf0] }
 0x27a   : > { %v1721_v44 = vpop.f32.mrf.mxu3  ;;  %v1625_v0 = vpop.f32.mrf.mxu1  ;;  %7312 = vst [vmem:[#allocation61_spill] sm:$0xff] %v6266_v28  ;;  %2539 = vmatpush.bf16.msrb.mxu0 %v6266_v28 }
 0x27b   : > { %v6261_v22 = vadd.f32 %v1721_v44, %v1672_v47  ;;  %v6264_v15 = vadd.f32 %v1625_v0, %v1576_v36  ;;  %v7316_v36 = vld [vmem:[#allocation37_spill] sm:$0xff]  ;;  %2638 = vmatpush.bf16.msrb.mxu2 %v6280_v29 }
 0x27c   : > { %7318 = vst [vmem:[#allocation37_spill] sm:$0xff] %v6280_v29  ;;  %v4319_v29 = vld [vmem:[#allocation7 + $0xd0] sm:$0xf] }
 0x27d   : > { %7310 = vst [vmem:[#allocation59_spill] sm:$0xff] %v6261_v22 }
 0x27e   : > { %7311 = vst [vmem:[#allocation60_spill] sm:$0xff] %v6264_v15 }
 0x281   : > { %v1674_v34 = vpop.f32.mrf.mxu2  ;;  %v1579_v13 = vpop.f32.mrf.mxu0 }
 0x282   : > { %v1723_v52 = vpop.f32.mrf.mxu3  ;;  %v1628_v44 = vpop.f32.mrf.mxu1 }
 0x283   : > { %v6271_v47 = vadd.f32 %v1723_v52, %v1674_v34  ;;  %v6274_v0 = vadd.f32 %v1628_v44, %v1579_v13  ;;  %v4329_v34 = vld [vmem:[#allocation7 + $0xe8] sm:$0xf0] }
 0x284   : > { %1774 = vmatmul.bf16.gmra.mxu0 %v7316_v36  ;;  %v6282_v28 = vor.u32 %v4509_v30, %v4329_v34 }
 0x285   : > { %7314 = vst [vmem:[#allocation63_spill] sm:$0xff] %v6271_v47  ;;  %1823 = vmatmul.bf16.gmra.mxu1 %v7317_v23  ;;  %v4327_v47 = vld [vmem:[#allocation7 + $0xe0] sm:$0xf] }
 0x286   : > { %7315 = vst [vmem:[#allocation64_spill] sm:$0xff] %v6274_v0  ;;  %1872 = vmatmul.bf16.gmra.mxu2 %v7316_v36  ;;  %2687 = vmatpush.bf16.msrb.mxu3 %v6282_v28  ;;  %v4494_v0 = vld [vmem:[#allocation7 + $0x64] sm:$0xf0]  ;;  %v6292_v30 = vor.u32 %v4510_v60, %v4327_v47  ;;  %v4491_v47 = vld [vmem:[#allocation7 + $0x54] sm:$0xf] }
 0x287   : > { %1921 = vmatmul.bf16.gmra.mxu3 %v7317_v23  ;;  %7319 = vst [vmem:[#allocation38_spill] sm:$0xff] %v6282_v28  ;;  %v4263_v23 = vld [vmem:[#allocation7 + $0x60] sm:$0xf] }
 0x288   : > { %v6290_v27 = vor.u32 %v4494_v0, %v4263_v23  ;;  %7321 = vst [vmem:[#allocation66_spill] sm:$0xff] %v6292_v30  ;;  %2589 = vmatpush.bf16.msrb.mxu1 %v6292_v30  ;;  %v4257_v0 = vld [vmem:[#allocation7 + $0x58] sm:$0xf0] }
 0x289   : > { %v1677_v52 = vpop.f32.mrf.mxu2  ;;  %v1581_v13 = vpop.f32.mrf.mxu0  ;;  %v6303_v23 = vor.u32 %v4491_v47, %v4257_v0  ;;  %v4255_v47 = vld [vmem:[#allocation7 + $0x50] sm:$0xf]  ;;  %v4492_v0 = vld [vmem:[#allocation7 + $0x54] sm:$0xf0] }
 0x28a   : > { %v1726_v48 = vpop.f32.mrf.mxu3  ;;  %v1630_v53 = vpop.f32.mrf.mxu1  ;;  %7320 = vst [vmem:[#allocation65_spill] sm:$0xff] %v6290_v27  ;;  %2540 = vmatpush.bf16.msrb.mxu0 %v6290_v27 }
 0x28b   : > { %v6285_v44 = vadd.f32 %v1726_v48, %v1677_v52  ;;  %v6288_v36 = vadd.f32 %v1630_v53, %v1581_v13  ;;  %v4507_v13 = vld [vmem:[#allocation7 + $0xd4] sm:$0xf]  ;;  %7323 = vst [vmem:[#allocation68_spill] sm:$0xff] %v6303_v23  ;;  %2639 = vmatpush.bf16.msrb.mxu2 %v6303_v23 }
 0x291   : > { %v1679_v15 = vpop.f32.mrf.mxu2  ;;  %v1740_v22 = vpop.f32.mrf.mxu0 }
 0x292   : > { %v1728_v34 = vpop.f32.mrf.mxu3  ;;  %v1741_v52 = vadd.f32 %v1740_v22, %v6103_v18  ;;  %v1789_v28 = vpop.f32.mrf.mxu1 }
 0x293   : > { %v6295_v48 = vadd.f32 %v1728_v34, %v1679_v15  ;;  %v4321_v15 = vld [vmem:[#allocation7 + $0xd8] sm:$0xf0] }
 0x294   : > { %v1790_v53 = vadd.f32 %v1789_v28, %v1741_v52  ;;  %2191 = vmatmul.bf16.vlgmr.msra.gmra.mxu0 %v5993_v12  ;;  %v6305_v18 = vor.u32 %v4507_v13, %v4321_v15  ;;  %v6313_v13 = vor.u32 %v4492_v0, %v4255_v47  ;;  %v4508_v15 = vld [vmem:[#allocation7 + $0xd4] sm:$0xf0] }
 0x295   : > { %7322 = vst [vmem:[#allocation67_spill] sm:$0xff] %v6295_v48  ;;  %2240 = vmatmul.bf16.vlgmr.msra.gmra.mxu1 %v6000_v58 }
 0x296   : > { %2289 = vmatmul.bf16.vlgmr.msra.gmra.mxu2 %v5993_v12  ;;  %2688 = vmatpush.bf16.msrb.mxu3 %v6305_v18 }
 0x297   : > { %2338 = vmatmul.bf16.vlgmr.msra.gmra.mxu3 %v6000_v58  ;;  %2541 = vmatpush.bf16.msrb.mxu0 %v6313_v13 }
 0x299   : > { %v1838_v60 = vpop.f32.mrf.mxu2  ;;  %v1742_v34 = vpop.f32.mrf.mxu0 }
 0x29a   : > { %v1839_v22 = vadd.f32 %v1838_v60, %v6117_v4  ;;  %v1887_v28 = vpop.f32.mrf.mxu3  ;;  %v1743_v52 = vadd.f32 %v1742_v34, %v6120_v63  ;;  %v1791_v12 = vpop.f32.mrf.mxu1  ;;  %v6315_v60 = vor.u32 %v4508_v15, %v4319_v29  ;;  %v4249_v29 = vld [vmem:[#allocation7 + $0x48] sm:$0xf0]  ;;  %v4505_v34 = vld [vmem:[#allocation7 + $0xc4] sm:$0xf] }
 0x29c   : > { %v1888_v58 = vadd.f32 %v1887_v28, %v1839_v22  ;;  %v1792_v30 = vadd.f32 %v1791_v12, %v1743_v52  ;;  %2590 = vmatpush.bf16.msrb.mxu1 %v6315_v60 }
 0x29e   : > { %v6311_v27 = vpack.c.bf16 %v1792_v30, %v1790_v53 }
 0x2a1   : > { %v1840_v4 = vpop.f32.mrf.mxu2  ;;  %v1745_v63 = vpop.f32.mrf.mxu0 }
 0x2a2   : > { %v1841_v23 = vadd.f32 %v1840_v4, %v6128_v3  ;;  %v1889_v48 = vpop.f32.mrf.mxu3  ;;  %v1746_v22 = vadd.f32 %v1745_v63, %v6130_v46  ;;  %v1794_v12 = vpop.f32.mrf.mxu1  ;;  %v4489_v3 = vld [vmem:[#allocation7 + $0x44] sm:$0xf]  ;;  %v4313_v46 = vld [vmem:[#allocation7 + $0xc8] sm:$0xf0] }
 0x2a3   : > { %v6327_v52 = vor.u32 %v4489_v3, %v4249_v29  ;;  %v6329_v0 = vor.u32 %v4505_v34, %v4313_v46  ;;  %v4490_v3 = vld [vmem:[#allocation7 + $0x44] sm:$0xf0]  ;;  %v4311_v29 = vld [vmem:[#allocation7 + $0xc0] sm:$0xf] }
 0x2a4   : > { %v1890_v30 = vadd.f32 %v1889_v48, %v1841_v23  ;;  %v1795_v53 = vadd.f32 %v1794_v12, %v1746_v22  ;;  %2196 = vmatmul.bf16.gmra.mxu0 %v6005_v42  ;;  %v4506_v46 = vld [vmem:[#allocation7 + $0xc4] sm:$0xf0] }
 0x2a5   : > { %2245 = vmatmul.bf16.gmra.mxu1 %v6012_v20  ;;  %2640 = vmatpush.bf16.msrb.mxu2 %v6327_v52 }
 0x2a6   : > { %v6322_v28 = vpack.c.bf16 %v1890_v30, %v1888_v58  ;;  %2294 = vmatmul.bf16.gmra.mxu2 %v6005_v42  ;;  %2689 = vmatpush.bf16.msrb.mxu3 %v6329_v0  ;;  %v4247_v30 = vld [vmem:[#allocation7 + $0x40] sm:$0xf] }
 0x2a7   : > { %2343 = vmatmul.bf16.gmra.mxu3 %v6012_v20  ;;  %v6337_v34 = vor.u32 %v4490_v3, %v4247_v30 }
 0x2a9   : > { %v1843_v47 = vpop.f32.mrf.mxu2  ;;  %v1747_v58 = vpop.f32.mrf.mxu0  ;;  %2542 = vmatpush.bf16.msrb.mxu0 %v6337_v34 }
 0x2aa   : > { %v1844_v48 = vadd.f32 %v1843_v47, %v6141_v6  ;;  %v1892_v23 = vpop.f32.mrf.mxu3  ;;  %v1748_v15 = vadd.f32 %v1747_v58, %v6144_v37  ;;  %v1796_v4 = vpop.f32.mrf.mxu1  ;;  %v6339_v47 = vor.u32 %v4506_v46, %v4311_v29 }
 0x2ac   : > { %v1893_v63 = vadd.f32 %v1892_v23, %v1844_v48  ;;  %v1797_v22 = vadd.f32 %v1796_v4, %v1748_v15  ;;  %2591 = vmatpush.bf16.msrb.mxu1 %v6339_v47  ;;  %v4241_v4 = vld [vmem:[#allocation7 + $0x38] sm:$0xf0] }
 0x2ae   : > { %v6335_v12 = vpack.c.bf16 %v1797_v22, %v1795_v53  ;;  %v4503_v22 = vld [vmem:[#allocation7 + $0xb4] sm:$0xf] }
 0x2b1   : > { %v1845_v6 = vpop.f32.mrf.mxu2  ;;  %v1750_v37 = vpop.f32.mrf.mxu0 }
 0x2b2   : > { %v1846_v20 = vadd.f32 %v1845_v6, %v6152_v8  ;;  %v1894_v42 = vpop.f32.mrf.mxu3  ;;  %v1751_v48 = vadd.f32 %v1750_v37, %v6154_v33  ;;  %v1799_v23 = vpop.f32.mrf.mxu1  ;;  %v4487_v8 = vld [vmem:[#allocation7 + $0x34] sm:$0xf]  ;;  %v4305_v33 = vld [vmem:[#allocation7 + $0xb8] sm:$0xf0] }
 0x2b3   : > { %v6351_v30 = vor.u32 %v4487_v8, %v4241_v4  ;;  %v6353_v29 = vor.u32 %v4503_v22, %v4305_v33  ;;  %v4488_v8 = vld [vmem:[#allocation7 + $0x34] sm:$0xf0]  ;;  %v4303_v4 = vld [vmem:[#allocation7 + $0xb0] sm:$0xf] }
 0x2b4   : > { %v1895_v53 = vadd.f32 %v1894_v42, %v1846_v20  ;;  %v1800_v58 = vadd.f32 %v1799_v23, %v1751_v48  ;;  %2201 = vmatmul.bf16.gmra.mxu0 %v6017_v55  ;;  %v4504_v33 = vld [vmem:[#allocation7 + $0xb4] sm:$0xf0] }
 0x2b5   : > { %2250 = vmatmul.bf16.gmra.mxu1 %v6024_v7  ;;  %2641 = vmatpush.bf16.msrb.mxu2 %v6351_v30 }
 0x2b6   : > { %v6346_v15 = vpack.c.bf16 %v1895_v53, %v1893_v63  ;;  %2299 = vmatmul.bf16.gmra.mxu2 %v6017_v55  ;;  %2690 = vmatpush.bf16.msrb.mxu3 %v6353_v29  ;;  %v4239_v53 = vld [vmem:[#allocation7 + $0x30] sm:$0xf] }
 0x2b7   : > { %2348 = vmatmul.bf16.gmra.mxu3 %v6024_v7  ;;  %v6361_v22 = vor.u32 %v4488_v8, %v4239_v53 }
 0x2b9   : > { %v1848_v3 = vpop.f32.mrf.mxu2  ;;  %v1752_v63 = vpop.f32.mrf.mxu0  ;;  %2543 = vmatpush.bf16.msrb.mxu0 %v6361_v22 }
 0x2ba   : > { %v1849_v42 = vadd.f32 %v1848_v3, %v6165_v39  ;;  %v1897_v20 = vpop.f32.mrf.mxu3  ;;  %v1753_v46 = vadd.f32 %v1752_v63, %v6168_v49  ;;  %v1801_v6 = vpop.f32.mrf.mxu1  ;;  %v6363_v3 = vor.u32 %v4504_v33, %v4303_v4 }
 0x2bc   : > { %v1898_v37 = vadd.f32 %v1897_v20, %v1849_v42  ;;  %v1802_v48 = vadd.f32 %v1801_v6, %v1753_v46  ;;  %2592 = vmatpush.bf16.msrb.mxu1 %v6363_v3  ;;  %v4233_v6 = vld [vmem:[#allocation7 + $0x28] sm:$0xf0] }
 0x2be   : > { %v6359_v23 = vpack.c.bf16 %v1802_v48, %v1800_v58  ;;  %v4501_v48 = vld [vmem:[#allocation7 + $0xa4] sm:$0xf] }
 0x2c1   : > { %v1850_v39 = vpop.f32.mrf.mxu2  ;;  %v1755_v49 = vpop.f32.mrf.mxu0 }
 0x2c2   : > { %v1851_v7 = vadd.f32 %v1850_v39, %v6176_v56  ;;  %v1899_v55 = vpop.f32.mrf.mxu3  ;;  %v1756_v42 = vadd.f32 %v1755_v49, %v6178_v40  ;;  %v1804_v20 = vpop.f32.mrf.mxu1  ;;  %v4485_v56 = vld [vmem:[#allocation7 + $0x24] sm:$0xf]  ;;  %v4297_v40 = vld [vmem:[#allocation7 + $0xa8] sm:$0xf0] }
 0x2c3   : > { %v6375_v53 = vor.u32 %v4485_v56, %v4233_v6  ;;  %v6377_v4 = vor.u32 %v4501_v48, %v4297_v40  ;;  %v4486_v56 = vld [vmem:[#allocation7 + $0x24] sm:$0xf0]  ;;  %v4295_v6 = vld [vmem:[#allocation7 + $0xa0] sm:$0xf] }
 0x2c4   : > { %v1900_v58 = vadd.f32 %v1899_v55, %v1851_v7  ;;  %v1805_v63 = vadd.f32 %v1804_v20, %v1756_v42  ;;  %2206 = vmatmul.bf16.gmra.mxu0 %v6029_v51  ;;  %v4502_v40 = vld [vmem:[#allocation7 + $0xa4] sm:$0xf0] }
 0x2c5   : > { %2255 = vmatmul.bf16.gmra.mxu1 %v6036_v14  ;;  %2642 = vmatpush.bf16.msrb.mxu2 %v6375_v53 }
 0x2c6   : > { %v6370_v46 = vpack.c.bf16 %v1900_v58, %v1898_v37  ;;  %2304 = vmatmul.bf16.gmra.mxu2 %v6029_v51  ;;  %2691 = vmatpush.bf16.msrb.mxu3 %v6377_v4  ;;  %v4231_v58 = vld [vmem:[#allocation7 + $0x20] sm:$0xf] }
 0x2c7   : > { %2353 = vmatmul.bf16.gmra.mxu3 %v6036_v14  ;;  %v6385_v48 = vor.u32 %v4486_v56, %v4231_v58 }
 0x2c9   : > { %v1853_v8 = vpop.f32.mrf.mxu2  ;;  %v1757_v37 = vpop.f32.mrf.mxu0  ;;  %2544 = vmatpush.bf16.msrb.mxu0 %v6385_v48 }
 0x2ca   : > { %v1854_v55 = vadd.f32 %v1853_v8, %v6189_v1  ;;  %v1902_v7 = vpop.f32.mrf.mxu3  ;;  %v1758_v33 = vadd.f32 %v1757_v37, %v6192_v9  ;;  %v1806_v39 = vpop.f32.mrf.mxu1  ;;  %v6387_v8 = vor.u32 %v4502_v40, %v4295_v6 }
 0x2cc   : > { %v1903_v49 = vadd.f32 %v1902_v7, %v1854_v55  ;;  %v1807_v42 = vadd.f32 %v1806_v39, %v1758_v33  ;;  %2593 = vmatpush.bf16.msrb.mxu1 %v6387_v8  ;;  %v4225_v39 = vld [vmem:[#allocation7 + $0x18] sm:$0xf0] }
 0x2ce   : > { %v6383_v20 = vpack.c.bf16 %v1807_v42, %v1805_v63  ;;  %v4499_v42 = vld [vmem:[#allocation7 + $0x94] sm:$0xf] }
 0x2d1   : > { %v1855_v1 = vpop.f32.mrf.mxu2  ;;  %v1760_v9 = vpop.f32.mrf.mxu0 }
 0x2d2   : > { %v1856_v14 = vadd.f32 %v1855_v1, %v6200_v11  ;;  %v1904_v51 = vpop.f32.mrf.mxu3  ;;  %v1761_v55 = vadd.f32 %v1760_v9, %v6202_v57  ;;  %v1809_v7 = vpop.f32.mrf.mxu1  ;;  %v4483_v11 = vld [vmem:[#allocation7 + $0x14] sm:$0xf]  ;;  %v4289_v57 = vld [vmem:[#allocation7 + $0x98] sm:$0xf0] }
 0x2d3   : > { %v6399_v58 = vor.u32 %v4483_v11, %v4225_v39  ;;  %v6401_v6 = vor.u32 %v4499_v42, %v4289_v57  ;;  %v4484_v11 = vld [vmem:[#allocation7 + $0x14] sm:$0xf0]  ;;  %v4287_v39 = vld [vmem:[#allocation7 + $0x90] sm:$0xf] }
 0x2d4   : > { %v1905_v63 = vadd.f32 %v1904_v51, %v1856_v14  ;;  %v1810_v37 = vadd.f32 %v1809_v7, %v1761_v55  ;;  %2211 = vmatmul.bf16.gmra.mxu0 %v6041_v32  ;;  %v4500_v57 = vld [vmem:[#allocation7 + $0x94] sm:$0xf0] }
 0x2d5   : > { %2260 = vmatmul.bf16.gmra.mxu1 %v6048_v54  ;;  %2643 = vmatpush.bf16.msrb.mxu2 %v6399_v58 }
 0x2d6   : > { %v6394_v33 = vpack.c.bf16 %v1905_v63, %v1903_v49  ;;  %2309 = vmatmul.bf16.gmra.mxu2 %v6041_v32  ;;  %2692 = vmatpush.bf16.msrb.mxu3 %v6401_v6  ;;  %v4223_v63 = vld [vmem:[#allocation7 + $0x10] sm:$0xf] }
 0x2d7   : > { %2358 = vmatmul.bf16.gmra.mxu3 %v6048_v54  ;;  %v6409_v42 = vor.u32 %v4484_v11, %v4223_v63 }
 0x2d9   : > { %v1858_v56 = vpop.f32.mrf.mxu2  ;;  %v1762_v49 = vpop.f32.mrf.mxu0  ;;  %2545 = vmatpush.bf16.msrb.mxu0 %v6409_v42 }
 0x2da   : > { %v1859_v51 = vadd.f32 %v1858_v56, %v6213_v25  ;;  %v1907_v14 = vpop.f32.mrf.mxu3  ;;  %v1763_v40 = vadd.f32 %v1762_v49, %v6216_v35  ;;  %v1811_v1 = vpop.f32.mrf.mxu1  ;;  %v6411_v56 = vor.u32 %v4500_v57, %v4287_v39 }
 0x2dc   : > { %v1908_v9 = vadd.f32 %v1907_v14, %v1859_v51  ;;  %v1812_v55 = vadd.f32 %v1811_v1, %v1763_v40  ;;  %2594 = vmatpush.bf16.msrb.mxu1 %v6411_v56  ;;  %v4217_v1 = vld [vmem:[#allocation7 + $0x8] sm:$0xf0] }
 0x2de   : > { %v6407_v7 = vpack.c.bf16 %v1812_v55, %v1810_v37  ;;  %v4497_v55 = vld [vmem:[#allocation7 + $0x84] sm:$0xf] }
 0x2e1   : > { %v1860_v25 = vpop.f32.mrf.mxu2  ;;  %v1765_v35 = vpop.f32.mrf.mxu0 }
 0x2e2   : > { %v1861_v54 = vadd.f32 %v1860_v25, %v6224_v17  ;;  %v1909_v32 = vpop.f32.mrf.mxu3  ;;  %v1766_v51 = vadd.f32 %v1765_v35, %v6226_v61  ;;  %v1814_v14 = vpop.f32.mrf.mxu1  ;;  %v4481_v17 = vld [vmem:[#allocation7 + $0x4] sm:$0xf]  ;;  %v4281_v61 = vld [vmem:[#allocation7 + $0x88] sm:$0xf0] }
 0x2e3   : > { %v6423_v63 = vor.u32 %v4481_v17, %v4217_v1  ;;  %v6425_v39 = vor.u32 %v4497_v55, %v4281_v61  ;;  %v4482_v17 = vld [vmem:[#allocation7 + $0x4] sm:$0xf0] }
 0x2e4   : > { %v1910_v37 = vadd.f32 %v1909_v32, %v1861_v54  ;;  %v1815_v49 = vadd.f32 %v1814_v14, %v1766_v51  ;;  %2216 = vmatmul.bf16.gmra.mxu0 %v6053_v50  ;;  %v4498_v55 = vld [vmem:[#allocation7 + $0x84] sm:$0xf0] }
 0x2e5   : > { %2265 = vmatmul.bf16.gmra.mxu1 %v6060_v62  ;;  %2644 = vmatpush.bf16.msrb.mxu2 %v6423_v63 }
 0x2e6   : > { %v6418_v40 = vpack.c.bf16 %v1910_v37, %v1908_v9  ;;  %2314 = vmatmul.bf16.gmra.mxu2 %v6053_v50  ;;  %2693 = vmatpush.bf16.msrb.mxu3 %v6425_v39  ;;  %v4215_v37 = vld [vmem:[#allocation7] sm:$0xf] }
 0x2e7   : > { %2363 = vmatmul.bf16.gmra.mxu3 %v6060_v62  ;;  %v6436_v1 = vor.u32 %v4482_v17, %v4215_v37  ;;  %v7330_v17 = vld [vmem:[#allocation20_spill] sm:$0xff] }
 0x2e9   : > { %v1863_v11 = vpop.f32.mrf.mxu2  ;;  %v1767_v9 = vpop.f32.mrf.mxu0  ;;  %2865 = vmatpush.bf16.msra.mxu2 %v6063_v45  ;;  %2546 = vmatpush.bf16.msrb.mxu0 %v6436_v1 }
 0x2ea   : > { %v1864_v32 = vadd.f32 %v1863_v11, %v6237_v38  ;;  %v1912_v54 = vpop.f32.mrf.mxu3  ;;  %v1768_v57 = vadd.f32 %v1767_v9, %v6240_v24  ;;  %v1816_v25 = vpop.f32.mrf.mxu1  ;;  %2914 = vmatpush.bf16.msra.mxu3 %v6065_v31  ;;  %v4279_v38 = vld [vmem:[#allocation7 + $0x80] sm:$0xf] }
 0x2eb   : > { %v6439_v61 = vor.u32 %v4498_v55, %v4279_v38  ;;  %v7328_v9 = vld [vmem:[#allocation59_spill] sm:$0xff]  ;;  %v7331_v55 = vld [vmem:[#allocation46_spill] sm:$0xff] }
 0x2ec   : > { %v1913_v35 = vadd.f32 %v1912_v54, %v1864_v32  ;;  %v1817_v51 = vadd.f32 %v1816_v25, %v1768_v57  ;;  %v7327_v54 = vld [vmem:[#allocation22_spill] sm:$0xff] }
 0x2ed   : > { %2866 = vmatpush.bf16.msra.mxu2 %v6087_v21  ;;  %2595 = vmatpush.bf16.msrb.mxu1 %v6439_v61 }
 0x2ee   : > { %v6433_v14 = vpack.c.bf16 %v1817_v51, %v1815_v49  ;;  %2915 = vmatpush.bf16.msra.mxu3 %v6089_v43  ;;  %2767 = vmatpush.bf16.msra.mxu0 %v6070_v26  ;;  %v7325_v26 = vld [vmem:[#allocation44_spill] sm:$0xff] }
 0x2f1   : > { %v1865_v24 = vpop.f32.mrf.mxu2  ;;  %v1770_v31 = vpop.f32.mrf.mxu0  ;;  %2816 = vmatpush.bf16.msra.mxu1 %v6073_v16  ;;  %2867 = vmatpush.bf16.msra.mxu2 %v6112_v2  ;;  %v7326_v16 = vld [vmem:[#allocation21_spill] sm:$0xff] }
 0x2f2   : > { %v1866_v45 = vadd.f32 %v1865_v24, %v6248_v5  ;;  %v1914_v11 = vpop.f32.mrf.mxu3  ;;  %v1771_v49 = vadd.f32 %v1770_v31, %v6250_v10  ;;  %v1819_v32 = vpop.f32.mrf.mxu1  ;;  %2916 = vmatpush.bf16.msra.mxu3 %v6114_v41  ;;  %v7324_v10 = vld [vmem:[#allocation43_spill] sm:$0xff] }
 0x2f3   : > { %2768 = vmatpush.bf16.msra.mxu0 %v7324_v10  ;;  %v7332_v24 = vld [vmem:[#allocation23_spill] sm:$0xff] }
 0x2f4   : > { %v1915_v21 = vadd.f32 %v1914_v11, %v1866_v45  ;;  %v1820_v43 = vadd.f32 %v1819_v32, %v1771_v49  ;;  %2221 = vmatmul.bf16.gmra.mxu0 %v6076_v19  ;;  %v7333_v11 = vld [vmem:[#allocation24_spill] sm:$0xff]  ;;  %v7334_v49 = vld [vmem:[#allocation47_spill] sm:$0xff] }
 0x2f5   : > { %2270 = vmatmul.bf16.gmra.mxu1 %v6084_v59  ;;  %2868 = vmatpush.bf16.msra.mxu2 %v7326_v16  ;;  %v7335_v32 = vld [vmem:[#allocation48_spill] sm:$0xff]  ;;  %v7338_v16 = vld [vmem:[#allocation63_spill] sm:$0xff] }
 0x2f6   : > { %v6450_v5 = vpack.c.bf16 %v1915_v21, %v1913_v35  ;;  %2319 = vmatmul.bf16.gmra.mxu2 %v6076_v19  ;;  %2817 = vmatpush.bf16.msra.mxu1 %v7325_v26  ;;  %v7329_v35 = vld [vmem:[#allocation60_spill] sm:$0xff]  ;;  %v7336_v21 = vld [vmem:[#allocation25_spill] sm:$0xff]  ;;  %v7337_v26 = vld [vmem:[#allocation26_spill] sm:$0xff] }
 0x2f7   : > { %2368 = vmatmul.bf16.gmra.mxu3 %v6084_v59  ;;  %2769 = vmatpush.bf16.msra.mxu0 %v7330_v17 }
 0x2f8   : > { %2917 = vmatpush.bf16.msra.mxu3 %v7327_v54 }
 0x2f9   : > { %v1868_v2 = vpop.f32.mrf.mxu2  ;;  %v1772_v25 = vpop.f32.mrf.mxu0  ;;  %2869 = vmatpush.bf16.msra.mxu2 %v7332_v24  ;;  %v7344_v24 = vld [vmem:[#allocation32_spill] sm:$0xff] }
 0x2fa   : > { %v1869_v57 = vadd.f32 %v1868_v2, %v7328_v9  ;;  %v1917_v41 = vpop.f32.mrf.mxu3  ;;  %v1773_v51 = vadd.f32 %v1772_v25, %v7329_v35  ;;  %v1821_v37 = vpop.f32.mrf.mxu1  ;;  %2818 = vmatpush.bf16.msra.mxu1 %v7331_v55  ;;  %v7340_v35 = vld [vmem:[#allocation49_spill] sm:$0xff] }
 0x2fb   : > { %2770 = vmatpush.bf16.msra.mxu0 %v7334_v49  ;;  %v7343_v55 = vld [vmem:[#allocation45_spill] sm:$0xff]  ;;  %v7346_v49 = vld [vmem:[#allocation51_spill] sm:$0xff] }
 0x2fc   : > { %v1918_v38 = vadd.f32 %v1917_v41, %v1869_v57  ;;  %v1822_v45 = vadd.f32 %v1821_v37, %v1773_v51  ;;  %2918 = vmatpush.bf16.msra.mxu3 %v7333_v11  ;;  %v7339_v57 = vld [vmem:[#allocation64_spill] sm:$0xff]  ;;  %v7341_v51 = vld [vmem:[#allocation50_spill] sm:$0xff]  ;;  %v7342_v37 = vld [vmem:[#allocation31_spill] sm:$0xff] }
 0x2fd   : > { %2870 = vmatpush.bf16.msra.mxu2 %v7336_v21  ;;  %v7345_v11 = vld [vmem:[#allocation19_spill] sm:$0xff] }
 0x2fe   : > { %v6465_v31 = vpack.c.bf16 %v1822_v45, %v1820_v43  ;;  %2819 = vmatpush.bf16.msra.mxu1 %v7335_v32  ;;  %v7347_v32 = vld [vmem:[#allocation52_spill] sm:$0xff]  ;;  %v7348_v21 = vld [vmem:[#allocation35_spill] sm:$0xff] }
 0x2ff   : > { %2771 = vmatpush.bf16.msra.mxu0 %v7340_v35 }
 0x300   : > { %2919 = vmatpush.bf16.msra.mxu3 %v7337_v26  ;;  %v7349_v26 = vld [vmem:[#allocation36_spill] sm:$0xff] }
 0x301   : > { %v1870_v10 = vpop.f32.mrf.mxu2  ;;  %v1775_v9 = vpop.f32.mrf.mxu0  ;;  %2871 = vmatpush.bf16.msra.mxu2 %v7342_v37  ;;  %v7353_v37 = vld [vmem:[#allocation56_spill] sm:$0xff] }
 0x302   : > { %v1871_v2 = vadd.f32 %v1870_v10, %v7338_v16  ;;  %v1919_v54 = vpop.f32.mrf.mxu3  ;;  %v1776_v41 = vadd.f32 %v1775_v9, %v7339_v57  ;;  %v1824_v25 = vpop.f32.mrf.mxu1  ;;  %2820 = vmatpush.bf16.msra.mxu1 %v7341_v51  ;;  %v7350_v57 = vld [vmem:[#allocation53_spill] sm:$0xff]  ;;  %v7352_v51 = vld [vmem:[#allocation55_spill] sm:$0xff] }
 0x303   : > { %2772 = vmatpush.bf16.msra.mxu0 %v7346_v49  ;;  %v7354_v49 = vld [vmem:[#allocation67_spill] sm:$0xff] }
 0x304   : > { %v1920_v43 = vadd.f32 %v1919_v54, %v1871_v2  ;;  %v1825_v17 = vadd.f32 %v1824_v25, %v1776_v41  ;;  %2226 = vmatmul.bf16.gmra.mxu0 %v7343_v55  ;;  %2920 = vmatpush.bf16.msra.mxu3 %v7344_v24  ;;  %v7351_v25 = vld [vmem:[#allocation54_spill] sm:$0xff] }
 0x305   : > { %2275 = vmatmul.bf16.gmra.mxu1 %v7345_v11  ;;  %2872 = vmatpush.bf16.msra.mxu2 %v7348_v21 }
 0x306   : > { %v6478_v45 = vpack.c.bf16 %v1920_v43, %v1918_v38  ;;  %2324 = vmatmul.bf16.gmra.mxu2 %v7343_v55  ;;  %2821 = vmatpush.bf16.msra.mxu1 %v7347_v32 }
 0x307   : > { %2373 = vmatmul.bf16.gmra.mxu3 %v7345_v11  ;;  %2773 = vmatpush.bf16.msra.mxu0 %v7350_v57 }
 0x308   : > { %2921 = vmatpush.bf16.msra.mxu3 %v7349_v26 }
 0x309   : > { %v1873_v10 = vpop.f32.mrf.mxu2  ;;  %v1777_v38 = vpop.f32.mrf.mxu0 }
 0x30a   : > { %v1874_v16 = vadd.f32 %v1873_v10, %v6285_v44  ;;  %v1922_v2 = vpop.f32.mrf.mxu3  ;;  %v1778_v54 = vadd.f32 %v1777_v38, %v6288_v36  ;;  %v1826_v9 = vpop.f32.mrf.mxu1  ;;  %2822 = vmatpush.bf16.msra.mxu1 %v7351_v25  ;;  %v7357_v38 = vld [vmem:[#allocation61_spill] sm:$0xff] }
 0x30b   : > { %2774 = vmatpush.bf16.msra.mxu0 %v7352_v51  ;;  %v7359_v51 = vld [vmem:[#allocation37_spill] sm:$0xff] }
 0x30c   : > { %v1923_v41 = vadd.f32 %v1922_v2, %v1874_v16  ;;  %v1827_v35 = vadd.f32 %v1826_v9, %v1778_v54  ;;  %v7356_v2 = vld [vmem:[#allocation58_spill] sm:$0xff] }
 0x30d   : > { %v7358_v9 = vld [vmem:[#allocation62_spill] sm:$0xff] }
 0x30e   : > { %v6491_v43 = vpack.c.bf16 %v1827_v35, %v1825_v17  ;;  %2823 = vmatpush.bf16.msra.mxu1 %v7353_v37  ;;  %v7355_v17 = vld [vmem:[#allocation57_spill] sm:$0xff] }
 0x311   : > { %v1875_v24 = vpop.f32.mrf.mxu2  ;;  %v2192_v21 = vpop.f32.mrf.mxu0 }
 0x312   : > { %v1876_v44 = vadd.f32 %v1875_v24, %v7354_v49  ;;  %v1924_v32 = vpop.f32.mrf.mxu3  ;;  %v2241_v10 = vpop.f32.mrf.mxu1  ;;  %v7360_v24 = vld [vmem:[#allocation38_spill] sm:$0xff]  ;;  %v7361_v49 = vld [vmem:[#allocation65_spill] sm:$0xff] }
 0x313   : > { %v6496_v26 = vadd.f32 %v2241_v10, %v2192_v21 }
 0x314   : > { %v1925_v36 = vadd.f32 %v1924_v32, %v1876_v44  ;;  %2547 = vmatmul.bf16.vlgmr.msrb.gmra.mxu0 %v6311_v27  ;;  %v7362_v44 = vld [vmem:[#allocation66_spill] sm:$0xff]  ;;  %v7363_v32 = vld [vmem:[#allocation68_spill] sm:$0xff] }
 0x315   : > { %2596 = vmatmul.bf16.vlgmr.msrb.gmra.mxu1 %v6322_v28  ;;  %2963 = vmatpush.bf16.msrb.mxu0 %v7357_v38 }
 0x316   : > { %v6499_v16 = vpack.c.bf16 %v1925_v36, %v1923_v41  ;;  %2645 = vmatmul.bf16.vlgmr.msrb.gmra.mxu2 %v6311_v27  ;;  %3012 = vmatpush.bf16.msrb.mxu1 %v7358_v9 }
 0x317   : > { %2694 = vmatmul.bf16.vlgmr.msrb.gmra.mxu3 %v6322_v28  ;;  %3061 = vmatpush.bf16.msrb.mxu2 %v7355_v17 }
 0x318   : > { %3110 = vmatpush.bf16.msrb.mxu3 %v7356_v2 }
 0x319   : > { %v2290_v54 = vpop.f32.mrf.mxu2  ;;  %v2194_v25 = vpop.f32.mrf.mxu0  ;;  %2964 = vmatpush.bf16.msrb.mxu0 %v7361_v49 }
 0x31a   : > { %v2339_v57 = vpop.f32.mrf.mxu3  ;;  %v2243_v41 = vpop.f32.mrf.mxu1  ;;  %3013 = vmatpush.bf16.msrb.mxu1 %v7362_v44 }
 0x31b   : > { %v6508_v35 = vadd.f32 %v2339_v57, %v2290_v54  ;;  %3062 = vmatpush.bf16.msrb.mxu2 %v7359_v51  ;;  %v6511_v37 = vadd.f32 %v2243_v41, %v2194_v25 }
 0x31c   : > { %3111 = vmatpush.bf16.msrb.mxu3 %v7360_v24 }
 0x31d   : > { %2965 = vmatpush.bf16.msrb.mxu0 %v6313_v13 }
 0x31e   : > { %3014 = vmatpush.bf16.msrb.mxu1 %v6315_v60 }
 0x31f   : > { %3063 = vmatpush.bf16.msrb.mxu2 %v7363_v32 }
 0x320   : > { %3112 = vmatpush.bf16.msrb.mxu3 %v6305_v18 }
 0x321   : > { %v2292_v21 = vpop.f32.mrf.mxu2  ;;  %v2197_v36 = vpop.f32.mrf.mxu0  ;;  %2966 = vmatpush.bf16.msrb.mxu0 %v6337_v34 }
 0x322   : > { %v2341_v10 = vpop.f32.mrf.mxu3  ;;  %v2246_v2 = vpop.f32.mrf.mxu1  ;;  %3015 = vmatpush.bf16.msrb.mxu1 %v6339_v47 }
 0x323   : > { %v6520_v17 = vadd.f32 %v2341_v10, %v2292_v21  ;;  %3064 = vmatpush.bf16.msrb.mxu2 %v6327_v52  ;;  %v6523_v38 = vadd.f32 %v2246_v2, %v2197_v36 }
 0x324   : > { %3113 = vmatpush.bf16.msrb.mxu3 %v6329_v0  ;;  %2552 = vmatmul.bf16.gmra.mxu0 %v6335_v12 }
 0x325   : > { %2601 = vmatmul.bf16.gmra.mxu1 %v6346_v15  ;;  %2967 = vmatpush.bf16.msrb.mxu0 %v6361_v22 }
 0x326   : > { %2650 = vmatmul.bf16.gmra.mxu2 %v6335_v12  ;;  %3016 = vmatpush.bf16.msrb.mxu1 %v6363_v3 }
 0x327   : > { %2699 = vmatmul.bf16.gmra.mxu3 %v6346_v15  ;;  %3065 = vmatpush.bf16.msrb.mxu2 %v6351_v30 }
 0x328   : > { %3114 = vmatpush.bf16.msrb.mxu3 %v6353_v29 }
 0x329   : > { %v2295_v18 = vpop.f32.mrf.mxu2  ;;  %v2199_v60 = vpop.f32.mrf.mxu0  ;;  %2968 = vmatpush.bf16.msrb.mxu0 %v6385_v48 }
 0x32a   : > { %v2344_v13 = vpop.f32.mrf.mxu3  ;;  %v2248_v0 = vpop.f32.mrf.mxu1  ;;  %3017 = vmatpush.bf16.msrb.mxu1 %v6387_v8 }
 0x32b   : > { %v6536_v52 = vadd.f32 %v2344_v13, %v2295_v18  ;;  %3066 = vmatpush.bf16.msrb.mxu2 %v6375_v53  ;;  %v6539_v34 = vadd.f32 %v2248_v0, %v2199_v60 }
 0x32c   : > { %3115 = vmatpush.bf16.msrb.mxu3 %v6377_v4 }
 0x32d   : > { %2969 = vmatpush.bf16.msrb.mxu0 %v6409_v42 }
 0x32e   : > { %3018 = vmatpush.bf16.msrb.mxu1 %v6411_v56 }
 0x32f   : > { %3067 = vmatpush.bf16.msrb.mxu2 %v6399_v58 }
 0x330   : > { %3116 = vmatpush.bf16.msrb.mxu3 %v6401_v6 }
 0x331   : > { %v2297_v47 = vpop.f32.mrf.mxu2  ;;  %v2202_v29 = vpop.f32.mrf.mxu0  ;;  %2970 = vmatpush.bf16.msrb.mxu0 %v6436_v1 }
 0x332   : > { %v2346_v30 = vpop.f32.mrf.mxu3  ;;  %v2251_v3 = vpop.f32.mrf.mxu1  ;;  %3019 = vmatpush.bf16.msrb.mxu1 %v6439_v61 }
 0x333   : > { %v6548_v22 = vadd.f32 %v2346_v30, %v2297_v47  ;;  %3068 = vmatpush.bf16.msrb.mxu2 %v6423_v63  ;;  %v6551_v53 = vadd.f32 %v2251_v3, %v2202_v29 }
 0x334   : > { %3117 = vmatpush.bf16.msrb.mxu3 %v6425_v39  ;;  %2557 = vmatmul.bf16.gmra.mxu0 %v6359_v23 }
 0x335   : > { %2606 = vmatmul.bf16.gmra.mxu1 %v6370_v46 }
 0x336   : > { %2655 = vmatmul.bf16.gmra.mxu2 %v6359_v23 }
 0x337   : > { %2704 = vmatmul.bf16.gmra.mxu3 %v6370_v46 }
 0x339   : > { %v2300_v4 = vpop.f32.mrf.mxu2  ;;  %v2204_v8 = vpop.f32.mrf.mxu0 }
 0x33a   : > { %v2349_v48 = vpop.f32.mrf.mxu3  ;;  %v2253_v6 = vpop.f32.mrf.mxu1 }
 0x33b   : > { %v6560_v58 = vadd.f32 %v2349_v48, %v2300_v4  ;;  %v6562_v42 = vadd.f32 %v2253_v6, %v2204_v8 }
 0x341   : > { %v2302_v56 = vpop.f32.mrf.mxu2  ;;  %v2207_v39 = vpop.f32.mrf.mxu0 }
 0x342   : > { %v2351_v63 = vpop.f32.mrf.mxu3  ;;  %v2256_v61 = vpop.f32.mrf.mxu1 }
 0x343   : > { %v6564_v1 = vadd.f32 %v2351_v63, %v2302_v56  ;;  %v6566_v54 = vadd.f32 %v2256_v61, %v2207_v39 }
 0x344   : > { %2562 = vmatmul.bf16.gmra.mxu0 %v6383_v20 }
 0x345   : > { %2611 = vmatmul.bf16.gmra.mxu1 %v6394_v33 }
 0x346   : > { %2660 = vmatmul.bf16.gmra.mxu2 %v6383_v20 }
 0x347   : > { %2709 = vmatmul.bf16.gmra.mxu3 %v6394_v33 }
 0x349   : > { %v2305_v9 = vpop.f32.mrf.mxu2  ;;  %v2209_v25 = vpop.f32.mrf.mxu0 }
 0x34a   : > { %v2354_v57 = vpop.f32.mrf.mxu3  ;;  %v2258_v51 = vpop.f32.mrf.mxu1 }
 0x34b   : > { %v6572_v41 = vadd.f32 %v2354_v57, %v2305_v9  ;;  %v6574_v24 = vadd.f32 %v2258_v51, %v2209_v25 }
 0x351   : > { %v2307_v49 = vpop.f32.mrf.mxu2  ;;  %v2212_v32 = vpop.f32.mrf.mxu0 }
 0x352   : > { %v2356_v44 = vpop.f32.mrf.mxu3  ;;  %v2261_v10 = vpop.f32.mrf.mxu1 }
 0x353   : > { %v6576_v21 = vadd.f32 %v2356_v44, %v2307_v49  ;;  %v6578_v36 = vadd.f32 %v2261_v10, %v2212_v32 }
 0x354   : > { %2567 = vmatmul.bf16.gmra.mxu0 %v6407_v7 }
 0x355   : > { %2616 = vmatmul.bf16.gmra.mxu1 %v6418_v40 }
 0x356   : > { %2665 = vmatmul.bf16.gmra.mxu2 %v6407_v7 }
 0x357   : > { %2714 = vmatmul.bf16.gmra.mxu3 %v6418_v40 }
 0x359   : > { %v2310_v2 = vpop.f32.mrf.mxu2  ;;  %v2214_v13 = vpop.f32.mrf.mxu0 }
 0x35a   : > { %v2359_v18 = vpop.f32.mrf.mxu3  ;;  %v2263_v0 = vpop.f32.mrf.mxu1 }
 0x35b   : > { %v6584_v60 = vadd.f32 %v2359_v18, %v2310_v2  ;;  %v6586_v47 = vadd.f32 %v2263_v0, %v2214_v13 }
 0x361   : > { %v2312_v30 = vpop.f32.mrf.mxu2  ;;  %v2217_v3 = vpop.f32.mrf.mxu0 }
 0x362   : > { %v2361_v29 = vpop.f32.mrf.mxu3  ;;  %v2266_v48 = vpop.f32.mrf.mxu1 }
 0x363   : > { %v6588_v4 = vadd.f32 %v2361_v29, %v2312_v30  ;;  %v6590_v8 = vadd.f32 %v2266_v48, %v2217_v3 }
 0x364   : > { %2572 = vmatmul.bf16.gmra.mxu0 %v6433_v14 }
 0x365   : > { %2621 = vmatmul.bf16.gmra.mxu1 %v6450_v5 }
 0x366   : > { %2670 = vmatmul.bf16.gmra.mxu2 %v6433_v14 }
 0x367   : > { %2719 = vmatmul.bf16.gmra.mxu3 %v6450_v5 }
 0x369   : > { %v2315_v6 = vpop.f32.mrf.mxu2  ;;  %v2219_v63 = vpop.f32.mrf.mxu0 }
 0x36a   : > { %v2364_v56 = vpop.f32.mrf.mxu3  ;;  %v2268_v61 = vpop.f32.mrf.mxu1 }
 0x36b   : > { %v6596_v39 = vadd.f32 %v2364_v56, %v2315_v6  ;;  %v6598_v9 = vadd.f32 %v2268_v61, %v2219_v63 }
 0x371   : > { %v2317_v57 = vpop.f32.mrf.mxu2  ;;  %v2222_v51 = vpop.f32.mrf.mxu0 }
 0x372   : > { %v2366_v25 = vpop.f32.mrf.mxu3  ;;  %v2271_v44 = vpop.f32.mrf.mxu1 }
 0x373   : > { %v6600_v49 = vadd.f32 %v2366_v25, %v2317_v57  ;;  %v6602_v32 = vadd.f32 %v2271_v44, %v2222_v51 }
 0x374   : > { %2577 = vmatmul.bf16.gmra.mxu0 %v6465_v31 }
 0x375   : > { %2626 = vmatmul.bf16.gmra.mxu1 %v6478_v45 }
 0x376   : > { %2675 = vmatmul.bf16.gmra.mxu2 %v6465_v31 }
 0x377   : > { %2724 = vmatmul.bf16.gmra.mxu3 %v6478_v45 }
 0x379   : > { %v2320_v10 = vpop.f32.mrf.mxu2  ;;  %v2224_v18 = vpop.f32.mrf.mxu0 }
 0x37a   : > { %v2369_v2 = vpop.f32.mrf.mxu3  ;;  %v2273_v0 = vpop.f32.mrf.mxu1 }
 0x37b   : > { %v6608_v13 = vadd.f32 %v2369_v2, %v2320_v10  ;;  %v6610_v30 = vadd.f32 %v2273_v0, %v2224_v18 }
 0x381   : > { %v2322_v29 = vpop.f32.mrf.mxu2  ;;  %v2227_v48 = vpop.f32.mrf.mxu0 }
 0x382   : > { %v2371_v3 = vpop.f32.mrf.mxu3  ;;  %v2276_v56 = vpop.f32.mrf.mxu1 }
 0x383   : > { %v6612_v6 = vadd.f32 %v2371_v3, %v2322_v29  ;;  %v6614_v63 = vadd.f32 %v2276_v56, %v2227_v48 }
 0x384   : > { %2582 = vmatmul.bf16.gmra.mxu0 %v6491_v43 }
 0x385   : > { %2631 = vmatmul.bf16.gmra.mxu1 %v6499_v16 }
 0x386   : > { %2680 = vmatmul.bf16.gmra.mxu2 %v6491_v43 }
 0x387   : > { %2729 = vmatmul.bf16.gmra.mxu3 %v6499_v16 }
 0x389   : > { %v2325_v61 = vpop.f32.mrf.mxu2  ;;  %v2229_v25 = vpop.f32.mrf.mxu0 }
 0x38a   : > { %v2374_v57 = vpop.f32.mrf.mxu3  ;;  %v2278_v44 = vpop.f32.mrf.mxu1 }
 0x38b   : > { %v6620_v51 = vadd.f32 %v2374_v57, %v2325_v61  ;;  %v6622_v10 = vadd.f32 %v2278_v44, %v2229_v25 }
 0x391   : > { %v2327_v2 = vpop.f32.mrf.mxu2  ;;  %v2548_v0 = vpop.f32.mrf.mxu0 }
 0x392   : > { %v2376_v18 = vpop.f32.mrf.mxu3  ;;  %v2597_v3 = vpop.f32.mrf.mxu1 }
 0x393   : > { %v6624_v29 = vadd.f32 %v2376_v18, %v2327_v2  ;;  %v2598_v48 = vadd.f32 %v2597_v3, %v2548_v0 }
 0x394   : > { %2775 = vmatmul.bf16.vlgmr.msra.gmra.mxu0 %v6311_v27 }
 0x395   : > { %v6628_v56 = vsub.f32 %v6496_v26, %v2598_v48  ;;  %2824 = vmatmul.bf16.vlgmr.msra.gmra.mxu1 %v6322_v28 }
 0x396   : > { %2873 = vmatmul.bf16.vlgmr.msra.gmra.mxu2 %v6311_v27 }
 0x397   : > { %7364 = vst [vmem:[#allocation43_spill] sm:$0xff] %v6628_v56  ;;  %2922 = vmatmul.bf16.vlgmr.msra.gmra.mxu3 %v6322_v28 }
 0x399   : > { %v2646_v61 = vpop.f32.mrf.mxu2  ;;  %v2550_v25 = vpop.f32.mrf.mxu0 }
 0x39a   : > { %v2695_v57 = vpop.f32.mrf.mxu3  ;;  %v2599_v11 = vpop.f32.mrf.mxu1 }
 0x39b   : > { %v2696_v44 = vadd.f32 %v2695_v57, %v2646_v61  ;;  %v2600_v2 = vadd.f32 %v2599_v11, %v2550_v25 }
 0x39d   : > { %v6634_v18 = vsub.f32 %v6508_v35, %v2696_v44  ;;  %v6637_v0 = vsub.f32 %v6511_v37, %v2600_v2 }
 0x3a1   : > { %v2648_v26 = vpop.f32.mrf.mxu2  ;;  %v2553_v48 = vpop.f32.mrf.mxu0 }
 0x3a2   : > { %v2697_v3 = vpop.f32.mrf.mxu3  ;;  %v2602_v55 = vpop.f32.mrf.mxu1 }
 0x3a3   : > { %v2698_v56 = vadd.f32 %v2697_v3, %v2648_v26  ;;  %v2603_v27 = vadd.f32 %v2602_v55, %v2553_v48 }
 0x3a4   : > { %2780 = vmatmul.bf16.gmra.mxu0 %v6335_v12 }
 0x3a5   : > { %v6640_v28 = vsub.f32 %v6520_v17, %v2698_v56  ;;  %v6644_v61 = vsub.f32 %v6523_v38, %v2603_v27  ;;  %2829 = vmatmul.bf16.gmra.mxu1 %v6346_v15 }
 0x3a6   : > { %2878 = vmatmul.bf16.gmra.mxu2 %v6335_v12 }
 0x3a7   : > { %2927 = vmatmul.bf16.gmra.mxu3 %v6346_v15 }
 0x3a9   : > { %v2651_v11 = vpop.f32.mrf.mxu2  ;;  %v2555_v37 = vpop.f32.mrf.mxu0 }
 0x3aa   : > { %v2700_v35 = vpop.f32.mrf.mxu3  ;;  %v2604_v25 = vpop.f32.mrf.mxu1 }
 0x3ab   : > { %v2701_v57 = vadd.f32 %v2700_v35, %v2651_v11  ;;  %v2605_v55 = vadd.f32 %v2604_v25, %v2555_v37 }
 0x3ad   : > { %v6650_v17 = vsub.f32 %v6536_v52, %v2701_v57  ;;  %v6653_v56 = vsub.f32 %v6539_v34, %v2605_v55 }
 0x3b1   : > { %v2653_v38 = vpop.f32.mrf.mxu2  ;;  %v2558_v2 = vpop.f32.mrf.mxu0 }
 0x3b2   : > { %v2702_v44 = vpop.f32.mrf.mxu3  ;;  %v2607_v3 = vpop.f32.mrf.mxu1 }
 0x3b3   : > { %v2703_v26 = vadd.f32 %v2702_v44, %v2653_v38  ;;  %v2608_v12 = vadd.f32 %v2607_v3, %v2558_v2 }
 0x3b4   : > { %2785 = vmatmul.bf16.gmra.mxu0 %v6359_v23 }
 0x3b5   : > { %v6656_v15 = vsub.f32 %v6548_v22, %v2703_v26  ;;  %v6660_v48 = vsub.f32 %v6551_v53, %v2608_v12  ;;  %2834 = vmatmul.bf16.gmra.mxu1 %v6370_v46 }
 0x3b6   : > { %2883 = vmatmul.bf16.gmra.mxu2 %v6359_v23 }
 0x3b7   : > { %2932 = vmatmul.bf16.gmra.mxu3 %v6370_v46 }
 0x3b9   : > { %v2656_v52 = vpop.f32.mrf.mxu2  ;;  %v2560_v27 = vpop.f32.mrf.mxu0 }
 0x3ba   : > { %v2705_v34 = vpop.f32.mrf.mxu3  ;;  %v2609_v35 = vpop.f32.mrf.mxu1 }
 0x3bb   : > { %v2706_v11 = vadd.f32 %v2705_v34, %v2656_v52  ;;  %v2610_v37 = vadd.f32 %v2609_v35, %v2560_v27 }
 0x3bd   : > { %v6666_v22 = vsub.f32 %v6560_v58, %v2706_v11  ;;  %v6669_v57 = vsub.f32 %v6562_v42, %v2610_v37 }
 0x3c1   : > { %v2658_v53 = vpop.f32.mrf.mxu2  ;;  %v2563_v55 = vpop.f32.mrf.mxu0 }
 0x3c2   : > { %v2707_v25 = vpop.f32.mrf.mxu3  ;;  %v2612_v44 = vpop.f32.mrf.mxu1 }
 0x3c3   : > { %v2708_v38 = vadd.f32 %v2707_v25, %v2658_v53  ;;  %v2613_v23 = vadd.f32 %v2612_v44, %v2563_v55 }
 0x3c4   : > { %2790 = vmatmul.bf16.gmra.mxu0 %v6383_v20 }
 0x3c5   : > { %v6672_v46 = vsub.f32 %v6564_v1, %v2708_v38  ;;  %v6676_v2 = vsub.f32 %v6566_v54, %v2613_v23  ;;  %2839 = vmatmul.bf16.gmra.mxu1 %v6394_v33 }
 0x3c6   : > { %2888 = vmatmul.bf16.gmra.mxu2 %v6383_v20 }
 0x3c7   : > { %2937 = vmatmul.bf16.gmra.mxu3 %v6394_v33 }
 0x3c9   : > { %v2661_v58 = vpop.f32.mrf.mxu2  ;;  %v2565_v26 = vpop.f32.mrf.mxu0 }
 0x3ca   : > { %v2710_v42 = vpop.f32.mrf.mxu3  ;;  %v2614_v12 = vpop.f32.mrf.mxu1 }
 0x3cb   : > { %v2711_v3 = vadd.f32 %v2710_v42, %v2661_v58  ;;  %v2615_v52 = vadd.f32 %v2614_v12, %v2565_v26 }
 0x3cd   : > { %v6682_v1 = vsub.f32 %v6572_v41, %v2711_v3  ;;  %v6685_v34 = vsub.f32 %v6574_v24, %v2615_v52 }
 0x3d1   : > { %v2663_v54 = vpop.f32.mrf.mxu2  ;;  %v2568_v11 = vpop.f32.mrf.mxu0 }
 0x3d2   : > { %v2712_v27 = vpop.f32.mrf.mxu3  ;;  %v2617_v37 = vpop.f32.mrf.mxu1 }
 0x3d3   : > { %v2713_v35 = vadd.f32 %v2712_v27, %v2663_v54  ;;  %v2618_v20 = vadd.f32 %v2617_v37, %v2568_v11 }
 0x3d4   : > { %2795 = vmatmul.bf16.gmra.mxu0 %v6407_v7 }
 0x3d5   : > { %v6688_v33 = vsub.f32 %v6576_v21, %v2713_v35  ;;  %v6692_v53 = vsub.f32 %v6578_v36, %v2618_v20  ;;  %2844 = vmatmul.bf16.gmra.mxu1 %v6418_v40 }
 0x3d6   : > { %2893 = vmatmul.bf16.gmra.mxu2 %v6407_v7 }
 0x3d7   : > { %2942 = vmatmul.bf16.gmra.mxu3 %v6418_v40 }
 0x3d9   : > { %v2666_v41 = vpop.f32.mrf.mxu2  ;;  %v2570_v25 = vpop.f32.mrf.mxu0 }
 0x3da   : > { %v2715_v24 = vpop.f32.mrf.mxu3  ;;  %v2619_v38 = vpop.f32.mrf.mxu1 }
 0x3db   : > { %v2716_v55 = vadd.f32 %v2715_v24, %v2666_v41  ;;  %v2620_v44 = vadd.f32 %v2619_v38, %v2570_v25 }
 0x3dd   : > { %v6698_v21 = vsub.f32 %v6584_v60, %v2716_v55  ;;  %v6701_v23 = vsub.f32 %v6586_v47, %v2620_v44 }
 0x3e1   : > { %v2668_v36 = vpop.f32.mrf.mxu2  ;;  %v2573_v42 = vpop.f32.mrf.mxu0 }
 0x3e2   : > { %v2717_v58 = vpop.f32.mrf.mxu3  ;;  %v2622_v3 = vpop.f32.mrf.mxu1 }
 0x3e3   : > { %v2718_v26 = vadd.f32 %v2717_v58, %v2668_v36  ;;  %v2623_v7 = vadd.f32 %v2622_v3, %v2573_v42 }
 0x3e4   : > { %2800 = vmatmul.bf16.gmra.mxu0 %v6433_v14 }
 0x3e5   : > { %v6704_v40 = vsub.f32 %v6588_v4, %v2718_v26  ;;  %v6708_v12 = vsub.f32 %v6590_v8, %v2623_v7  ;;  %2849 = vmatmul.bf16.gmra.mxu1 %v6450_v5 }
 0x3e6   : > { %2898 = vmatmul.bf16.gmra.mxu2 %v6433_v14 }
 0x3e7   : > { %2947 = vmatmul.bf16.gmra.mxu3 %v6450_v5 }
 0x3e9   : > { %v2671_v60 = vpop.f32.mrf.mxu2  ;;  %v2575_v52 = vpop.f32.mrf.mxu0 }
 0x3ea   : > { %v2720_v47 = vpop.f32.mrf.mxu3  ;;  %v2624_v27 = vpop.f32.mrf.mxu1 }
 0x3eb   : > { %v2721_v54 = vadd.f32 %v2720_v47, %v2671_v60  ;;  %v2625_v11 = vadd.f32 %v2624_v27, %v2575_v52 }
 0x3ed   : > { %v6714_v4 = vsub.f32 %v6596_v39, %v2721_v54  ;;  %v6717_v35 = vsub.f32 %v6598_v9, %v2625_v11 }
 0x3f1   : > { %v2673_v8 = vpop.f32.mrf.mxu2  ;;  %v2578_v20 = vpop.f32.mrf.mxu0 }
 0x3f2   : > { %v2722_v37 = vpop.f32.mrf.mxu3  ;;  %v2627_v24 = vpop.f32.mrf.mxu1 }
 0x3f3   : > { %v2723_v41 = vadd.f32 %v2722_v37, %v2673_v8  ;;  %v2628_v14 = vadd.f32 %v2627_v24, %v2578_v20  ;;  %v7374_v24 = vld [vmem:[#allocation27_spill] sm:$0xff] }
 0x3f4   : > { %2805 = vmatmul.bf16.gmra.mxu0 %v6465_v31 }
 0x3f5   : > { %v6720_v5 = vsub.f32 %v6600_v49, %v2723_v41  ;;  %v6724_v25 = vsub.f32 %v6602_v32, %v2628_v14  ;;  %2854 = vmatmul.bf16.gmra.mxu1 %v6478_v45  ;;  %v7375_v14 = vld [vmem:[#allocation28_spill] sm:$0xff] }
 0x3f6   : > { %2903 = vmatmul.bf16.gmra.mxu2 %v6465_v31 }
 0x3f7   : > { %7365 = vst [vmem:[#allocation44_spill] sm:$0xff] %v6720_v5  ;;  %2952 = vmatmul.bf16.gmra.mxu3 %v6478_v45 }
 0x3f8   : > { %7366 = vst [vmem:[#allocation21_spill] sm:$0xff] %v6724_v25  ;;  %v3193_v25 = vld [vmem:[%s5084_s0 + $0x10] sm:$0xff] }
 0x3f9   : > { %v2676_v39 = vpop.f32.mrf.mxu2  ;;  %v2580_v55 = vpop.f32.mrf.mxu0 }
 0x3fa   : > { %v2725_v9 = vpop.f32.mrf.mxu3  ;;  %v2629_v44 = vpop.f32.mrf.mxu1 }
 0x3fb   : > { %v2726_v38 = vadd.f32 %v2725_v9, %v2676_v39  ;;  %v2630_v36 = vadd.f32 %v2629_v44, %v2580_v55 }
 0x3fd   : > { %v6730_v49 = vsub.f32 %v6608_v13, %v2726_v38  ;;  %v6733_v58 = vsub.f32 %v6610_v30, %v2630_v36 }
 0x3ff   : > { %7367 = vst [vmem:[#allocation22_spill] sm:$0xff] %v6730_v49  ;;  %v3159_v49 = vld [vmem:[%s5078_s1] sm:$0xff] }
 0x400   : > { %7368 = vst [vmem:[#allocation59_spill] sm:$0xff] %v6733_v58 }
 0x401   : > { %v2678_v32 = vpop.f32.mrf.mxu2  ;;  %v2583_v26 = vpop.f32.mrf.mxu0 }
 0x402   : > { %v2727_v42 = vpop.f32.mrf.mxu3  ;;  %v2632_v7 = vpop.f32.mrf.mxu1 }
 0x403   : > { %v2728_v3 = vadd.f32 %v2727_v42, %v2678_v32  ;;  %v2633_v31 = vadd.f32 %v2632_v7, %v2583_v26  ;;  %v7377_v7 = vld [vmem:[#allocation30_spill] sm:$0xff] }
 0x404   : > { %2810 = vmatmul.bf16.gmra.mxu0 %v6491_v43 }
 0x405   : > { %v6736_v45 = vsub.f32 %v6612_v6, %v2728_v3  ;;  %v6740_v60 = vsub.f32 %v6614_v63, %v2633_v31  ;;  %2859 = vmatmul.bf16.gmra.mxu1 %v6499_v16  ;;  %v7376_v3 = vld [vmem:[#allocation29_spill] sm:$0xff] }
 0x406   : > { %2908 = vmatmul.bf16.gmra.mxu2 %v6491_v43 }
 0x407   : > { %7369 = vst [vmem:[#allocation60_spill] sm:$0xff] %v6736_v45  ;;  %2957 = vmatmul.bf16.gmra.mxu3 %v6499_v16 }
 0x408   : > { %7370 = vst [vmem:[#allocation20_spill] sm:$0xff] %v6740_v60 }
 0x409   : > { %v2681_v13 = vpop.f32.mrf.mxu2  ;;  %v2585_v47 = vpop.f32.mrf.mxu0 }
 0x40a   : > { %v2730_v30 = vpop.f32.mrf.mxu3  ;;  %v2634_v54 = vpop.f32.mrf.mxu1 }
 0x40b   : > { %v2731_v52 = vadd.f32 %v2730_v30, %v2681_v13  ;;  %v2635_v27 = vadd.f32 %v2634_v54, %v2585_v47 }
 0x40d   : > { %v6746_v6 = vsub.f32 %v6620_v51, %v2731_v52  ;;  %v6749_v11 = vsub.f32 %v6622_v10, %v2635_v27 }
 0x40f   : > { %7371 = vst [vmem:[#allocation46_spill] sm:$0xff] %v6746_v6 }
 0x410   : > { %7372 = vst [vmem:[#allocation23_spill] sm:$0xff] %v6749_v11 }
 0x411   : > { %v2683_v63 = vpop.f32.mrf.mxu2  ;;  %v2776_v37 = vpop.f32.mrf.mxu0 }
 0x412   : > { %v2732_v8 = vpop.f32.mrf.mxu3  ;;  %v2825_v41 = vpop.f32.mrf.mxu1 }
 0x413   : > { %v2733_v20 = vadd.f32 %v2732_v8, %v2683_v63  ;;  %v6751_v43 = vadd.f32 %v2825_v41, %v2776_v37 }
 0x414   : > { %2971 = vmatmul.bf16.vlgmr.msrb.gmra.mxu0 %v7374_v24 }
 0x415   : > { %v6754_v16 = vsub.f32 %v6624_v29, %v2733_v20  ;;  %3020 = vmatmul.bf16.vlgmr.msrb.gmra.mxu1 %v7375_v14 }
 0x416   : > { %3069 = vmatmul.bf16.vlgmr.msrb.gmra.mxu2 %v7374_v24  ;;  %v7378_v24 = vld [vmem:[#allocation33_spill] sm:$0xff] }
 0x417   : > { %7373 = vst [vmem:[#allocation24_spill] sm:$0xff] %v6754_v16  ;;  %3118 = vmatmul.bf16.vlgmr.msrb.gmra.mxu3 %v7375_v14  ;;  %v7379_v14 = vld [vmem:[#allocation34_spill] sm:$0xff] }
 0x419   : > { %v2874_v51 = vpop.f32.mrf.mxu2  ;;  %v2778_v39 = vpop.f32.mrf.mxu0 }
 0x41a   : > { %v2923_v10 = vpop.f32.mrf.mxu3  ;;  %v2827_v55 = vpop.f32.mrf.mxu1 }
 0x41b   : > { %v6760_v9 = vadd.f32 %v2923_v10, %v2874_v51  ;;  %v6762_v38 = vadd.f32 %v2827_v55, %v2778_v39 }
 0x421   : > { %v2876_v44 = vpop.f32.mrf.mxu2  ;;  %v2781_v29 = vpop.f32.mrf.mxu0 }
 0x422   : > { %v2925_v36 = vpop.f32.mrf.mxu3  ;;  %v2830_v42 = vpop.f32.mrf.mxu1 }
 0x423   : > { %v6764_v32 = vadd.f32 %v2925_v36, %v2876_v44  ;;  %v6766_v26 = vadd.f32 %v2830_v42, %v2781_v29 }
 0x424   : > { %2976 = vmatmul.bf16.gmra.mxu0 %v7376_v3 }
 0x425   : > { %3025 = vmatmul.bf16.gmra.mxu1 %v7377_v7 }
 0x426   : > { %3074 = vmatmul.bf16.gmra.mxu2 %v7376_v3 }
 0x427   : > { %3123 = vmatmul.bf16.gmra.mxu3 %v7377_v7 }
 0x429   : > { %v2879_v31 = vpop.f32.mrf.mxu2  ;;  %v2783_v30 = vpop.f32.mrf.mxu0 }
 0x42a   : > { %v2928_v13 = vpop.f32.mrf.mxu3  ;;  %v2832_v52 = vpop.f32.mrf.mxu1 }
 0x42b   : > { %v6772_v47 = vadd.f32 %v2928_v13, %v2879_v31  ;;  %v6774_v54 = vadd.f32 %v2832_v52, %v2783_v30  ;;  %v7380_v30 = vld [vmem:[#allocation39_spill] sm:$0xff]  ;;  %v7381_v52 = vld [vmem:[#allocation40_spill] sm:$0xff] }
 0x431   : > { %v2881_v27 = vpop.f32.mrf.mxu2  ;;  %v2786_v8 = vpop.f32.mrf.mxu0 }
 0x432   : > { %v2930_v63 = vpop.f32.mrf.mxu3  ;;  %v2835_v20 = vpop.f32.mrf.mxu1 }
 0x433   : > { %v6776_v37 = vadd.f32 %v2930_v63, %v2881_v27  ;;  %v6778_v41 = vadd.f32 %v2835_v20, %v2786_v8 }
 0x434   : > { %2981 = vmatmul.bf16.gmra.mxu0 %v7378_v24 }
 0x435   : > { %3030 = vmatmul.bf16.gmra.mxu1 %v7379_v14 }
 0x436   : > { %3079 = vmatmul.bf16.gmra.mxu2 %v7378_v24 }
 0x437   : > { %3128 = vmatmul.bf16.gmra.mxu3 %v7379_v14 }
 0x439   : > { %v2884_v51 = vpop.f32.mrf.mxu2  ;;  %v2788_v39 = vpop.f32.mrf.mxu0 }
 0x43a   : > { %v2933_v10 = vpop.f32.mrf.mxu3  ;;  %v2837_v44 = vpop.f32.mrf.mxu1 }
 0x43b   : > { %v6784_v55 = vadd.f32 %v2933_v10, %v2884_v51  ;;  %v6786_v36 = vadd.f32 %v2837_v44, %v2788_v39 }
 0x441   : > { %v2886_v29 = vpop.f32.mrf.mxu2  ;;  %v2791_v3 = vpop.f32.mrf.mxu0 }
 0x442   : > { %v2935_v42 = vpop.f32.mrf.mxu3  ;;  %v2840_v31 = vpop.f32.mrf.mxu1 }
 0x443   : > { %v6788_v7 = vadd.f32 %v2935_v42, %v2886_v29  ;;  %v6790_v13 = vadd.f32 %v2840_v31, %v2791_v3  ;;  %v7382_v3 = vld [vmem:[#allocation41_spill] sm:$0xff]  ;;  %v7383_v31 = vld [vmem:[#allocation42_spill] sm:$0xff] }
 0x444   : > { %2986 = vmatmul.bf16.gmra.mxu0 %v7380_v30 }
 0x445   : > { %3035 = vmatmul.bf16.gmra.mxu1 %v7381_v52 }
 0x446   : > { %3084 = vmatmul.bf16.gmra.mxu2 %v7380_v30 }
 0x447   : > { %3133 = vmatmul.bf16.gmra.mxu3 %v7381_v52 }
 0x449   : > { %v2889_v27 = vpop.f32.mrf.mxu2  ;;  %v2793_v8 = vpop.f32.mrf.mxu0 }
 0x44a   : > { %v2938_v63 = vpop.f32.mrf.mxu3  ;;  %v2842_v24 = vpop.f32.mrf.mxu1 }
 0x44b   : > { %v6796_v20 = vadd.f32 %v2938_v63, %v2889_v27  ;;  %v6798_v14 = vadd.f32 %v2842_v24, %v2793_v8 }
 0x451   : > { %v2891_v51 = vpop.f32.mrf.mxu2  ;;  %v2796_v39 = vpop.f32.mrf.mxu0 }
 0x452   : > { %v2940_v10 = vpop.f32.mrf.mxu3  ;;  %v2845_v29 = vpop.f32.mrf.mxu1 }
 0x453   : > { %v6800_v44 = vadd.f32 %v2940_v10, %v2891_v51  ;;  %v6802_v42 = vadd.f32 %v2845_v29, %v2796_v39 }
 0x454   : > { %2991 = vmatmul.bf16.gmra.mxu0 %v7382_v3 }
 0x455   : > { %3040 = vmatmul.bf16.gmra.mxu1 %v7383_v31 }
 0x456   : > { %3089 = vmatmul.bf16.gmra.mxu2 %v7382_v3 }
 0x457   : > { %3138 = vmatmul.bf16.gmra.mxu3 %v7383_v31 }
 0x459   : > { %v2894_v30 = vpop.f32.mrf.mxu2  ;;  %v2798_v27 = vpop.f32.mrf.mxu0 }
 0x45a   : > { %v2943_v52 = vpop.f32.mrf.mxu3  ;;  %v2847_v8 = vpop.f32.mrf.mxu1 }
 0x45b   : > { %v6808_v63 = vadd.f32 %v2943_v52, %v2894_v30  ;;  %v6810_v24 = vadd.f32 %v2847_v8, %v2798_v27 }
 0x461   : > { %v2896_v51 = vpop.f32.mrf.mxu2  ;;  %v2801_v39 = vpop.f32.mrf.mxu0 }
 0x462   : > { %v2945_v10 = vpop.f32.mrf.mxu3  ;;  %v2850_v16 = vpop.f32.mrf.mxu1 }
 0x463   : > { %v6812_v29 = vadd.f32 %v2945_v10, %v2896_v51  ;;  %v6814_v11 = vadd.f32 %v2850_v16, %v2801_v39 }
 0x464   : > { %2996 = vmatmul.bf16.gmra.mxu0 %v6053_v50 }
 0x465   : > { %3045 = vmatmul.bf16.gmra.mxu1 %v6060_v62 }
 0x466   : > { %3094 = vmatmul.bf16.gmra.mxu2 %v6053_v50 }
 0x467   : > { %3143 = vmatmul.bf16.gmra.mxu3 %v6060_v62 }
 0x469   : > { %v2899_v3 = vpop.f32.mrf.mxu2  ;;  %v2803_v30 = vpop.f32.mrf.mxu0 }
 0x46a   : > { %v2948_v31 = vpop.f32.mrf.mxu3  ;;  %v2852_v27 = vpop.f32.mrf.mxu1 }
 0x46b   : > { %v6820_v52 = vadd.f32 %v2948_v31, %v2899_v3  ;;  %v6822_v8 = vadd.f32 %v2852_v27, %v2803_v30 }
 0x471   : > { %v2901_v51 = vpop.f32.mrf.mxu2  ;;  %v2806_v16 = vpop.f32.mrf.mxu0 }
 0x472   : > { %v2950_v10 = vpop.f32.mrf.mxu3  ;;  %v2855_v6 = vpop.f32.mrf.mxu1 }
 0x473   : > { %v6824_v39 = vadd.f32 %v2950_v10, %v2901_v51  ;;  %v6826_v60 = vadd.f32 %v2855_v6, %v2806_v16 }
 0x474   : > { %3001 = vmatmul.bf16.gmra.mxu0 %v6076_v19 }
 0x475   : > { %3050 = vmatmul.bf16.gmra.mxu1 %v6084_v59 }
 0x476   : > { %3099 = vmatmul.bf16.gmra.mxu2 %v6076_v19  ;;  %v7388_v19 = vld [vmem:[#allocation45_spill] sm:$0xff] }
 0x477   : > { %3148 = vmatmul.bf16.gmra.mxu3 %v6084_v59  ;;  %v7389_v59 = vld [vmem:[#allocation19_spill] sm:$0xff] }
 0x479   : > { %v2904_v50 = vpop.f32.mrf.mxu2  ;;  %v2808_v3 = vpop.f32.mrf.mxu0 }
 0x47a   : > { %v2953_v62 = vpop.f32.mrf.mxu3  ;;  %v2857_v30 = vpop.f32.mrf.mxu1 }
 0x47b   : > { %v6832_v31 = vadd.f32 %v2953_v62, %v2904_v50  ;;  %v6834_v27 = vadd.f32 %v2857_v30, %v2808_v3 }
 0x47d   : > { %7384 = vst [vmem:[#allocation47_spill] sm:$0xff] %v6832_v31  ;;  %v3161_v31 = vld [vmem:[%s5078_s1 + $0x10] sm:$0xff] }
 0x47e   : > { %7385 = vst [vmem:[#allocation48_spill] sm:$0xff] %v6834_v27  ;;  %v3191_v27 = vld [vmem:[%s5084_s0] sm:$0xff] }
 0x481   : > { %v2906_v51 = vpop.f32.mrf.mxu2  ;;  %v2811_v10 = vpop.f32.mrf.mxu0 }
 0x482   : > { %v2955_v6 = vpop.f32.mrf.mxu3  ;;  %v2860_v45 = vpop.f32.mrf.mxu1 }
 0x483   : > { %v6836_v16 = vadd.f32 %v2955_v6, %v2906_v51  ;;  %v6838_v58 = vadd.f32 %v2860_v45, %v2811_v10 }
 0x484   : > { %3006 = vmatmul.bf16.gmra.mxu0 %v7388_v19 }
 0x485   : > { %7386 = vst [vmem:[#allocation25_spill] sm:$0xff] %v6836_v16  ;;  %3055 = vmatmul.bf16.gmra.mxu1 %v7389_v59 }
 0x486   : > { %7387 = vst [vmem:[#allocation26_spill] sm:$0xff] %v6838_v58  ;;  %3104 = vmatmul.bf16.gmra.mxu2 %v7388_v19 }
 0x487   : > { %3153 = vmatmul.bf16.gmra.mxu3 %v7389_v59 }
 0x489   : > { %v2909_v50 = vpop.f32.mrf.mxu2  ;;  %v2813_v3 = vpop.f32.mrf.mxu0 }
 0x48a   : > { %v2958_v62 = vpop.f32.mrf.mxu3  ;;  %v2862_v51 = vpop.f32.mrf.mxu1 }
 0x48b   : > { %v6845_v30 = vadd.f32 %v2958_v62, %v2909_v50  ;;  %v6847_v6 = vadd.f32 %v2862_v51, %v2813_v3  ;;  %v7393_v62 = vld [vmem:[#allocation43_spill] sm:$0xff] }
 0x48d   : > { %7390 = vst [vmem:[#allocation63_spill] sm:$0xff] %v6845_v30  ;;  %v3223_v30 = vmul.f32 %v3159_v49, %v7393_v62 }
 0x48e   : > { %7391 = vst [vmem:[#allocation64_spill] sm:$0xff] %v6847_v6  ;;  %v3383_v6 = vmul.f32 %v3191_v27, %v7393_v62 }
 0x491   : > { %v2911_v45 = vpop.f32.mrf.mxu2  ;;  %v2972_v58 = vpop.f32.mrf.mxu0 }
 0x492   : > { %v2960_v10 = vpop.f32.mrf.mxu3  ;;  %v2973_v19 = vadd.f32 %v2972_v58, %v6751_v43  ;;  %v3021_v59 = vpop.f32.mrf.mxu1 }
 0x493   : > { %v6849_v16 = vadd.f32 %v2960_v10, %v2911_v45 }
 0x494   : > { %v3022_v50 = vadd.f32 %v3021_v59, %v2973_v19  ;;  %v3160_v19 = vld [vmem:[%s5078_s1 + $0x8] sm:$0xff] }
 0x495   : > { %7392 = vst [vmem:[#allocation49_spill] sm:$0xff] %v6849_v16  ;;  %v3192_v59 = vld [vmem:[%s5084_s0 + $0x8] sm:$0xff] }
 0x496   : > { %v3255_v3 = vmul.f32 %v3191_v27, %v3022_v50  ;;  %v3351_v51 = vmul.f32 %v3159_v49, %v3022_v50 }
 0x498   : > { %v3287_v58 = vsub.f32 %v3223_v30, %v3255_v3  ;;  %v3415_v43 = vadd.f32 %v3383_v6, %v3351_v51  ;;  %v3224_v30 = vmul.f32 %v3160_v19, %v6634_v18  ;;  %v3225_v51 = vmul.f32 %v3161_v31, %v6637_v0 }
 0x499   : > { %v3070_v45 = vpop.f32.mrf.mxu2  ;;  %v2974_v10 = vpop.f32.mrf.mxu0 }
 0x49a   : > { %v3071_v49 = vadd.f32 %v3070_v45, %v6760_v9  ;;  %v3119_v27 = vpop.f32.mrf.mxu3  ;;  %3319 = vst [vmem:[%s6859_s17] sm:$0xff] %v3287_v58  ;;  %v2975_v50 = vadd.f32 %v2974_v10, %v6762_v38  ;;  %v3023_v62 = vpop.f32.mrf.mxu1  ;;  %v3384_v9 = vmul.f32 %v3192_v59, %v6634_v18 }
 0x49b   : > { %3447 = vst [vmem:[%s6864_s16] sm:$0xff] %v3415_v43  ;;  %v3385_v43 = vmul.f32 %v3193_v25, %v6637_v0 }
 0x49c   : > { %v3120_v16 = vadd.f32 %v3119_v27, %v3071_v49  ;;  %v3024_v5 = vadd.f32 %v3023_v62, %v2975_v50  ;;  %v3194_v62 = vld [vmem:[%s5084_s0 + $0x18] sm:$0xff] }
 0x49e   : > { %v3256_v6 = vmul.f32 %v3192_v59, %v3120_v16  ;;  %v3352_v3 = vmul.f32 %v3160_v19, %v3120_v16  ;;  %v3257_v58 = vmul.f32 %v3193_v25, %v3024_v5  ;;  %v3353_v38 = vmul.f32 %v3161_v31, %v3024_v5  ;;  %v3162_v59 = vld [vmem:[%s5078_s1 + $0x18] sm:$0xff]  ;;  %v3163_v25 = vld [vmem:[%s5078_s1 + $0x20] sm:$0xff] }
 0x4a0   : > { %v3288_v45 = vsub.f32 %v3224_v30, %v3256_v6  ;;  %v3416_v49 = vadd.f32 %v3384_v9, %v3352_v3  ;;  %v3289_v27 = vsub.f32 %v3225_v51, %v3257_v58  ;;  %v3417_v10 = vadd.f32 %v3385_v43, %v3353_v38  ;;  %v3195_v30 = vld [vmem:[%s5084_s0 + $0x20] sm:$0xff] }
 0x4a1   : > { %v3072_v50 = vpop.f32.mrf.mxu2  ;;  %v2977_v19 = vpop.f32.mrf.mxu0  ;;  %v3226_v3 = vmul.f32 %v3162_v59, %v6640_v28  ;;  %v3386_v51 = vmul.f32 %v3194_v62, %v6640_v28  ;;  %v3227_v58 = vmul.f32 %v3163_v25, %v6644_v61  ;;  %v3387_v43 = vmul.f32 %v3195_v30, %v6644_v61 }
 0x4a2   : > { %3320 = vst [vmem:[%s6859_s17 + $0x8] sm:$0xff] %v3288_v45  ;;  %v3073_v16 = vadd.f32 %v3072_v50, %v6764_v32  ;;  %v3121_v18 = vpop.f32.mrf.mxu3  ;;  %v2978_v5 = vadd.f32 %v2977_v19, %v6766_v26  ;;  %v3026_v31 = vpop.f32.mrf.mxu1  ;;  %v3164_v19 = vld [vmem:[%s5078_s1 + $0x28] sm:$0xff] }
 0x4a3   : > { %3448 = vst [vmem:[%s6864_s16 + $0x8] sm:$0xff] %v3416_v49 }
 0x4a4   : > { %3321 = vst [vmem:[%s6859_s17 + $0x10] sm:$0xff] %v3289_v27  ;;  %v3122_v0 = vadd.f32 %v3121_v18, %v3073_v16  ;;  %v3027_v6 = vadd.f32 %v3026_v31, %v2978_v5  ;;  %v3165_v31 = vld [vmem:[%s5078_s1 + $0x30] sm:$0xff] }
 0x4a5   : > { %3449 = vst [vmem:[%s6864_s16 + $0x10] sm:$0xff] %v3417_v10 }
 0x4a6   : > { %v3258_v9 = vmul.f32 %v3194_v62, %v3122_v0  ;;  %v3354_v32 = vmul.f32 %v3162_v59, %v3122_v0  ;;  %v3259_v26 = vmul.f32 %v3195_v30, %v3027_v6  ;;  %v3355_v38 = vmul.f32 %v3163_v25, %v3027_v6  ;;  %v3196_v59 = vld [vmem:[%s5084_s0 + $0x28] sm:$0xff]  ;;  %v3197_v0 = vld [vmem:[%s5084_s0 + $0x30] sm:$0xff] }
 0x4a7   : > { %v3228_v30 = vmul.f32 %v3164_v19, %v6650_v17 }
 0x4a8   : > { %v3290_v45 = vsub.f32 %v3226_v3, %v3258_v9  ;;  %v3418_v49 = vadd.f32 %v3386_v51, %v3354_v32  ;;  %v3291_v27 = vsub.f32 %v3227_v58, %v3259_v26  ;;  %v3419_v10 = vadd.f32 %v3387_v43, %v3355_v38 }
 0x4a9   : > { %v3075_v50 = vpop.f32.mrf.mxu2  ;;  %v2979_v18 = vpop.f32.mrf.mxu0  ;;  %v3388_v3 = vmul.f32 %v3196_v59, %v6650_v17  ;;  %v3229_v9 = vmul.f32 %v3165_v31, %v6653_v56  ;;  %v3389_v51 = vmul.f32 %v3197_v0, %v6653_v56 }
 0x4aa   : > { %3322 = vst [vmem:[%s6859_s17 + $0x18] sm:$0xff] %v3290_v45  ;;  %v3076_v16 = vadd.f32 %v3075_v50, %v6772_v47  ;;  %v3124_v28 = vpop.f32.mrf.mxu3  ;;  %v2980_v62 = vadd.f32 %v2979_v18, %v6774_v54  ;;  %v3028_v5 = vpop.f32.mrf.mxu1  ;;  %v3198_v50 = vld [vmem:[%s5084_s0 + $0x38] sm:$0xff]  ;;  %v3167_v18 = vld [vmem:[%s5078_s1 + $0x40] sm:$0xff] }
 0x4ab   : > { %3450 = vst [vmem:[%s6864_s16 + $0x18] sm:$0xff] %v3418_v49 }
 0x4ac   : > { %3323 = vst [vmem:[%s6859_s17 + $0x20] sm:$0xff] %v3291_v27  ;;  %v3125_v61 = vadd.f32 %v3124_v28, %v3076_v16  ;;  %v3029_v25 = vadd.f32 %v3028_v5, %v2980_v62 }
 0x4ad   : > { %3451 = vst [vmem:[%s6864_s16 + $0x20] sm:$0xff] %v3419_v10  ;;  %v3166_v10 = vld [vmem:[%s5078_s1 + $0x38] sm:$0xff] }
 0x4ae   : > { %v3260_v6 = vmul.f32 %v3196_v59, %v3125_v61  ;;  %v3356_v47 = vmul.f32 %v3164_v19, %v3125_v61  ;;  %v3261_v54 = vmul.f32 %v3197_v0, %v3029_v25  ;;  %v3357_v32 = vmul.f32 %v3165_v31, %v3029_v25  ;;  %v3199_v19 = vld [vmem:[%s5084_s0 + $0x40] sm:$0xff] }
 0x4af   : > { %v3230_v62 = vmul.f32 %v3166_v10, %v6656_v15  ;;  %v3390_v61 = vmul.f32 %v3198_v50, %v6656_v15  ;;  %v3231_v31 = vmul.f32 %v3167_v18, %v6660_v48  ;;  %v3391_v25 = vmul.f32 %v3199_v19, %v6660_v48 }
 0x4b0   : > { %v3292_v58 = vsub.f32 %v3228_v30, %v3260_v6  ;;  %v3420_v26 = vadd.f32 %v3388_v3, %v3356_v47  ;;  %v3293_v38 = vsub.f32 %v3229_v9, %v3261_v54  ;;  %v3421_v43 = vadd.f32 %v3389_v51, %v3357_v32  ;;  %v3168_v51 = vld [vmem:[%s5078_s1 + $0x48] sm:$0xff] }
 0x4b1   : > { %v3077_v45 = vpop.f32.mrf.mxu2  ;;  %v2982_v27 = vpop.f32.mrf.mxu0 }
 0x4b2   : > { %3324 = vst [vmem:[%s6859_s17 + $0x28] sm:$0xff] %v3292_v58  ;;  %v3078_v49 = vadd.f32 %v3077_v45, %v6776_v37  ;;  %v3126_v17 = vpop.f32.mrf.mxu3  ;;  %v2983_v16 = vadd.f32 %v2982_v27, %v6778_v41  ;;  %v3031_v28 = vpop.f32.mrf.mxu1  ;;  %v3200_v58 = vld [vmem:[%s5084_s0 + $0x48] sm:$0xff]  ;;  %v3201_v45 = vld [vmem:[%s5084_s0 + $0x50] sm:$0xff] }
 0x4b3   : > { %3452 = vst [vmem:[%s6864_s16 + $0x28] sm:$0xff] %v3420_v26 }
 0x4b4   : > { %3325 = vst [vmem:[%s6859_s17 + $0x30] sm:$0xff] %v3293_v38  ;;  %v3127_v56 = vadd.f32 %v3126_v17, %v3078_v49  ;;  %v3032_v59 = vadd.f32 %v3031_v28, %v2983_v16  ;;  %v3232_v17 = vmul.f32 %v3168_v51, %v6666_v22  ;;  %v3393_v28 = vmul.f32 %v3201_v45, %v6669_v57 }
 0x4b5   : > { %3453 = vst [vmem:[%s6864_s16 + $0x30] sm:$0xff] %v3421_v43  ;;  %v3169_v43 = vld [vmem:[%s5078_s1 + $0x50] sm:$0xff] }
 0x4b6   : > { %v3262_v5 = vmul.f32 %v3198_v50, %v3127_v56  ;;  %v3358_v37 = vmul.f32 %v3166_v10, %v3127_v56  ;;  %v3263_v41 = vmul.f32 %v3199_v19, %v3032_v59  ;;  %v3359_v0 = vmul.f32 %v3167_v18, %v3032_v59 }
 0x4b7   : > { %v3392_v10 = vmul.f32 %v3200_v58, %v6666_v22  ;;  %v3233_v50 = vmul.f32 %v3169_v43, %v6669_v57 }
 0x4b8   : > { %v3294_v30 = vsub.f32 %v3230_v62, %v3262_v5  ;;  %v3422_v6 = vadd.f32 %v3390_v61, %v3358_v37  ;;  %v3295_v47 = vsub.f32 %v3231_v31, %v3263_v41  ;;  %v3423_v3 = vadd.f32 %v3391_v25, %v3359_v0  ;;  %v3170_v61 = vld [vmem:[%s5078_s1 + $0x58] sm:$0xff]  ;;  %v3171_v25 = vld [vmem:[%s5078_s1 + $0x60] sm:$0xff] }
 0x4b9   : > { %v3080_v9 = vpop.f32.mrf.mxu2  ;;  %v2984_v32 = vpop.f32.mrf.mxu0  ;;  %v3202_v31 = vld [vmem:[%s5084_s0 + $0x58] sm:$0xff] }
 0x4ba   : > { %3326 = vst [vmem:[%s6859_s17 + $0x38] sm:$0xff] %v3294_v30  ;;  %v3081_v54 = vadd.f32 %v3080_v9, %v6784_v55  ;;  %v3129_v15 = vpop.f32.mrf.mxu3  ;;  %v2985_v26 = vadd.f32 %v2984_v32, %v6786_v36  ;;  %v3033_v38 = vpop.f32.mrf.mxu1  ;;  %v3203_v30 = vld [vmem:[%s5084_s0 + $0x60] sm:$0xff]  ;;  %v3394_v9 = vmul.f32 %v3202_v31, %v6672_v46 }
 0x4bb   : > { %3454 = vst [vmem:[%s6864_s16 + $0x38] sm:$0xff] %v3422_v6  ;;  %v3395_v32 = vmul.f32 %v3203_v30, %v6676_v2 }
 0x4bc   : > { %3327 = vst [vmem:[%s6859_s17 + $0x40] sm:$0xff] %v3295_v47  ;;  %v3130_v48 = vadd.f32 %v3129_v15, %v3081_v54  ;;  %v3034_v49 = vadd.f32 %v3033_v38, %v2985_v26  ;;  %v3234_v47 = vmul.f32 %v3170_v61, %v6672_v46  ;;  %v3235_v54 = vmul.f32 %v3171_v25, %v6676_v2 }
 0x4bd   : > { %3455 = vst [vmem:[%s6864_s16 + $0x40] sm:$0xff] %v3423_v3 }
 0x4be   : > { %v3264_v27 = vmul.f32 %v3200_v58, %v3130_v48  ;;  %v3360_v55 = vmul.f32 %v3168_v51, %v3130_v48  ;;  %v3265_v36 = vmul.f32 %v3201_v45, %v3034_v49  ;;  %v3361_v16 = vmul.f32 %v3169_v43, %v3034_v49  ;;  %v3172_v49 = vld [vmem:[%s5078_s1 + $0x68] sm:$0xff] }
 0x4c0   : > { %v3296_v56 = vsub.f32 %v3232_v17, %v3264_v27  ;;  %v3424_v18 = vadd.f32 %v3392_v10, %v3360_v55  ;;  %v3297_v19 = vsub.f32 %v3233_v50, %v3265_v36  ;;  %v3425_v59 = vadd.f32 %v3393_v28, %v3361_v16  ;;  %v3204_v17 = vld [vmem:[%s5084_s0 + $0x68] sm:$0xff]  ;;  %v3173_v10 = vld [vmem:[%s5078_s1 + $0x70] sm:$0xff] }
 0x4c1   : > { %v3082_v62 = vpop.f32.mrf.mxu2  ;;  %v2987_v37 = vpop.f32.mrf.mxu0  ;;  %v3205_v50 = vld [vmem:[%s5084_s0 + $0x70] sm:$0xff]  ;;  %v3236_v16 = vmul.f32 %v3172_v49, %v6682_v1 }
 0x4c2   : > { %3328 = vst [vmem:[%s6859_s17 + $0x48] sm:$0xff] %v3296_v56  ;;  %v3083_v5 = vadd.f32 %v3082_v62, %v6788_v7  ;;  %v3131_v22 = vpop.f32.mrf.mxu3  ;;  %v2988_v41 = vadd.f32 %v2987_v37, %v6790_v13  ;;  %v3036_v0 = vpop.f32.mrf.mxu1  ;;  %v3396_v56 = vmul.f32 %v3204_v17, %v6682_v1 }
 0x4c3   : > { %3456 = vst [vmem:[%s6864_s16 + $0x48] sm:$0xff] %v3424_v18  ;;  %v3237_v18 = vmul.f32 %v3173_v10, %v6685_v34 }
 0x4c4   : > { %3329 = vst [vmem:[%s6859_s17 + $0x50] sm:$0xff] %v3297_v19  ;;  %v3132_v57 = vadd.f32 %v3131_v22, %v3083_v5  ;;  %v3037_v6 = vadd.f32 %v3036_v0, %v2988_v41  ;;  %v3174_v0 = vld [vmem:[%s5078_s1 + $0x78] sm:$0xff] }
 0x4c5   : > { %3457 = vst [vmem:[%s6864_s16 + $0x50] sm:$0xff] %v3425_v59  ;;  %v3397_v59 = vmul.f32 %v3205_v50, %v6685_v34 }
 0x4c6   : > { %v3266_v3 = vmul.f32 %v3202_v31, %v3132_v57  ;;  %v3362_v7 = vmul.f32 %v3170_v61, %v3132_v57  ;;  %v3267_v13 = vmul.f32 %v3203_v30, %v3037_v6  ;;  %v3363_v15 = vmul.f32 %v3171_v25, %v3037_v6  ;;  %v3206_v57 = vld [vmem:[%s5084_s0 + $0x78] sm:$0xff]  ;;  %v3175_v6 = vld [vmem:[%s5078_s1 + $0x80] sm:$0xff] }
 0x4c8   : > { %v3298_v51 = vsub.f32 %v3234_v47, %v3266_v3  ;;  %v3426_v58 = vadd.f32 %v3394_v9, %v3362_v7  ;;  %v3299_v26 = vsub.f32 %v3235_v54, %v3267_v13  ;;  %v3427_v38 = vadd.f32 %v3395_v32, %v3363_v15  ;;  %v3207_v47 = vld [vmem:[%s5084_s0 + $0x80] sm:$0xff] }
 0x4c9   : > { %v3085_v48 = vpop.f32.mrf.mxu2  ;;  %v2989_v45 = vpop.f32.mrf.mxu0  ;;  %v3238_v7 = vmul.f32 %v3174_v0, %v6688_v33  ;;  %v3398_v54 = vmul.f32 %v3206_v57, %v6688_v33  ;;  %v3239_v13 = vmul.f32 %v3175_v6, %v6692_v53  ;;  %v3399_v32 = vmul.f32 %v3207_v47, %v6692_v53 }
 0x4ca   : > { %3330 = vst [vmem:[%s6859_s17 + $0x58] sm:$0xff] %v3298_v51  ;;  %v3086_v43 = vadd.f32 %v3085_v48, %v6796_v20  ;;  %v3134_v46 = vpop.f32.mrf.mxu3  ;;  %v2990_v27 = vadd.f32 %v2989_v45, %v6798_v14  ;;  %v3038_v55 = vpop.f32.mrf.mxu1  ;;  %v3176_v45 = vld [vmem:[%s5078_s1 + $0x88] sm:$0xff] }
 0x4cb   : > { %3458 = vst [vmem:[%s6864_s16 + $0x58] sm:$0xff] %v3426_v58 }
 0x4cc   : > { %3331 = vst [vmem:[%s6859_s17 + $0x60] sm:$0xff] %v3299_v26  ;;  %v3135_v2 = vadd.f32 %v3134_v46, %v3086_v43  ;;  %v3039_v36 = vadd.f32 %v3038_v55, %v2990_v27  ;;  %v3177_v55 = vld [vmem:[%s5078_s1 + $0x90] sm:$0xff] }
 0x4cd   : > { %3459 = vst [vmem:[%s6864_s16 + $0x60] sm:$0xff] %v3427_v38 }
 0x4ce   : > { %v3268_v28 = vmul.f32 %v3204_v17, %v3135_v2  ;;  %v3364_v20 = vmul.f32 %v3172_v49, %v3135_v2  ;;  %v3269_v14 = vmul.f32 %v3205_v50, %v3039_v36  ;;  %v3365_v19 = vmul.f32 %v3173_v10, %v3039_v36  ;;  %v3208_v49 = vld [vmem:[%s5084_s0 + $0x88] sm:$0xff]  ;;  %v3209_v2 = vld [vmem:[%s5084_s0 + $0x90] sm:$0xff] }
 0x4cf   : > { %v3240_v50 = vmul.f32 %v3176_v45, %v6698_v21 }
 0x4d0   : > { %v3300_v62 = vsub.f32 %v3236_v16, %v3268_v28  ;;  %v3428_v5 = vadd.f32 %v3396_v56, %v3364_v20  ;;  %v3301_v22 = vsub.f32 %v3237_v18, %v3269_v14  ;;  %v3429_v37 = vadd.f32 %v3397_v59, %v3365_v19 }
 0x4d1   : > { %v3087_v61 = vpop.f32.mrf.mxu2  ;;  %v2992_v41 = vpop.f32.mrf.mxu0  ;;  %v3400_v16 = vmul.f32 %v3208_v49, %v6698_v21  ;;  %v3241_v28 = vmul.f32 %v3177_v55, %v6701_v23  ;;  %v3401_v56 = vmul.f32 %v3209_v2, %v6701_v23 }
 0x4d2   : > { %3332 = vst [vmem:[%s6859_s17 + $0x68] sm:$0xff] %v3300_v62  ;;  %v3088_v31 = vadd.f32 %v3087_v61, %v6800_v44  ;;  %v3136_v1 = vpop.f32.mrf.mxu3  ;;  %v2993_v25 = vadd.f32 %v2992_v41, %v6802_v42  ;;  %v3041_v30 = vpop.f32.mrf.mxu1  ;;  %v3210_v61 = vld [vmem:[%s5084_s0 + $0x98] sm:$0xff]  ;;  %v3179_v41 = vld [vmem:[%s5078_s1 + $0xa0] sm:$0xff] }
 0x4d3   : > { %3460 = vst [vmem:[%s6864_s16 + $0x68] sm:$0xff] %v3428_v5 }
 0x4d4   : > { %3333 = vst [vmem:[%s6859_s17 + $0x70] sm:$0xff] %v3301_v22  ;;  %v3137_v34 = vadd.f32 %v3136_v1, %v3088_v31  ;;  %v3042_v3 = vadd.f32 %v3041_v30, %v2993_v25 }
 0x4d5   : > { %3461 = vst [vmem:[%s6864_s16 + $0x70] sm:$0xff] %v3429_v37  ;;  %v3178_v37 = vld [vmem:[%s5078_s1 + $0x98] sm:$0xff] }
 0x4d6   : > { %v3270_v9 = vmul.f32 %v3206_v57, %v3137_v34  ;;  %v3366_v44 = vmul.f32 %v3174_v0, %v3137_v34  ;;  %v3271_v42 = vmul.f32 %v3207_v47, %v3042_v3  ;;  %v3367_v15 = vmul.f32 %v3175_v6, %v3042_v3  ;;  %v3211_v0 = vld [vmem:[%s5084_s0 + $0xa0] sm:$0xff] }
 0x4d7   : > { %v3242_v25 = vmul.f32 %v3178_v37, %v6704_v40  ;;  %v3402_v34 = vmul.f32 %v3210_v61, %v6704_v40  ;;  %v3243_v6 = vmul.f32 %v3179_v41, %v6708_v12  ;;  %v3403_v3 = vmul.f32 %v3211_v0, %v6708_v12 }
 0x4d8   : > { %v3302_v51 = vsub.f32 %v3238_v7, %v3270_v9  ;;  %v3430_v58 = vadd.f32 %v3398_v54, %v3366_v44  ;;  %v3303_v26 = vsub.f32 %v3239_v13, %v3271_v42  ;;  %v3431_v38 = vadd.f32 %v3399_v32, %v3367_v15  ;;  %v3180_v32 = vld [vmem:[%s5078_s1 + $0xa8] sm:$0xff] }
 0x4d9   : > { %v3090_v48 = vpop.f32.mrf.mxu2  ;;  %v2994_v46 = vpop.f32.mrf.mxu0 }
 0x4da   : > { %3334 = vst [vmem:[%s6859_s17 + $0x78] sm:$0xff] %v3302_v51  ;;  %v3091_v43 = vadd.f32 %v3090_v48, %v6808_v63  ;;  %v3139_v33 = vpop.f32.mrf.mxu3  ;;  %v2995_v17 = vadd.f32 %v2994_v46, %v6810_v24  ;;  %v3043_v27 = vpop.f32.mrf.mxu1  ;;  %v3212_v51 = vld [vmem:[%s5084_s0 + $0xa8] sm:$0xff]  ;;  %v3213_v48 = vld [vmem:[%s5084_s0 + $0xb0] sm:$0xff] }
 0x4db   : > { %3462 = vst [vmem:[%s6864_s16 + $0x78] sm:$0xff] %v3430_v58 }
 0x4dc   : > { %3335 = vst [vmem:[%s6859_s17 + $0x80] sm:$0xff] %v3303_v26  ;;  %v3140_v53 = vadd.f32 %v3139_v33, %v3091_v43  ;;  %v3044_v10 = vadd.f32 %v3043_v27, %v2995_v17  ;;  %v3244_v33 = vmul.f32 %v3180_v32, %v6714_v4  ;;  %v3405_v27 = vmul.f32 %v3213_v48, %v6717_v35 }
 0x4dd   : > { %3463 = vst [vmem:[%s6864_s16 + $0x80] sm:$0xff] %v3431_v38  ;;  %v3181_v38 = vld [vmem:[%s5078_s1 + $0xb0] sm:$0xff] }
 0x4de   : > { %v3272_v36 = vmul.f32 %v3208_v49, %v3140_v53  ;;  %v3368_v63 = vmul.f32 %v3176_v45, %v3140_v53  ;;  %v3273_v24 = vmul.f32 %v3209_v2, %v3044_v10  ;;  %v3369_v20 = vmul.f32 %v3177_v55, %v3044_v10 }
 0x4df   : > { %v3404_v45 = vmul.f32 %v3212_v51, %v6714_v4  ;;  %v3245_v49 = vmul.f32 %v3181_v38, %v6717_v35 }
 0x4e0   : > { %v3304_v18 = vsub.f32 %v3240_v50, %v3272_v36  ;;  %v3432_v14 = vadd.f32 %v3400_v16, %v3368_v63  ;;  %v3305_v19 = vsub.f32 %v3241_v28, %v3273_v24  ;;  %v3433_v59 = vadd.f32 %v3401_v56, %v3369_v20  ;;  %v3182_v16 = vld [vmem:[%s5078_s1 + $0xb8] sm:$0xff]  ;;  %v3183_v56 = vld [vmem:[%s5078_s1 + $0xc0] sm:$0xff] }
 0x4e1   : > { %v3092_v62 = vpop.f32.mrf.mxu2  ;;  %v2997_v22 = vpop.f32.mrf.mxu0  ;;  %v3214_v28 = vld [vmem:[%s5084_s0 + $0xb8] sm:$0xff] }
 0x4e2   : > { %3336 = vst [vmem:[%s6859_s17 + $0x88] sm:$0xff] %v3304_v18  ;;  %v3093_v5 = vadd.f32 %v3092_v62, %v6812_v29  ;;  %v3141_v21 = vpop.f32.mrf.mxu3  ;;  %v2998_v31 = vadd.f32 %v2997_v22, %v6814_v11  ;;  %v3046_v1 = vpop.f32.mrf.mxu1  ;;  %v3215_v18 = vld [vmem:[%s5084_s0 + $0xc0] sm:$0xff] }
 0x4e3   : > { %3464 = vst [vmem:[%s6864_s16 + $0x88] sm:$0xff] %v3432_v14 }
 0x4e4   : > { %3337 = vst [vmem:[%s6859_s17 + $0x90] sm:$0xff] %v3305_v19  ;;  %v3142_v23 = vadd.f32 %v3141_v21, %v3093_v5  ;;  %v3047_v57 = vadd.f32 %v3046_v1, %v2998_v31  ;;  %v7395_v19 = vld [vmem:[#allocation44_spill] sm:$0xff]  ;;  %v7396_v21 = vld [vmem:[#allocation21_spill] sm:$0xff] }
 0x4e5   : > { %3465 = vst [vmem:[%s6864_s16 + $0x90] sm:$0xff] %v3433_v59  ;;  %v3246_v59 = vmul.f32 %v3182_v16, %v7395_v19  ;;  %v3406_v5 = vmul.f32 %v3214_v28, %v7395_v19  ;;  %v3247_v22 = vmul.f32 %v3183_v56, %v7396_v21 }
 0x4e6   : > { %v3274_v30 = vmul.f32 %v3210_v61, %v3142_v23  ;;  %v3370_v29 = vmul.f32 %v3178_v37, %v3142_v23  ;;  %v3275_v11 = vmul.f32 %v3211_v0, %v3047_v57  ;;  %v3371_v47 = vmul.f32 %v3179_v41, %v3047_v57  ;;  %v7397_v57 = vld [vmem:[#allocation47_spill] sm:$0xff] }
 0x4e7   : > { %v3407_v61 = vmul.f32 %v3215_v18, %v7396_v21 }
 0x4e8   : > { %v3306_v7 = vsub.f32 %v3242_v25, %v3274_v30  ;;  %v3434_v9 = vadd.f32 %v3402_v34, %v3370_v29  ;;  %v3307_v44 = vsub.f32 %v3243_v6, %v3275_v11  ;;  %v3435_v54 = vadd.f32 %v3403_v3, %v3371_v47  ;;  %v3184_v34 = vld [vmem:[%s5078_s1 + $0xc8] sm:$0xff] }
 0x4e9   : > { %v3095_v13 = vpop.f32.mrf.mxu2  ;;  %v2999_v15 = vpop.f32.mrf.mxu0  ;;  %v3216_v6 = vld [vmem:[%s5084_s0 + $0xc8] sm:$0xff] }
 0x4ea   : > { %3338 = vst [vmem:[%s6859_s17 + $0x98] sm:$0xff] %v3306_v7  ;;  %v3096_v42 = vadd.f32 %v3095_v13, %v6820_v52  ;;  %v3144_v40 = vpop.f32.mrf.mxu3  ;;  %v3000_v58 = vadd.f32 %v2999_v15, %v6822_v8  ;;  %v3048_v26 = vpop.f32.mrf.mxu1  ;;  %v7398_v11 = vld [vmem:[#allocation48_spill] sm:$0xff]  ;;  %v7399_v13 = vld [vmem:[#allocation22_spill] sm:$0xff] }
 0x4eb   : > { %3466 = vst [vmem:[%s6864_s16 + $0x98] sm:$0xff] %v3434_v9  ;;  %v3185_v9 = vld [vmem:[%s5078_s1 + $0xd0] sm:$0xff] }
 0x4ec   : > { %3339 = vst [vmem:[%s6859_s17 + $0xa0] sm:$0xff] %v3307_v44  ;;  %v3145_v12 = vadd.f32 %v3144_v40, %v3096_v42  ;;  %v3049_v43 = vadd.f32 %v3048_v26, %v3000_v58  ;;  %v3217_v44 = vld [vmem:[%s5084_s0 + $0xd0] sm:$0xff]  ;;  %v3248_v42 = vmul.f32 %v3184_v34, %v7399_v13 }
 0x4ed   : > { %3467 = vst [vmem:[%s6864_s16 + $0xa0] sm:$0xff] %v3435_v54 }
 0x4ee   : > { %v3276_v46 = vmul.f32 %v3212_v51, %v3145_v12  ;;  %v3372_v52 = vmul.f32 %v3180_v32, %v3145_v12  ;;  %v3277_v8 = vmul.f32 %v3213_v48, %v3049_v43  ;;  %v3373_v17 = vmul.f32 %v3181_v38, %v3049_v43  ;;  %v7400_v51 = vld [vmem:[#allocation59_spill] sm:$0xff] }
 0x4ef   : > { %v3408_v32 = vmul.f32 %v3216_v6, %v7399_v13  ;;  %v3249_v58 = vmul.f32 %v3185_v9, %v7400_v51  ;;  %v3409_v38 = vmul.f32 %v3217_v44, %v7400_v51 }
 0x4f0   : > { %v3308_v53 = vsub.f32 %v3244_v33, %v3276_v46  ;;  %v3436_v55 = vadd.f32 %v3404_v45, %v3372_v52  ;;  %v3309_v2 = vsub.f32 %v3245_v49, %v3277_v8  ;;  %v3437_v10 = vadd.f32 %v3405_v27, %v3373_v17  ;;  %v7401_v45 = vld [vmem:[#allocation25_spill] sm:$0xff]  ;;  %v3186_v27 = vld [vmem:[%s5078_s1 + $0xd8] sm:$0xff] }
 0x4f1   : > { %v3097_v50 = vpop.f32.mrf.mxu2  ;;  %v3002_v63 = vpop.f32.mrf.mxu0 }
 0x4f2   : > { %3340 = vst [vmem:[%s6859_s17 + $0xa8] sm:$0xff] %v3308_v53  ;;  %v3098_v36 = vadd.f32 %v3097_v50, %v6824_v39  ;;  %v3146_v4 = vpop.f32.mrf.mxu3  ;;  %v3003_v24 = vadd.f32 %v3002_v63, %v6826_v60  ;;  %v3051_v20 = vpop.f32.mrf.mxu1  ;;  %v3218_v53 = vld [vmem:[%s5084_s0 + $0xd8] sm:$0xff] }
 0x4f3   : > { %3468 = vst [vmem:[%s6864_s16 + $0xa8] sm:$0xff] %v3436_v55  ;;  %v7402_v55 = vld [vmem:[#allocation26_spill] sm:$0xff] }
 0x4f4   : > { %3341 = vst [vmem:[%s6859_s17 + $0xb0] sm:$0xff] %v3309_v2  ;;  %v3147_v35 = vadd.f32 %v3146_v4, %v3098_v36  ;;  %v3052_v14 = vadd.f32 %v3051_v20, %v3003_v24  ;;  %v3187_v36 = vld [vmem:[%s5078_s1 + $0xe0] sm:$0xff] }
 0x4f5   : > { %3469 = vst [vmem:[%s6864_s16 + $0xb0] sm:$0xff] %v3437_v10  ;;  %v3219_v4 = vld [vmem:[%s5084_s0 + $0xe0] sm:$0xff] }
 0x4f6   : > { %v3278_v62 = vmul.f32 %v3214_v28, %v3147_v35  ;;  %v3374_v39 = vmul.f32 %v3182_v16, %v3147_v35  ;;  %v3279_v60 = vmul.f32 %v3215_v18, %v3052_v14  ;;  %v3375_v37 = vmul.f32 %v3183_v56, %v3052_v14  ;;  %v7403_v16 = vld [vmem:[#allocation60_spill] sm:$0xff] }
 0x4f7   : > { %v3250_v28 = vmul.f32 %v3186_v27, %v7403_v16  ;;  %v3410_v35 = vmul.f32 %v3218_v53, %v7403_v16  ;;  %v7404_v56 = vld [vmem:[#allocation20_spill] sm:$0xff] }
 0x4f8   : > { %v3310_v31 = vsub.f32 %v3246_v59, %v3278_v62  ;;  %v3438_v1 = vadd.f32 %v3406_v5, %v3374_v39  ;;  %v3311_v23 = vsub.f32 %v3247_v22, %v3279_v60  ;;  %v3439_v41 = vadd.f32 %v3407_v61, %v3375_v37  ;;  %v7405_v60 = vld [vmem:[#allocation63_spill] sm:$0xff] }
 0x4f9   : > { %v3100_v0 = vpop.f32.mrf.mxu2  ;;  %v3004_v29 = vpop.f32.mrf.mxu0  ;;  %v3251_v18 = vmul.f32 %v3187_v36, %v7404_v56  ;;  %v3411_v59 = vmul.f32 %v3219_v4, %v7404_v56 }
 0x4fa   : > { %3342 = vst [vmem:[%s6859_s17 + $0xb8] sm:$0xff] %v3310_v31  ;;  %v3101_v25 = vadd.f32 %v3100_v0, %v7397_v57  ;;  %v3149_v30 = vpop.f32.mrf.mxu3  ;;  %v3005_v47 = vadd.f32 %v3004_v29, %v7398_v11  ;;  %v3053_v3 = vpop.f32.mrf.mxu1  ;;  %v3221_v29 = vld [vmem:[%s5084_s0 + $0xf0] sm:$0xff] }
 0x4fb   : > { %3470 = vst [vmem:[%s6864_s16 + $0xb8] sm:$0xff] %v3438_v1  ;;  %v3188_v1 = vld [vmem:[%s5078_s1 + $0xe8] sm:$0xff] }
 0x4fc   : > { %3343 = vst [vmem:[%s6859_s17 + $0xc0] sm:$0xff] %v3311_v23  ;;  %v3150_v7 = vadd.f32 %v3149_v30, %v3101_v25  ;;  %v3054_v54 = vadd.f32 %v3053_v3, %v3005_v47  ;;  %v3220_v23 = vld [vmem:[%s5084_s0 + $0xe8] sm:$0xff]  ;;  %v3189_v30 = vld [vmem:[%s5078_s1 + $0xf0] sm:$0xff] }
 0x4fd   : > { %3471 = vst [vmem:[%s6864_s16 + $0xc0] sm:$0xff] %v3439_v41  ;;  %v7406_v41 = vld [vmem:[#allocation64_spill] sm:$0xff] }
 0x4fe   : > { %v3280_v40 = vmul.f32 %v3216_v6, %v3150_v7  ;;  %v3376_v15 = vmul.f32 %v3184_v34, %v3150_v7  ;;  %v3281_v26 = vmul.f32 %v3217_v44, %v3054_v54  ;;  %v3377_v12 = vmul.f32 %v3185_v9, %v3054_v54  ;;  %v7407_v6 = vld [vmem:[#allocation46_spill] sm:$0xff]  ;;  %v7408_v9 = vld [vmem:[#allocation23_spill] sm:$0xff] }
 0x4ff   : > { %v3252_v11 = vmul.f32 %v3188_v1, %v7407_v6  ;;  %v3412_v7 = vmul.f32 %v3220_v23, %v7407_v6  ;;  %v3253_v44 = vmul.f32 %v3189_v30, %v7408_v9 }
 0x500   : > { %v3312_v48 = vsub.f32 %v3248_v42, %v3280_v40  ;;  %v3440_v43 = vadd.f32 %v3408_v32, %v3376_v15  ;;  %v3313_v33 = vsub.f32 %v3249_v58, %v3281_v26  ;;  %v3441_v46 = vadd.f32 %v3409_v38, %v3377_v12  ;;  %v7409_v26 = vld [vmem:[#allocation49_spill] sm:$0xff] }
 0x501   : > { %v3102_v52 = vpop.f32.mrf.mxu2  ;;  %v3007_v17 = vpop.f32.mrf.mxu0  ;;  %v3413_v42 = vmul.f32 %v3221_v29, %v7408_v9 }
 0x502   : > { %3344 = vst [vmem:[%s6859_s17 + $0xc8] sm:$0xff] %v3312_v48  ;;  %v3103_v49 = vadd.f32 %v3102_v52, %v7401_v45  ;;  %v3151_v8 = vpop.f32.mrf.mxu3  ;;  %v3008_v2 = vadd.f32 %v3007_v17, %v7402_v55  ;;  %v3056_v10 = vpop.f32.mrf.mxu1  ;;  %v3190_v48 = vld [vmem:[%s5078_s1 + $0xf8] sm:$0xff] }
 0x503   : > { %3472 = vst [vmem:[%s6864_s16 + $0xc8] sm:$0xff] %v3440_v43  ;;  %v3222_v43 = vld [vmem:[%s5084_s0 + $0xf8] sm:$0xff] }
 0x504   : > { %3345 = vst [vmem:[%s6859_s17 + $0xd0] sm:$0xff] %v3313_v33  ;;  %v3152_v50 = vadd.f32 %v3151_v8, %v3103_v49  ;;  %v3057_v63 = vadd.f32 %v3056_v10, %v3008_v2 }
 0x505   : > { %3473 = vst [vmem:[%s6864_s16 + $0xd0] sm:$0xff] %v3441_v46  ;;  %v7410_v46 = vld [vmem:[#allocation24_spill] sm:$0xff] }
 0x506   : > { %v3282_v24 = vmul.f32 %v3218_v53, %v3152_v50  ;;  %v3378_v20 = vmul.f32 %v3186_v27, %v3152_v50  ;;  %v3283_v14 = vmul.f32 %v3219_v4, %v3057_v63  ;;  %v3379_v19 = vmul.f32 %v3187_v36, %v3057_v63 }
 0x507   : > { %v3254_v52 = vmul.f32 %v3190_v48, %v7410_v46  ;;  %v3414_v8 = vmul.f32 %v3222_v43, %v7410_v46 }
 0x508   : > { %v3314_v62 = vsub.f32 %v3250_v28, %v3282_v24  ;;  %v3442_v39 = vadd.f32 %v3410_v35, %v3378_v20  ;;  %v3315_v5 = vsub.f32 %v3251_v18, %v3283_v14  ;;  %v3443_v21 = vadd.f32 %v3411_v59, %v3379_v19 }
 0x509   : > { %v3105_v22 = vpop.f32.mrf.mxu2  ;;  %v3009_v31 = vpop.f32.mrf.mxu0 }
 0x50a   : > { %3346 = vst [vmem:[%s6859_s17 + $0xd8] sm:$0xff] %v3314_v62  ;;  %v3106_v37 = vadd.f32 %v3105_v22, %v7405_v60  ;;  %v3154_v61 = vpop.f32.mrf.mxu3  ;;  %v3010_v0 = vadd.f32 %v3009_v31, %v7406_v41  ;;  %v3058_v25 = vpop.f32.mrf.mxu1 }
 0x50b   : > { %3474 = vst [vmem:[%s6864_s16 + $0xd8] sm:$0xff] %v3442_v39 }
 0x50c   : > { %3347 = vst [vmem:[%s6859_s17 + $0xe0] sm:$0xff] %v3315_v5  ;;  %v3155_v57 = vadd.f32 %v3154_v61, %v3106_v37  ;;  %v3059_v34 = vadd.f32 %v3058_v25, %v3010_v0 }
 0x50d   : > { %3475 = vst [vmem:[%s6864_s16 + $0xe0] sm:$0xff] %v3443_v21 }
 0x50e   : > { %v3284_v47 = vmul.f32 %v3220_v23, %v3155_v57  ;;  %v3380_v3 = vmul.f32 %v3188_v1, %v3155_v57  ;;  %v3285_v54 = vmul.f32 %v3221_v29, %v3059_v34  ;;  %v3381_v13 = vmul.f32 %v3189_v30, %v3059_v34 }
 0x510   : > { %v3316_v40 = vsub.f32 %v3252_v11, %v3284_v47  ;;  %v3444_v15 = vadd.f32 %v3412_v7, %v3380_v3  ;;  %v3317_v32 = vsub.f32 %v3253_v44, %v3285_v54  ;;  %v3445_v51 = vadd.f32 %v3413_v42, %v3381_v13 }
 0x511   : > { %v3107_v58 = vpop.f32.mrf.mxu2 }
 0x512   : > { %3348 = vst [vmem:[%s6859_s17 + $0xe8] sm:$0xff] %v3316_v40  ;;  %v3108_v12 = vadd.f32 %v3107_v58, %v7409_v26  ;;  %v3156_v38 = vpop.f32.mrf.mxu3 }
 0x513   : > { %3476 = vst [vmem:[%s6864_s16 + $0xe8] sm:$0xff] %v3444_v15 }
 0x514   : > { %3349 = vst [vmem:[%s6859_s17 + $0xf0] sm:$0xff] %v3317_v32  ;;  %v3157_v33 = vadd.f32 %v3156_v38, %v3108_v12 }
 0x515   : > { %3477 = vst [vmem:[%s6864_s16 + $0xf0] sm:$0xff] %v3445_v51 }
 0x516   : > { %v3286_v45 = vmul.f32 %v3222_v43, %v3157_v33  ;;  %v3382_v49 = vmul.f32 %v3190_v48, %v3157_v33 }
 0x518   : > { %v3318_v17 = vsub.f32 %v3254_v52, %v3286_v45  ;;  %v3446_v27 = vadd.f32 %v3414_v8, %v3382_v49 }
 0x51a   : > { %3350 = vst [vmem:[%s6859_s17 + $0xf8] sm:$0xff] %v3318_v17 }
 0x51b   : > { %3478 = vst [vmem:[%s6864_s16 + $0xf8] sm:$0xff] %v3446_v27 }
 0x51c PF: > { %s7411_s12 = sld [smem:[#allocation17_spill]]  ;;  %s7413_s30 = smov %s4818_s10 }
 0x51d   : > { %s7412_s20 = sld [smem:[#allocation18_spill]]  ;;  %s7414_s10 = smov %s4822_s11 }
 0x522   : > { %p24_p4 = scmp.ge.s32.totalorder %s7411_s12, 4  }
 0x523   : > { %s7415_s11 = smov %s7412_s20 }
 0x524   :  { %26 = sbr.rel (!%p24_p4) target bundleno = 11 (0xb), region = 147 }
 0x529   :  { %3522 = vsyncpa [#allocation3], 1 }
 0x52a   :  { %3524 = vsyncpa [#allocation3 + $0x1], 1 }
 0x52b   :  { %3525 = vsyncpa [#allocation5], 1 }
 0x52c   :  { %3527 = vsyncpa [#allocation5 + $0x1], 1 }
 0x52d   :  { %3528 = vsyncpa [#allocation8], 1 }

</bundles_post_ra>
